<compile_context>
chip_gen: v7x
topology: tpu7x:2x2x1
jax: 0.10.0
libtpu: 0.0.40
codegen_flags: <defaults>
</compile_context>

<pallas_src>
import functools
import math

import jax
import jax.numpy as jnp
from jax import lax
from jax.experimental import pallas as pl
from jax.experimental.pallas import tpu as pltpu


# Row indices inside the packed per-layer "small vector" input
# (biases + LayerNorm affine parameters), padded to a common lane width.
IDX_B_QKV_S = 0    # width 3*D  fused self-attn q/k/v bias
IDX_BO_S    = 1    # width D
IDX_BQ_C    = 2    # width D
IDX_B_KV_C  = 3    # width 2*D  fused cross-attn k/v bias
IDX_BO_C    = 4    # width D
IDX_B1      = 5    # width F
IDX_B2      = 6    # width D
IDX_G1      = 7
IDX_BE1     = 8
IDX_G2      = 9
IDX_BE2     = 10
IDX_G3      = 11
IDX_BE3     = 12
N_VEC       = 13


def _layer_norm(x, gamma, beta, eps=1e-5):
    mean = jnp.mean(x, axis=-1, keepdims=True)
    var = jnp.mean((x - mean) ** 2, axis=-1, keepdims=True)
    return (x - mean) * lax.rsqrt(var + eps) * gamma + beta


def _mha(q2, k2, v2, batch, s_q, s_k, n_heads, mask_add):
    """Multi-head attention on flattened (batch*seq, D) operands.

    All heads and all batch elements are folded into a single leading einsum
    batch dimension, so each score / PV contraction is one head-batched MXU
    launch.  Only simple 3-D (1,0,2) relayouts are used (known-good lowering).
    Softmax math stays in f32.
    """
    d_model = q2.shape[-1]
    dh = d_model // n_heads
    scale = 1.0 / math.sqrt(dh)

    def split_heads(x2_bf, seq):
        # (batch*seq, D) -> (n_heads*batch, seq, dh)
        xh = x2_bf.reshape(batch * seq, n_heads, dh)
        xh = jnp.transpose(xh, (1, 0, 2))              # (H, batch*seq, dh)
        return xh.reshape(n_heads * batch, seq, dh)

    qh = split_heads((q2 * scale).astype(jnp.bfloat16), s_q)
    kh = split_heads(k2.astype(jnp.bfloat16), s_k)
    vh = split_heads(v2.astype(jnp.bfloat16), s_k)

    # Head+batch-batched score matmul, bf16 operands, f32 accumulation.
    scores = jnp.einsum("bqd,bkd->bqk", qh, kh,
                        preferred_element_type=jnp.float32)    # (H*B, s_q, s_k)
    if mask_add is not None:
        scores = scores + mask_add[None, :, :]

    m = jnp.max(scores, axis=-1, keepdims=True)
    p = jnp.exp(scores - m)
    # EUP approximate reciprocal instead of a VALU divide.
    p = p * pl.reciprocal(jnp.sum(p, axis=-1, keepdims=True), approx=True)

    out = jnp.einsum("bqk,bkd->bqd", p.astype(jnp.bfloat16), vh,
                     preferred_element_type=jnp.float32)       # (H*B, s_q, dh)
    out = out.reshape(n_heads, batch * s_q, dh)
    out = jnp.transpose(out, (1, 0, 2))                        # (B*s_q, H, dh)
    return out.reshape(batch * s_q, d_model)                   # f32 (M, D)


def decoder_block_kernel(n_heads,
                         y_ref, z_ref,
                         w_qkv_s_ref, wo_s_ref, wq_c_ref, w_kv_c_ref, wo_c_ref,
                         w1_ref, w2_ref, vec_ref,
                         y_out_ref, k_state_ref, v_state_ref,
                         mask_ref):
    l = pl.program_id(1)
    nb, s, d = y_out_ref.shape
    l_mem = z_ref.shape[2]
    f = w1_ref.shape[2]
    m_rows = nb * s

    # Layer 0: seed the VMEM-resident residual stream and the causal mask.
    @pl.when(l == 0)
    def _():
        y_out_ref[...] = y_ref[...].astype(y_out_ref.dtype)
        row = lax.broadcasted_iota(jnp.int32, (s, s), 0)
        col = lax.broadcasted_iota(jnp.int32, (s, s), 1)
        mask_ref[...] = jnp.where(col <= row, jnp.float32(0.0),
                                  jnp.float32(-1e30))

    vecs = vec_ref[0]                                  # (16, VEC_W) f32
    causal_mask = mask_ref[...]                        # (s, s) additive f32

    # Residual stream (f32), flattened to (N*S, D) so projections/FFN feed the
    # MXU with a tall LHS instead of S rows per batch element.
    y = y_out_ref[...].astype(jnp.float32).reshape(m_rows, d)
    y_bf = y.astype(jnp.bfloat16)
    z_bf = z_ref[0].reshape(nb * l_mem, -1).astype(jnp.bfloat16)

    def proj(x_bf, w_ref, bias):
        # bf16 x bf16 MXU matmul, f32 accumulation, f32 bias add.
        return jnp.dot(x_bf, w_ref[0], preferred_element_type=jnp.float32) + bias

    # --- causal self-attention (fused Q/K/V projection) ---
    qkv = proj(y_bf, w_qkv_s_ref, vecs[IDX_B_QKV_S, :3 * d])     # (M, 3D)
    q = qkv[:, :d]
    k = qkv[:, d:2 * d]
    v = qkv[:, 2 * d:]
    attn = _mha(q, k, v, nb, s, s, n_heads, causal_mask)
    attn = proj(attn.astype(jnp.bfloat16), wo_s_ref, vecs[IDX_BO_S, :d])
    x = _layer_norm(y + attn, vecs[IDX_G1, :d], vecs[IDX_BE1, :d])

    # --- cross-attention to memory z (full LengthMask -> no masking) ---
    qc = proj(x.astype(jnp.bfloat16), wq_c_ref, vecs[IDX_BQ_C, :d])
    kv_c = proj(z_bf, w_kv_c_ref, vecs[IDX_B_KV_C, :2 * d])      # (N*L, 2D)
    kc = kv_c[:, :d]
    vc = kv_c[:, d:]
    cross = _mha(qc, kc, vc, nb, s, l_mem, n_heads, None)
    cross = proj(cross.astype(jnp.bfloat16), wo_c_ref, vecs[IDX_BO_C, :d])
    x = _layer_norm(x + cross, vecs[IDX_G2, :d], vecs[IDX_BE2, :d])

    # --- feed forward (ReLU) ---
    h = jnp.maximum(proj(x.astype(jnp.bfloat16), w1_ref, vecs[IDX_B1, :f]), 0.0)
    ff = proj(h.astype(jnp.bfloat16), w2_ref, vecs[IDX_B2, :d])
    out = _layer_norm(x + ff, vecs[IDX_G3, :d], vecs[IDX_BE3, :d])

    # y_out stays VMEM-resident across the (arbitrary) layer axis.
    y_out_ref[...] = out.reshape(nb, s, d).astype(y_out_ref.dtype)
    # Recurrent state: cached self-attention keys / values for this layer.
    k_state_ref[0] = k.reshape(nb, s, d).astype(k_state_ref.dtype)
    v_state_ref[0] = v.reshape(nb, s, d).astype(v_state_ref.dtype)


def run_decoder_block(y, zs, layer_params, n_heads, batch_tile=None):
    """One fused pallas_call over all layers. Returns (y_out, [(K, V)] per layer).

    grid = (batch_tiles, num_layers): layer axis is 'arbitrary' (residual
    stream lives in the VMEM output block across it); batch-tile axis is
    'parallel'.  With batch_tile == N (default) weights are DMA'd once per
    layer; on v7x set batch_tile = N // 2 to split across both TensorCores.
    """
    n, s, d = y.shape
    num_layers = len(layer_params)
    z = jnp.stack(zs, axis=0)                       # (Lyr, N, L, Dz)
    _, _, l_mem, dz = z.shape
    f = layer_params[0]["w1"].shape[1]

    if batch_tile is None:
        batch_tile = n
    assert n % batch_tile == 0
    nb = batch_tile
    num_batch_tiles = n // nb

    def stack(name):
        return jnp.stack([p[name] for p in layer_params], axis=0)

    # Fused projection weights, cast once to bf16 (native MXU dtype, half DMA).
    w_qkv_s = jnp.concatenate(
        [stack("wq_s"), stack("wk_s"), stack("wv_s")], axis=-1).astype(jnp.bfloat16)
    wo_s = stack("wo_s").astype(jnp.bfloat16)
    wq_c = stack("wq_c").astype(jnp.bfloat16)
    w_kv_c = jnp.concatenate(
        [stack("wk_c"), stack("wv_c")], axis=-1).astype(jnp.bfloat16)
    wo_c = stack("wo_c").astype(jnp.bfloat16)
    w1 = stack("w1").astype(jnp.bfloat16)
    w2 = stack("w2").astype(jnp.bfloat16)

    # Pack all small per-layer vectors (biases + LN affine) into one array.
    def vec_row(*names):
        return jnp.stack(
            [jnp.concatenate([p[nm].reshape(-1) for nm in names])
             for p in layer_params], axis=0)         # (Lyr, width)

    rows = [
        vec_row("bq_s", "bk_s", "bv_s"),    # IDX_B_QKV_S
        vec_row("bo_s"),                    # IDX_BO_S
        vec_row("bq_c"),                    # IDX_BQ_C
        vec_row("bk_c", "bv_c"),            # IDX_B_KV_C
        vec_row("bo_c"),                    # IDX_BO_C
        vec_row("b1"),                      # IDX_B1
        vec_row("b2"),                      # IDX_B2
        vec_row("g1"), vec_row("be1"),
        vec_row("g2"), vec_row("be2"),
        vec_row("g3"), vec_row("be3"),
    ]
    vec_w = max(r.shape[1] for r in rows)
    rows = [jnp.pad(r, ((0, 0), (0, vec_w - r.shape[1]))) for r in rows]
    vec_packed = jnp.stack(rows, axis=1).astype(jnp.float32)   # (Lyr, 13, W)
    n_vec_pad = ((N_VEC + 7) // 8) * 8                         # sublane-align
    vec_packed = jnp.pad(vec_packed,
                         ((0, 0), (0, n_vec_pad - N_VEC), (0, 0)))

    weight_args = (w_qkv_s, wo_s, wq_c, w_kv_c, wo_c, w1, w2, vec_packed)

    def wspec(arr):
        blk = (1,) + arr.shape[1:]
        return pl.BlockSpec(blk, lambda b, l: (l, 0, 0))

    in_specs = (
        [pl.BlockSpec((nb, s, d), lambda b, l: (b, 0, 0)),             # y
         pl.BlockSpec((1, nb, l_mem, dz), lambda b, l: (l, b, 0, 0))]  # z / layer
        + [wspec(a) for a in weight_args]
    )
    out_specs = [
        pl.BlockSpec((nb, s, d), lambda b, l: (b, 0, 0)),              # resident y
        pl.BlockSpec((1, nb, s, d), lambda b, l: (l, b, 0, 0)),        # K cache
        pl.BlockSpec((1, nb, s, d), lambda b, l: (l, b, 0, 0)),        # V cache
    ]
    out_shapes = (
        jax.ShapeDtypeStruct((n, s, d), jnp.float32),
        jax.ShapeDtypeStruct((num_layers, n, s, d), jnp.float32),
        jax.ShapeDtypeStruct((num_layers, n, s, d), jnp.float32),
    )

    # Advisory cost estimate so XLA can schedule surrounding ops around the call.
    matmul_flops = 2 * n * num_layers * (
        s * d * 3 * d + 3 * s * d * d + l_mem * dz * 2 * d
        + s * d * f + s * f * d + 2 * s * s * d + 2 * s * l_mem * d)
    transcendentals = n * num_layers * (n_heads * (s * s + s * l_mem) + 6 * s)
    bytes_accessed = int(sum(a.nbytes for a in (y, z) + weight_args)
                         + n * s * d * 4 + 2 * num_layers * n * s * d * 4)
    cost = pl.CostEstimate(flops=int(matmul_flops),
                           transcendentals=int(transcendentals),
                           bytes_accessed=bytes_accessed)

    kernel = functools.partial(decoder_block_kernel, n_heads)
    y_out, k_state, v_state = pl.pallas_call(
        kernel,
        out_shape=out_shapes,
        grid_spec=pltpu.PrefetchScalarGridSpec(
            num_scalar_prefetch=0,
            grid=(num_batch_tiles, num_layers),
            in_specs=in_specs,
            out_specs=out_specs,
            scratch_shapes=[pltpu.VMEM((s, s), jnp.float32)],  # additive causal mask
        ),
        compiler_params=pltpu.CompilerParams(
            dimension_semantics=("parallel", "arbitrary"),
            # 48 MiB stays inside v7x's 64 MiB physical VMEM; v5e/v6e could go
            # higher.  At production dims (D~1024, F~4096) also tile the FFN /
            # reduce weight buffering so double-buffered weights fit on v7x.
            vmem_limit_bytes=48 * 1024 * 1024,
        ),
        cost_estimate=cost,
    )(y, z, *weight_args)

    state = [(k_state[idx], v_state[idx]) for idx in range(num_layers)]
    return y_out, state


def recurrent_decoder_block_forward(y, zs, layer_params, n_heads, state=None):
    """Mirrors RecurrentDecoderBlock.forward(y, zs, state)."""
    if state is None:
        state = [None] * len(layer_params)
    # TODO(synk): consuming a non-None incoming recurrent state (incremental
    # decoding with cached K/V) is not implemented; only the state=None path
    # of the reference forward is reproduced.
    y_out, new_state = run_decoder_block(y, zs, layer_params, n_heads)
    for idx in range(len(layer_params)):
        state[idx] = new_state[idx]
    return y_out, state


def init_layer_params(key, d_model, d_attr, d_ff):
    ks = jax.random.split(key, 20)

    def lin(k, din, dout):
        return jax.random.normal(k, (din, dout), jnp.float32) / math.sqrt(din)

    def bias(k, dout):
        return 0.02 * jax.random.normal(k, (1, dout), jnp.float32)

    return {
        "wq_s": lin(ks[0], d_model, d_model), "bq_s": bias(ks[10], d_model),
        "wk_s": lin(ks[1], d_model, d_model), "bk_s": bias(ks[11], d_model),
        "wv_s": lin(ks[2], d_model, d_model), "bv_s": bias(ks[12], d_model),
        "wo_s": lin(ks[3], d_model, d_model), "bo_s": bias(ks[13], d_model),
        "wq_c": lin(ks[4], d_model, d_model), "bq_c": bias(ks[14], d_model),
        "wk_c": lin(ks[5], d_attr, d_model),  "bk_c": bias(ks[15], d_model),
        "wv_c": lin(ks[6], d_attr, d_model),  "bv_c": bias(ks[16], d_model),
        "wo_c": lin(ks[7], d_model, d_model), "bo_c": bias(ks[17], d_model),
        "w1": lin(ks[8], d_model, d_ff), "b1": bias(ks[18], d_ff),
        "w2": lin(ks[9], d_ff, d_model), "b2": bias(ks[19], d_model),
        "g1": jnp.ones((1, d_model), jnp.float32),
        "be1": jnp.zeros((1, d_model), jnp.float32),
        "g2": jnp.ones((1, d_model), jnp.float32),
        "be2": jnp.zeros((1, d_model), jnp.float32),
        "g3": jnp.ones((1, d_model), jnp.float32),
        "be3": jnp.zeros((1, d_model), jnp.float32),
    }


def _ref_forward(y, zs, layer_params, n_heads):
    """Pure-JAX f32 reference of the same forward pass (loose self-check)."""
    def mha(q, k, v, causal):
        S, D = q.shape[-2], q.shape[-1]
        L = k.shape[-2]
        dh = D // n_heads
        qh = q.reshape(q.shape[:-1] + (n_heads, dh))
        kh = k.reshape(k.shape[:-1] + (n_heads, dh))
        vh = v.reshape(v.shape[:-1] + (n_heads, dh))
        sc = jnp.einsum("...shd,...lhd->...hsl", qh, kh) / math.sqrt(dh)
        if causal:
            mask = jnp.tril(jnp.ones((S, L), bool))
            sc = jnp.where(mask, sc, -1e30)
        p = jax.nn.softmax(sc, axis=-1)
        o = jnp.einsum("...hsl,...lhd->...shd", p, vh)
        return o.reshape(q.shape)

    def ln(x, g, b):
        m = x.mean(-1, keepdims=True)
        v = ((x - m) ** 2).mean(-1, keepdims=True)
        return (x - m) / jnp.sqrt(v + 1e-5) * g + b

    for idx, p in enumerate(layer_params):
        z = zs[idx]
        q = y @ p["wq_s"] + p["bq_s"]
        k = y @ p["wk_s"] + p["bk_s"]
        v = y @ p["wv_s"] + p["bv_s"]
        a = mha(q, k, v, True) @ p["wo_s"] + p["bo_s"]
        x = ln(y + a, p["g1"], p["be1"])
        qc = x @ p["wq_c"] + p["bq_c"]
        kc = z @ p["wk_c"] + p["bk_c"]
        vc = z @ p["wv_c"] + p["bv_c"]
        c = mha(qc, kc, vc, False) @ p["wo_c"] + p["bo_c"]
        x = ln(x + c, p["g2"], p["be2"])
        h = jnp.maximum(x @ p["w1"] + p["b1"], 0.0)
        ff = h @ p["w2"] + p["b2"]
        y = ln(x + ff, p["g3"], p["be3"])
    return y


if __name__ == "__main__":
    # d_model/d_attr = 128 keeps every activation / output store lane-dense.
    N, S, L = 2, 8, 8            # batch, decoder seq, memory seq (L')
    D, Dz, F, H = 128, 128, 256, 4
    n_layers = 2

    key = jax.random.PRNGKey(0)
    k_y, k_z, k_p = jax.random.split(key, 3)

    y = jax.random.normal(k_y, (N, S, D), jnp.float32)
    zs = [jax.random.normal(k, (N, L, Dz), jnp.float32)
          for k in jax.random.split(k_z, n_layers)]
    layer_params = [init_layer_params(k, D, Dz, F)
                    for k in jax.random.split(k_p, n_layers)]

    y_out, state = recurrent_decoder_block_forward(y, zs, layer_params, H)

    jax.block_until_ready(y_out)
    for k_c, v_c in state:
        jax.block_until_ready(k_c)
        jax.block_until_ready(v_c)

    assert y_out.shape == (N, S, D)
    assert len(state) == n_layers
    assert state[0][0].shape == (N, S, D)

    # Loose self-check vs. a pure-JAX f32 reference (bf16 matmul tolerance).
    ref = _ref_forward(y, zs, layer_params, H)
    err = float(jnp.max(jnp.abs(y_out - ref)))
    assert err < 0.1, f"max abs error vs reference: {err}"

    # Check the cached K state of layer 0 (uses the original y) as well.
    k0_ref = y @ layer_params[0]["wk_s"] + layer_params[0]["bk_s"]
    k_err = float(jnp.max(jnp.abs(state[0][0] - k0_ref)))
    assert k_err < 0.1, f"max abs K-state error vs reference: {k_err}"

    print("KERNEL_OK")
</pallas_src>

<mosaic_0001>
module attributes {stable_mosaic.version = 11 : i64} {
  func.func @decoder_block_kernel(%arg0: i32, %arg1: i32, %arg2: memref<2x8x128xf32, #tpu.memory_space<vmem>>, %arg3: memref<1x2x8x128xf32, #tpu.memory_space<vmem>>, %arg4: memref<1x128x384xbf16, #tpu.memory_space<vmem>>, %arg5: memref<1x128x128xbf16, #tpu.memory_space<vmem>>, %arg6: memref<1x128x128xbf16, #tpu.memory_space<vmem>>, %arg7: memref<1x128x256xbf16, #tpu.memory_space<vmem>>, %arg8: memref<1x128x128xbf16, #tpu.memory_space<vmem>>, %arg9: memref<1x128x256xbf16, #tpu.memory_space<vmem>>, %arg10: memref<1x256x128xbf16, #tpu.memory_space<vmem>>, %arg11: memref<1x16x384xf32, #tpu.memory_space<vmem>>, %arg12: memref<2x8x128xf32, #tpu.memory_space<vmem>>, %arg13: memref<1x2x8x128xf32, #tpu.memory_space<vmem>>, %arg14: memref<1x2x8x128xf32, #tpu.memory_space<vmem>>, %arg15: memref<8x8xf32, #tpu.memory_space<vmem>>) attributes {dimension_semantics = [#tpu.dimension_semantics<parallel>, #tpu.dimension_semantics<arbitrary>], iteration_bounds = array<i64: 1, 2>, scalar_prefetch = 0 : i64, scratch_operands = 1 : i64, tpu.core_type = #tpu.core_type<tc>, window_params = [{transform_indices = @transform_0, window_bounds = array<i64: 2, 8, 128>}, {transform_indices = @transform_1, window_bounds = array<i64: 1, 2, 8, 128>}, {transform_indices = @transform_2, window_bounds = array<i64: 1, 128, 384>}, {transform_indices = @transform_3, window_bounds = array<i64: 1, 128, 128>}, {transform_indices = @transform_4, window_bounds = array<i64: 1, 128, 128>}, {transform_indices = @transform_5, window_bounds = array<i64: 1, 128, 256>}, {transform_indices = @transform_6, window_bounds = array<i64: 1, 128, 128>}, {transform_indices = @transform_7, window_bounds = array<i64: 1, 128, 256>}, {transform_indices = @transform_8, window_bounds = array<i64: 1, 256, 128>}, {transform_indices = @transform_9, window_bounds = array<i64: 1, 16, 384>}, {transform_indices = @transform_10, window_bounds = array<i64: 2, 8, 128>}, {transform_indices = @transform_11, window_bounds = array<i64: 1, 2, 8, 128>}, {transform_indices = @transform_12, window_bounds = array<i64: 1, 2, 8, 128>}]} {
    %c0_i32 = arith.constant 0 : i32
    %0 = arith.cmpi eq, %arg1, %c0_i32 : i32
    %1 = arith.extui %0 : i1 to i32
    %c0_i32_0 = arith.constant 0 : i32
    %2 = arith.cmpi ne, %1, %c0_i32_0 : i32
    scf.if %2 {
      %c0_76 = arith.constant 0 : index
      %c0_77 = arith.constant 0 : index
      %c0_78 = arith.constant 0 : index
      %241 = vector.load %arg2[%c0_76, %c0_77, %c0_78] : memref<2x8x128xf32, #tpu.memory_space<vmem>>, vector<2x8x128xf32>
      %c0_79 = arith.constant 0 : index
      %c0_80 = arith.constant 0 : index
      %c0_81 = arith.constant 0 : index
      %242 = vector.load %arg12[%c0_79, %c0_80, %c0_81] : memref<2x8x128xf32, #tpu.memory_space<vmem>>, vector<2x8x128xf32>
      tpu.vector_store %arg12[%c0_79, %c0_80, %c0_81], %241 {strides = array<i32>} : memref<2x8x128xf32, #tpu.memory_space<vmem>>, vector<2x8x128xf32>,
      %243 = tpu.iota {dimensions = array<i32: 0>} : vector<8x8xi32>
      %244 = tpu.iota {dimensions = array<i32: 1>} : vector<8x8xi32>
      %245 = arith.cmpi sle, %244, %243 : vector<8x8xi32>
      %cst_82 = arith.constant 0.000000e+00 : f32
      %cst_83 = arith.constant -1.000000e+30 : f32
      %246 = vector.broadcast %cst_82 : f32 to vector<8x8xf32>
      %247 = vector.broadcast %cst_83 : f32 to vector<8x8xf32>
      %248 = arith.select %245, %246, %247 : vector<8x8xi1>, vector<8x8xf32>
      %c0_84 = arith.constant 0 : index
      %c0_85 = arith.constant 0 : index
      %249 = vector.load %arg15[%c0_84, %c0_85] : memref<8x8xf32, #tpu.memory_space<vmem>>, vector<8x8xf32>
      tpu.vector_store %arg15[%c0_84, %c0_85], %248 {strides = array<i32>} : memref<8x8xf32, #tpu.memory_space<vmem>>, vector<8x8xf32>,
    } else {
    }
    %c0 = arith.constant 0 : index
    %c0_1 = arith.constant 0 : index
    %c0_2 = arith.constant 0 : index
    %3 = vector.load %arg11[%c0, %c0_1, %c0_2] : memref<1x16x384xf32, #tpu.memory_space<vmem>>, vector<1x16x384xf32>
    %4 = vector.shape_cast %3 : vector<1x16x384xf32> to vector<16x384xf32>
    %c0_3 = arith.constant 0 : index
    %c0_4 = arith.constant 0 : index
    %5 = vector.load %arg15[%c0_3, %c0_4] : memref<8x8xf32, #tpu.memory_space<vmem>>, vector<8x8xf32>
    %c0_5 = arith.constant 0 : index
    %c0_6 = arith.constant 0 : index
    %c0_7 = arith.constant 0 : index
    %6 = vector.load %arg12[%c0_5, %c0_6, %c0_7] : memref<2x8x128xf32, #tpu.memory_space<vmem>>, vector<2x8x128xf32>
    %7 = vector.shape_cast %6 : vector<2x8x128xf32> to vector<16x128xf32>
    %8 = arith.truncf %7 : vector<16x128xf32> to vector<16x128xbf16>
    %c0_8 = arith.constant 0 : index
    %c0_9 = arith.constant 0 : index
    %c0_10 = arith.constant 0 : index
    %c0_11 = arith.constant 0 : index
    %9 = vector.load %arg3[%c0_8, %c0_9, %c0_10, %c0_11] : memref<1x2x8x128xf32, #tpu.memory_space<vmem>>, vector<1x2x8x128xf32>
    %10 = vector.shape_cast %9 : vector<1x2x8x128xf32> to vector<2x8x128xf32>
    %11 = vector.shape_cast %10 : vector<2x8x128xf32> to vector<16x128xf32>
    %12 = arith.truncf %11 : vector<16x128xf32> to vector<16x128xbf16>
    %13 = vector.extract_strided_slice %4 {offsets = [0, 0], sizes = [1, 384], strides = [1, 1]} : vector<16x384xf32> to vector<1x384xf32>
    %14 = vector.shape_cast %13 : vector<1x384xf32> to vector<384xf32>
    %c0_12 = arith.constant 0 : index
    %c0_13 = arith.constant 0 : index
    %c0_14 = arith.constant 0 : index
    %15 = vector.load %arg4[%c0_12, %c0_13, %c0_14] : memref<1x128x384xbf16, #tpu.memory_space<vmem>>, vector<1x128x384xbf16>
    %16 = vector.shape_cast %15 : vector<1x128x384xbf16> to vector<128x384xbf16>
    %cst = arith.constant dense<0.000000e+00> : vector<16x384xf32>
    %17 = tpu.matmul %8, %16, %cst {dimension_numbers = #tpu.dot_dimension_numbers<[1], [0], [0], [1], [0, 0, 1, 1], [], []>} : vector<16x128xbf16>, vector<128x384xbf16>, vector<16x384xf32> -> vector<16x384xf32>
    %18 = vector.shape_cast %14 : vector<384xf32> to vector<1x384xf32>
    %19 = vector.broadcast %18 : vector<1x384xf32> to vector<16x384xf32>
    %20 = arith.addf %17, %19 : vector<16x384xf32>
    %21 = vector.extract_strided_slice %20 {offsets = [0, 0], sizes = [16, 128], strides = [1, 1]} : vector<16x384xf32> to vector<16x128xf32>
    %22 = vector.extract_strided_slice %20 {offsets = [0, 128], sizes = [16, 128], strides = [1, 1]} : vector<16x384xf32> to vector<16x128xf32>
    %23 = vector.extract_strided_slice %20 {offsets = [0, 256], sizes = [16, 128], strides = [1, 1]} : vector<16x384xf32> to vector<16x128xf32>
    %cst_15 = arith.constant 0.176776692 : f32
    %24 = vector.broadcast %cst_15 : f32 to vector<16x128xf32>
    %25 = arith.mulf %21, %24 : vector<16x128xf32>
    %26 = arith.truncf %25 : vector<16x128xf32> to vector<16x128xbf16>
    %27 = vector.shape_cast %26 : vector<16x128xbf16> to vector<16x4x32xbf16>
    %28 = tpu.transpose %27, [1, 0, 2] : vector<16x4x32xbf16> -> vector<4x16x32xbf16>
    %29 = vector.shape_cast %28 : vector<4x16x32xbf16> to vector<8x8x32xbf16>
    %30 = arith.truncf %22 : vector<16x128xf32> to vector<16x128xbf16>
    %31 = vector.shape_cast %30 : vector<16x128xbf16> to vector<16x4x32xbf16>
    %32 = tpu.transpose %31, [1, 0, 2] : vector<16x4x32xbf16> -> vector<4x16x32xbf16>
    %33 = vector.shape_cast %32 : vector<4x16x32xbf16> to vector<8x8x32xbf16>
    %34 = arith.truncf %23 : vector<16x128xf32> to vector<16x128xbf16>
    %35 = vector.shape_cast %34 : vector<16x128xbf16> to vector<16x4x32xbf16>
    %36 = tpu.transpose %35, [1, 0, 2] : vector<16x4x32xbf16> -> vector<4x16x32xbf16>
    %37 = vector.shape_cast %36 : vector<4x16x32xbf16> to vector<8x8x32xbf16>
    "tpu.trace_start"() <{level = 10 : i32, message = "bqd,bkd->bqk"}> : () -> ()
    %cst_16 = arith.constant dense<0.000000e+00> : vector<8x8x8xf32>
    %38 = tpu.matmul %29, %33, %cst_16 {dimension_numbers = #tpu.dot_dimension_numbers<[2], [2], [1], [1], [0, 0, 0, 1, 1, 1], [0], [0]>} : vector<8x8x32xbf16>, vector<8x8x32xbf16>, vector<8x8x8xf32> -> vector<8x8x8xf32>
    "tpu.trace_stop"() : () -> ()
    %39 = vector.shape_cast %5 : vector<8x8xf32> to vector<1x8x8xf32>
    %40 = vector.broadcast %39 : vector<1x8x8xf32> to vector<8x8x8xf32>
    %41 = arith.addf %38, %40 : vector<8x8x8xf32>
    %cst_17 = arith.constant dense<0xFF800000> : vector<8x8xf32>
    %42 = vector.multi_reduction <maximumf>, %41, %cst_17 [2] : vector<8x8x8xf32> to vector<8x8xf32>
    %43 = vector.shape_cast %42 : vector<8x8xf32> to vector<8x8x1xf32>
    %44 = vector.broadcast %43 : vector<8x8x1xf32> to vector<8x8x8xf32>
    %45 = arith.subf %41, %44 : vector<8x8x8xf32>
    %46 = math.exp %45 : vector<8x8x8xf32>
    %cst_18 = arith.constant dense<0.000000e+00> : vector<8x8xf32>
    %47 = vector.multi_reduction <add>, %46, %cst_18 [2] : vector<8x8x8xf32> to vector<8x8xf32>
    %48 = vector.shape_cast %47 : vector<8x8xf32> to vector<8x8x1xf32>
    %49 = tpu.reciprocal %48 {approx = true} : vector<8x8x1xf32> -> vector<8x8x1xf32>
    %50 = vector.broadcast %49 : vector<8x8x1xf32> to vector<8x8x8xf32>
    %51 = arith.mulf %46, %50 : vector<8x8x8xf32>
    %52 = arith.truncf %51 : vector<8x8x8xf32> to vector<8x8x8xbf16>
    "tpu.trace_start"() <{level = 10 : i32, message = "bqk,bkd->bqd"}> : () -> ()
    %cst_19 = arith.constant dense<0.000000e+00> : vector<8x8x32xf32>
    %53 = tpu.matmul %52, %37, %cst_19 {dimension_numbers = #tpu.dot_dimension_numbers<[2], [1], [1], [2], [0, 0, 0, 1, 1, 2], [0], [0]>} : vector<8x8x8xbf16>, vector<8x8x32xbf16>, vector<8x8x32xf32> -> vector<8x8x32xf32>
    "tpu.trace_stop"() : () -> ()
    %54 = vector.shape_cast %53 : vector<8x8x32xf32> to vector<4x16x32xf32>
    %55 = tpu.transpose %54, [1, 0, 2] : vector<4x16x32xf32> -> vector<16x4x32xf32>
    %56 = vector.shape_cast %55 : vector<16x4x32xf32> to vector<16x128xf32>
    %57 = arith.truncf %56 : vector<16x128xf32> to vector<16x128xbf16>
    %58 = vector.extract_strided_slice %4 {offsets = [1, 0], sizes = [1, 128], strides = [1, 1]} : vector<16x384xf32> to vector<1x128xf32>
    %59 = vector.shape_cast %58 : vector<1x128xf32> to vector<128xf32>
    %c0_20 = arith.constant 0 : index
    %c0_21 = arith.constant 0 : index
    %c0_22 = arith.constant 0 : index
    %60 = vector.load %arg5[%c0_20, %c0_21, %c0_22] : memref<1x128x128xbf16, #tpu.memory_space<vmem>>, vector<1x128x128xbf16>
    %61 = vector.shape_cast %60 : vector<1x128x128xbf16> to vector<128x128xbf16>
    %cst_23 = arith.constant dense<0.000000e+00> : vector<16x128xf32>
    %62 = tpu.matmul %57, %61, %cst_23 {dimension_numbers = #tpu.dot_dimension_numbers<[1], [0], [0], [1], [0, 0, 1, 1], [], []>} : vector<16x128xbf16>, vector<128x128xbf16>, vector<16x128xf32> -> vector<16x128xf32>
    %63 = vector.shape_cast %59 : vector<128xf32> to vector<1x128xf32>
    %64 = vector.broadcast %63 : vector<1x128xf32> to vector<16x128xf32>
    %65 = arith.addf %62, %64 : vector<16x128xf32>
    %66 = arith.addf %7, %65 : vector<16x128xf32>
    %67 = vector.extract_strided_slice %4 {offsets = [7, 0], sizes = [1, 128], strides = [1, 1]} : vector<16x384xf32> to vector<1x128xf32>
    %68 = vector.shape_cast %67 : vector<1x128xf32> to vector<128xf32>
    %69 = vector.extract_strided_slice %4 {offsets = [8, 0], sizes = [1, 128], strides = [1, 1]} : vector<16x384xf32> to vector<1x128xf32>
    %70 = vector.shape_cast %69 : vector<1x128xf32> to vector<128xf32>
    %cst_24 = arith.constant dense<0.000000e+00> : vector<16xf32>
    %71 = vector.multi_reduction <add>, %66, %cst_24 [1] : vector<16x128xf32> to vector<16xf32>
    %72 = vector.shape_cast %71 : vector<16xf32> to vector<16x1xf32>
    %cst_25 = arith.constant 1.280000e+02 : f32
    %73 = vector.broadcast %cst_25 : f32 to vector<16x1xf32>
    %74 = arith.divf %72, %73 : vector<16x1xf32>
    %75 = vector.broadcast %74 : vector<16x1xf32> to vector<16x128xf32>
    %76 = arith.subf %66, %75 : vector<16x128xf32>
    %77 = arith.mulf %76, %76 : vector<16x128xf32>
    %cst_26 = arith.constant dense<0.000000e+00> : vector<16xf32>
    %78 = vector.multi_reduction <add>, %77, %cst_26 [1] : vector<16x128xf32> to vector<16xf32>
    %79 = vector.shape_cast %78 : vector<16xf32> to vector<16x1xf32>
    %cst_27 = arith.constant 1.280000e+02 : f32
    %80 = vector.broadcast %cst_27 : f32 to vector<16x1xf32>
    %81 = arith.divf %79, %80 : vector<16x1xf32>
    %82 = vector.broadcast %74 : vector<16x1xf32> to vector<16x128xf32>
    %83 = arith.subf %66, %82 : vector<16x128xf32>
    %cst_28 = arith.constant 9.99999974E-6 : f32
    %84 = vector.broadcast %cst_28 : f32 to vector<16x1xf32>
    %85 = arith.addf %81, %84 : vector<16x1xf32>
    %86 = math.rsqrt %85 : vector<16x1xf32>
    %87 = vector.broadcast %86 : vector<16x1xf32> to vector<16x128xf32>
    %88 = arith.mulf %83, %87 : vector<16x128xf32>
    %89 = vector.shape_cast %68 : vector<128xf32> to vector<1x128xf32>
    %90 = vector.broadcast %89 : vector<1x128xf32> to vector<16x128xf32>
    %91 = arith.mulf %88, %90 : vector<16x128xf32>
    %92 = vector.shape_cast %70 : vector<128xf32> to vector<1x128xf32>
    %93 = vector.broadcast %92 : vector<1x128xf32> to vector<16x128xf32>
    %94 = arith.addf %91, %93 : vector<16x128xf32>
    %95 = arith.truncf %94 : vector<16x128xf32> to vector<16x128xbf16>
    %96 = vector.extract_strided_slice %4 {offsets = [2, 0], sizes = [1, 128], strides = [1, 1]} : vector<16x384xf32> to vector<1x128xf32>
    %97 = vector.shape_cast %96 : vector<1x128xf32> to vector<128xf32>
    %c0_29 = arith.constant 0 : index
    %c0_30 = arith.constant 0 : index
    %c0_31 = arith.constant 0 : index
    %98 = vector.load %arg6[%c0_29, %c0_30, %c0_31] : memref<1x128x128xbf16, #tpu.memory_space<vmem>>, vector<1x128x128xbf16>
    %99 = vector.shape_cast %98 : vector<1x128x128xbf16> to vector<128x128xbf16>
    %cst_32 = arith.constant dense<0.000000e+00> : vector<16x128xf32>
    %100 = tpu.matmul %95, %99, %cst_32 {dimension_numbers = #tpu.dot_dimension_numbers<[1], [0], [0], [1], [0, 0, 1, 1], [], []>} : vector<16x128xbf16>, vector<128x128xbf16>, vector<16x128xf32> -> vector<16x128xf32>
    %101 = vector.shape_cast %97 : vector<128xf32> to vector<1x128xf32>
    %102 = vector.broadcast %101 : vector<1x128xf32> to vector<16x128xf32>
    %103 = arith.addf %100, %102 : vector<16x128xf32>
    %104 = vector.extract_strided_slice %4 {offsets = [3, 0], sizes = [1, 256], strides = [1, 1]} : vector<16x384xf32> to vector<1x256xf32>
    %105 = vector.shape_cast %104 : vector<1x256xf32> to vector<256xf32>
    %c0_33 = arith.constant 0 : index
    %c0_34 = arith.constant 0 : index
    %c0_35 = arith.constant 0 : index
    %106 = vector.load %arg7[%c0_33, %c0_34, %c0_35] : memref<1x128x256xbf16, #tpu.memory_space<vmem>>, vector<1x128x256xbf16>
    %107 = vector.shape_cast %106 : vector<1x128x256xbf16> to vector<128x256xbf16>
    %cst_36 = arith.constant dense<0.000000e+00> : vector<16x256xf32>
    %108 = tpu.matmul %12, %107, %cst_36 {dimension_numbers = #tpu.dot_dimension_numbers<[1], [0], [0], [1], [0, 0, 1, 1], [], []>} : vector<16x128xbf16>, vector<128x256xbf16>, vector<16x256xf32> -> vector<16x256xf32>
    %109 = vector.shape_cast %105 : vector<256xf32> to vector<1x256xf32>
    %110 = vector.broadcast %109 : vector<1x256xf32> to vector<16x256xf32>
    %111 = arith.addf %108, %110 : vector<16x256xf32>
    %112 = vector.extract_strided_slice %111 {offsets = [0, 0], sizes = [16, 128], strides = [1, 1]} : vector<16x256xf32> to vector<16x128xf32>
    %113 = vector.extract_strided_slice %111 {offsets = [0, 128], sizes = [16, 128], strides = [1, 1]} : vector<16x256xf32> to vector<16x128xf32>
    %cst_37 = arith.constant 0.176776692 : f32
    %114 = vector.broadcast %cst_37 : f32 to vector<16x128xf32>
    %115 = arith.mulf %103, %114 : vector<16x128xf32>
    %116 = arith.truncf %115 : vector<16x128xf32> to vector<16x128xbf16>
    %117 = vector.shape_cast %116 : vector<16x128xbf16> to vector<16x4x32xbf16>
    %118 = tpu.transpose %117, [1, 0, 2] : vector<16x4x32xbf16> -> vector<4x16x32xbf16>
    %119 = vector.shape_cast %118 : vector<4x16x32xbf16> to vector<8x8x32xbf16>
    %120 = arith.truncf %112 : vector<16x128xf32> to vector<16x128xbf16>
    %121 = vector.shape_cast %120 : vector<16x128xbf16> to vector<16x4x32xbf16>
    %122 = tpu.transpose %121, [1, 0, 2] : vector<16x4x32xbf16> -> vector<4x16x32xbf16>
    %123 = vector.shape_cast %122 : vector<4x16x32xbf16> to vector<8x8x32xbf16>
    %124 = arith.truncf %113 : vector<16x128xf32> to vector<16x128xbf16>
    %125 = vector.shape_cast %124 : vector<16x128xbf16> to vector<16x4x32xbf16>
    %126 = tpu.transpose %125, [1, 0, 2] : vector<16x4x32xbf16> -> vector<4x16x32xbf16>
    %127 = vector.shape_cast %126 : vector<4x16x32xbf16> to vector<8x8x32xbf16>
    "tpu.trace_start"() <{level = 10 : i32, message = "bqd,bkd->bqk"}> : () -> ()
    %cst_38 = arith.constant dense<0.000000e+00> : vector<8x8x8xf32>
    %128 = tpu.matmul %119, %123, %cst_38 {dimension_numbers = #tpu.dot_dimension_numbers<[2], [2], [1], [1], [0, 0, 0, 1, 1, 1], [0], [0]>} : vector<8x8x32xbf16>, vector<8x8x32xbf16>, vector<8x8x8xf32> -> vector<8x8x8xf32>
    "tpu.trace_stop"() : () -> ()
    %cst_39 = arith.constant dense<0xFF800000> : vector<8x8xf32>
    %129 = vector.multi_reduction <maximumf>, %128, %cst_39 [2] : vector<8x8x8xf32> to vector<8x8xf32>
    %130 = vector.shape_cast %129 : vector<8x8xf32> to vector<8x8x1xf32>
    %131 = vector.broadcast %130 : vector<8x8x1xf32> to vector<8x8x8xf32>
    %132 = arith.subf %128, %131 : vector<8x8x8xf32>
    %133 = math.exp %132 : vector<8x8x8xf32>
    %cst_40 = arith.constant dense<0.000000e+00> : vector<8x8xf32>
    %134 = vector.multi_reduction <add>, %133, %cst_40 [2] : vector<8x8x8xf32> to vector<8x8xf32>
    %135 = vector.shape_cast %134 : vector<8x8xf32> to vector<8x8x1xf32>
    %136 = tpu.reciprocal %135 {approx = true} : vector<8x8x1xf32> -> vector<8x8x1xf32>
    %137 = vector.broadcast %136 : vector<8x8x1xf32> to vector<8x8x8xf32>
    %138 = arith.mulf %133, %137 : vector<8x8x8xf32>
    %139 = arith.truncf %138 : vector<8x8x8xf32> to vector<8x8x8xbf16>
    "tpu.trace_start"() <{level = 10 : i32, message = "bqk,bkd->bqd"}> : () -> ()
    %cst_41 = arith.constant dense<0.000000e+00> : vector<8x8x32xf32>
    %140 = tpu.matmul %139, %127, %cst_41 {dimension_numbers = #tpu.dot_dimension_numbers<[2], [1], [1], [2], [0, 0, 0, 1, 1, 2], [0], [0]>} : vector<8x8x8xbf16>, vector<8x8x32xbf16>, vector<8x8x32xf32> -> vector<8x8x32xf32>
    "tpu.trace_stop"() : () -> ()
    %141 = vector.shape_cast %140 : vector<8x8x32xf32> to vector<4x16x32xf32>
    %142 = tpu.transpose %141, [1, 0, 2] : vector<4x16x32xf32> -> vector<16x4x32xf32>
    %143 = vector.shape_cast %142 : vector<16x4x32xf32> to vector<16x128xf32>
    %144 = arith.truncf %143 : vector<16x128xf32> to vector<16x128xbf16>
    %145 = vector.extract_strided_slice %4 {offsets = [4, 0], sizes = [1, 128], strides = [1, 1]} : vector<16x384xf32> to vector<1x128xf32>
    %146 = vector.shape_cast %145 : vector<1x128xf32> to vector<128xf32>
    %c0_42 = arith.constant 0 : index
    %c0_43 = arith.constant 0 : index
    %c0_44 = arith.constant 0 : index
    %147 = vector.load %arg8[%c0_42, %c0_43, %c0_44] : memref<1x128x128xbf16, #tpu.memory_space<vmem>>, vector<1x128x128xbf16>
    %148 = vector.shape_cast %147 : vector<1x128x128xbf16> to vector<128x128xbf16>
    %cst_45 = arith.constant dense<0.000000e+00> : vector<16x128xf32>
    %149 = tpu.matmul %144, %148, %cst_45 {dimension_numbers = #tpu.dot_dimension_numbers<[1], [0], [0], [1], [0, 0, 1, 1], [], []>} : vector<16x128xbf16>, vector<128x128xbf16>, vector<16x128xf32> -> vector<16x128xf32>
    %150 = vector.shape_cast %146 : vector<128xf32> to vector<1x128xf32>
    %151 = vector.broadcast %150 : vector<1x128xf32> to vector<16x128xf32>
    %152 = arith.addf %149, %151 : vector<16x128xf32>
    %153 = arith.addf %94, %152 : vector<16x128xf32>
    %154 = vector.extract_strided_slice %4 {offsets = [9, 0], sizes = [1, 128], strides = [1, 1]} : vector<16x384xf32> to vector<1x128xf32>
    %155 = vector.shape_cast %154 : vector<1x128xf32> to vector<128xf32>
    %156 = vector.extract_strided_slice %4 {offsets = [10, 0], sizes = [1, 128], strides = [1, 1]} : vector<16x384xf32> to vector<1x128xf32>
    %157 = vector.shape_cast %156 : vector<1x128xf32> to vector<128xf32>
    %cst_46 = arith.constant dense<0.000000e+00> : vector<16xf32>
    %158 = vector.multi_reduction <add>, %153, %cst_46 [1] : vector<16x128xf32> to vector<16xf32>
    %159 = vector.shape_cast %158 : vector<16xf32> to vector<16x1xf32>
    %cst_47 = arith.constant 1.280000e+02 : f32
    %160 = vector.broadcast %cst_47 : f32 to vector<16x1xf32>
    %161 = arith.divf %159, %160 : vector<16x1xf32>
    %162 = vector.broadcast %161 : vector<16x1xf32> to vector<16x128xf32>
    %163 = arith.subf %153, %162 : vector<16x128xf32>
    %164 = arith.mulf %163, %163 : vector<16x128xf32>
    %cst_48 = arith.constant dense<0.000000e+00> : vector<16xf32>
    %165 = vector.multi_reduction <add>, %164, %cst_48 [1] : vector<16x128xf32> to vector<16xf32>
    %166 = vector.shape_cast %165 : vector<16xf32> to vector<16x1xf32>
    %cst_49 = arith.constant 1.280000e+02 : f32
    %167 = vector.broadcast %cst_49 : f32 to vector<16x1xf32>
    %168 = arith.divf %166, %167 : vector<16x1xf32>
    %169 = vector.broadcast %161 : vector<16x1xf32> to vector<16x128xf32>
    %170 = arith.subf %153, %169 : vector<16x128xf32>
    %cst_50 = arith.constant 9.99999974E-6 : f32
    %171 = vector.broadcast %cst_50 : f32 to vector<16x1xf32>
    %172 = arith.addf %168, %171 : vector<16x1xf32>
    %173 = math.rsqrt %172 : vector<16x1xf32>
    %174 = vector.broadcast %173 : vector<16x1xf32> to vector<16x128xf32>
    %175 = arith.mulf %170, %174 : vector<16x128xf32>
    %176 = vector.shape_cast %155 : vector<128xf32> to vector<1x128xf32>
    %177 = vector.broadcast %176 : vector<1x128xf32> to vector<16x128xf32>
    %178 = arith.mulf %175, %177 : vector<16x128xf32>
    %179 = vector.shape_cast %157 : vector<128xf32> to vector<1x128xf32>
    %180 = vector.broadcast %179 : vector<1x128xf32> to vector<16x128xf32>
    %181 = arith.addf %178, %180 : vector<16x128xf32>
    %182 = arith.truncf %181 : vector<16x128xf32> to vector<16x128xbf16>
    %183 = vector.extract_strided_slice %4 {offsets = [5, 0], sizes = [1, 256], strides = [1, 1]} : vector<16x384xf32> to vector<1x256xf32>
    %184 = vector.shape_cast %183 : vector<1x256xf32> to vector<256xf32>
    %c0_51 = arith.constant 0 : index
    %c0_52 = arith.constant 0 : index
    %c0_53 = arith.constant 0 : index
    %185 = vector.load %arg9[%c0_51, %c0_52, %c0_53] : memref<1x128x256xbf16, #tpu.memory_space<vmem>>, vector<1x128x256xbf16>
    %186 = vector.shape_cast %185 : vector<1x128x256xbf16> to vector<128x256xbf16>
    %cst_54 = arith.constant dense<0.000000e+00> : vector<16x256xf32>
    %187 = tpu.matmul %182, %186, %cst_54 {dimension_numbers = #tpu.dot_dimension_numbers<[1], [0], [0], [1], [0, 0, 1, 1], [], []>} : vector<16x128xbf16>, vector<128x256xbf16>, vector<16x256xf32> -> vector<16x256xf32>
    %188 = vector.shape_cast %184 : vector<256xf32> to vector<1x256xf32>
    %189 = vector.broadcast %188 : vector<1x256xf32> to vector<16x256xf32>
    %190 = arith.addf %187, %189 : vector<16x256xf32>
    %cst_55 = arith.constant 0.000000e+00 : f32
    %191 = vector.broadcast %cst_55 : f32 to vector<16x256xf32>
    %192 = arith.maximumf %190, %191 : vector<16x256xf32>
    %193 = arith.truncf %192 : vector<16x256xf32> to vector<16x256xbf16>
    %194 = vector.extract_strided_slice %4 {offsets = [6, 0], sizes = [1, 128], strides = [1, 1]} : vector<16x384xf32> to vector<1x128xf32>
    %195 = vector.shape_cast %194 : vector<1x128xf32> to vector<128xf32>
    %c0_56 = arith.constant 0 : index
    %c0_57 = arith.constant 0 : index
    %c0_58 = arith.constant 0 : index
    %196 = vector.load %arg10[%c0_56, %c0_57, %c0_58] : memref<1x256x128xbf16, #tpu.memory_space<vmem>>, vector<1x256x128xbf16>
    %197 = vector.shape_cast %196 : vector<1x256x128xbf16> to vector<256x128xbf16>
    %cst_59 = arith.constant dense<0.000000e+00> : vector<16x128xf32>
    %198 = tpu.matmul %193, %197, %cst_59 {dimension_numbers = #tpu.dot_dimension_numbers<[1], [0], [0], [1], [0, 0, 1, 1], [], []>} : vector<16x256xbf16>, vector<256x128xbf16>, vector<16x128xf32> -> vector<16x128xf32>
    %199 = vector.shape_cast %195 : vector<128xf32> to vector<1x128xf32>
    %200 = vector.broadcast %199 : vector<1x128xf32> to vector<16x128xf32>
    %201 = arith.addf %198, %200 : vector<16x128xf32>
    %202 = arith.addf %181, %201 : vector<16x128xf32>
    %203 = vector.extract_strided_slice %4 {offsets = [11, 0], sizes = [1, 128], strides = [1, 1]} : vector<16x384xf32> to vector<1x128xf32>
    %204 = vector.shape_cast %203 : vector<1x128xf32> to vector<128xf32>
    %205 = vector.extract_strided_slice %4 {offsets = [12, 0], sizes = [1, 128], strides = [1, 1]} : vector<16x384xf32> to vector<1x128xf32>
    %206 = vector.shape_cast %205 : vector<1x128xf32> to vector<128xf32>
    %cst_60 = arith.constant dense<0.000000e+00> : vector<16xf32>
    %207 = vector.multi_reduction <add>, %202, %cst_60 [1] : vector<16x128xf32> to vector<16xf32>
    %208 = vector.shape_cast %207 : vector<16xf32> to vector<16x1xf32>
    %cst_61 = arith.constant 1.280000e+02 : f32
    %209 = vector.broadcast %cst_61 : f32 to vector<16x1xf32>
    %210 = arith.divf %208, %209 : vector<16x1xf32>
    %211 = vector.broadcast %210 : vector<16x1xf32> to vector<16x128xf32>
    %212 = arith.subf %202, %211 : vector<16x128xf32>
    %213 = arith.mulf %212, %212 : vector<16x128xf32>
    %cst_62 = arith.constant dense<0.000000e+00> : vector<16xf32>
    %214 = vector.multi_reduction <add>, %213, %cst_62 [1] : vector<16x128xf32> to vector<16xf32>
    %215 = vector.shape_cast %214 : vector<16xf32> to vector<16x1xf32>
    %cst_63 = arith.constant 1.280000e+02 : f32
    %216 = vector.broadcast %cst_63 : f32 to vector<16x1xf32>
    %217 = arith.divf %215, %216 : vector<16x1xf32>
    %218 = vector.broadcast %210 : vector<16x1xf32> to vector<16x128xf32>
    %219 = arith.subf %202, %218 : vector<16x128xf32>
    %cst_64 = arith.constant 9.99999974E-6 : f32
    %220 = vector.broadcast %cst_64 : f32 to vector<16x1xf32>
    %221 = arith.addf %217, %220 : vector<16x1xf32>
    %222 = math.rsqrt %221 : vector<16x1xf32>
    %223 = vector.broadcast %222 : vector<16x1xf32> to vector<16x128xf32>
    %224 = arith.mulf %219, %223 : vector<16x128xf32>
    %225 = vector.shape_cast %204 : vector<128xf32> to vector<1x128xf32>
    %226 = vector.broadcast %225 : vector<1x128xf32> to vector<16x128xf32>
    %227 = arith.mulf %224, %226 : vector<16x128xf32>
    %228 = vector.shape_cast %206 : vector<128xf32> to vector<1x128xf32>
    %229 = vector.broadcast %228 : vector<1x128xf32> to vector<16x128xf32>
    %230 = arith.addf %227, %229 : vector<16x128xf32>
    %231 = vector.shape_cast %230 : vector<16x128xf32> to vector<2x8x128xf32>
    %c0_65 = arith.constant 0 : index
    %c0_66 = arith.constant 0 : index
    %c0_67 = arith.constant 0 : index
    %232 = vector.load %arg12[%c0_65, %c0_66, %c0_67] : memref<2x8x128xf32, #tpu.memory_space<vmem>>, vector<2x8x128xf32>
    tpu.vector_store %arg12[%c0_65, %c0_66, %c0_67], %231 {strides = array<i32>} : memref<2x8x128xf32, #tpu.memory_space<vmem>>, vector<2x8x128xf32>,
    %233 = vector.shape_cast %22 : vector<16x128xf32> to vector<2x8x128xf32>
    %c0_68 = arith.constant 0 : index
    %c0_69 = arith.constant 0 : index
    %c0_70 = arith.constant 0 : index
    %c0_71 = arith.constant 0 : index
    %234 = vector.load %arg13[%c0_68, %c0_69, %c0_70, %c0_71] : memref<1x2x8x128xf32, #tpu.memory_space<vmem>>, vector<1x2x8x128xf32>
    %235 = vector.shape_cast %234 : vector<1x2x8x128xf32> to vector<2x8x128xf32>
    %236 = vector.shape_cast %233 : vector<2x8x128xf32> to vector<1x2x8x128xf32>
    tpu.vector_store %arg13[%c0_68, %c0_69, %c0_70, %c0_71], %236 {strides = array<i32>} : memref<1x2x8x128xf32, #tpu.memory_space<vmem>>, vector<1x2x8x128xf32>,
    %237 = vector.shape_cast %23 : vector<16x128xf32> to vector<2x8x128xf32>
    %c0_72 = arith.constant 0 : index
    %c0_73 = arith.constant 0 : index
    %c0_74 = arith.constant 0 : index
    %c0_75 = arith.constant 0 : index
    %238 = vector.load %arg14[%c0_72, %c0_73, %c0_74, %c0_75] : memref<1x2x8x128xf32, #tpu.memory_space<vmem>>, vector<1x2x8x128xf32>
    %239 = vector.shape_cast %238 : vector<1x2x8x128xf32> to vector<2x8x128xf32>
    %240 = vector.shape_cast %237 : vector<2x8x128xf32> to vector<1x2x8x128xf32>
    tpu.vector_store %arg14[%c0_72, %c0_73, %c0_74, %c0_75], %240 {strides = array<i32>} : memref<1x2x8x128xf32, #tpu.memory_space<vmem>>, vector<1x2x8x128xf32>,
    return
  }
  func.func @transform_0(%arg0: i32, %arg1: i32) -> (i32, i32, i32) {
    %c0_i32 = arith.constant 0 : i32
    %c0_i32_0 = arith.constant 0 : i32
    %c0_i32_1 = arith.constant 0 : i32
    return %arg0, %c0_i32, %c0_i32_0 : i32, i32, i32
  }
  func.func @transform_1(%arg0: i32, %arg1: i32) -> (i32, i32, i32, i32) {
    %c0_i32 = arith.constant 0 : i32
    %c0_i32_0 = arith.constant 0 : i32
    %c0_i32_1 = arith.constant 0 : i32
    return %arg1, %arg0, %c0_i32, %c0_i32_0 : i32, i32, i32, i32
  }
  func.func @transform_2(%arg0: i32, %arg1: i32) -> (i32, i32, i32) {
    %c0_i32 = arith.constant 0 : i32
    %c0_i32_0 = arith.constant 0 : i32
    %c0_i32_1 = arith.constant 0 : i32
    return %arg1, %c0_i32, %c0_i32_0 : i32, i32, i32
  }
  func.func @transform_3(%arg0: i32, %arg1: i32) -> (i32, i32, i32) {
    %c0_i32 = arith.constant 0 : i32
    %c0_i32_0 = arith.constant 0 : i32
    %c0_i32_1 = arith.constant 0 : i32
    return %arg1, %c0_i32, %c0_i32_0 : i32, i32, i32
  }
  func.func @transform_4(%arg0: i32, %arg1: i32) -> (i32, i32, i32) {
    %c0_i32 = arith.constant 0 : i32
    %c0_i32_0 = arith.constant 0 : i32
    %c0_i32_1 = arith.constant 0 : i32
    return %arg1, %c0_i32, %c0_i32_0 : i32, i32, i32
  }
  func.func @transform_5(%arg0: i32, %arg1: i32) -> (i32, i32, i32) {
    %c0_i32 = arith.constant 0 : i32
    %c0_i32_0 = arith.constant 0 : i32
    %c0_i32_1 = arith.constant 0 : i32
    return %arg1, %c0_i32, %c0_i32_0 : i32, i32, i32
  }
  func.func @transform_6(%arg0: i32, %arg1: i32) -> (i32, i32, i32) {
    %c0_i32 = arith.constant 0 : i32
    %c0_i32_0 = arith.constant 0 : i32
    %c0_i32_1 = arith.constant 0 : i32
    return %arg1, %c0_i32, %c0_i32_0 : i32, i32, i32
  }
  func.func @transform_7(%arg0: i32, %arg1: i32) -> (i32, i32, i32) {
    %c0_i32 = arith.constant 0 : i32
    %c0_i32_0 = arith.constant 0 : i32
    %c0_i32_1 = arith.constant 0 : i32
    return %arg1, %c0_i32, %c0_i32_0 : i32, i32, i32
  }
  func.func @transform_8(%arg0: i32, %arg1: i32) -> (i32, i32, i32) {
    %c0_i32 = arith.constant 0 : i32
    %c0_i32_0 = arith.constant 0 : i32
    %c0_i32_1 = arith.constant 0 : i32
    return %arg1, %c0_i32, %c0_i32_0 : i32, i32, i32
  }
  func.func @transform_9(%arg0: i32, %arg1: i32) -> (i32, i32, i32) {
    %c0_i32 = arith.constant 0 : i32
    %c0_i32_0 = arith.constant 0 : i32
    %c0_i32_1 = arith.constant 0 : i32
    return %arg1, %c0_i32, %c0_i32_0 : i32, i32, i32
  }
  func.func @transform_10(%arg0: i32, %arg1: i32) -> (i32, i32, i32) {
    %c0_i32 = arith.constant 0 : i32
    %c0_i32_0 = arith.constant 0 : i32
    %c0_i32_1 = arith.constant 0 : i32
    return %arg0, %c0_i32, %c0_i32_0 : i32, i32, i32
  }
  func.func @transform_11(%arg0: i32, %arg1: i32) -> (i32, i32, i32, i32) {
    %c0_i32 = arith.constant 0 : i32
    %c0_i32_0 = arith.constant 0 : i32
    %c0_i32_1 = arith.constant 0 : i32
    return %arg1, %arg0, %c0_i32, %c0_i32_0 : i32, i32, i32, i32
  }
  func.func @transform_12(%arg0: i32, %arg1: i32) -> (i32, i32, i32, i32) {
    %c0_i32 = arith.constant 0 : i32
    %c0_i32_0 = arith.constant 0 : i32
    %c0_i32_1 = arith.constant 0 : i32
    return %arg1, %arg0, %c0_i32, %c0_i32_0 : i32, i32, i32, i32
  }
}

</mosaic_0001>

<bundles_post_ra>
// kernel: tpu_custom_call.1
= control target key start
LH: loop header
LB: loop body
LE: loop exit
PB: predicated region body
PF: predicated region fallthrough
CT: control target
= control target key end

     0   :  { %s9481_s0 = inlined_call_operand.hbm [shape: f32[2,8,128], index: 0, kind: input, shape index: {}]   ;;  %s9482_s1 = inlined_call_operand.hbm [shape: f32[2,2,8,128], index: 1, kind: input, shape index: {}]   ;;  %s9483_s2 = inlined_call_operand.hbm [shape: bf16[2,128,384], index: 2, kind: input, shape index: {}]   ;;  %s9484_s3 = inlined_call_operand.hbm [shape: bf16[2,128,128], index: 3, kind: input, shape index: {}]   ;;  %s9485_s4 = inlined_call_operand.hbm [shape: bf16[2,128,128], index: 4, kind: input, shape index: {}]   ;;  %s9486_s5 = inlined_call_operand.hbm [shape: bf16[2,128,256], index: 5, kind: input, shape index: {}]   ;;  %s9487_s6 = inlined_call_operand.hbm [shape: bf16[2,128,128], index: 6, kind: input, shape index: {}]   ;;  %s9488_s7 = inlined_call_operand.hbm [shape: bf16[2,128,256], index: 7, kind: input, shape index: {}]   ;;  %s9489_s8 = inlined_call_operand.hbm [shape: bf16[2,256,128], index: 8, kind: input, shape index: {}]   ;;  %s9490_s9 = inlined_call_operand.hbm [shape: f32[2,16,384], index: 9, kind: input, shape index: {}]   ;;  %s9491_s10 = inlined_call_operand.hbm [shape: f32[2,8,128], index: 10, kind: output, shape index: {0}]   ;;  %s9492_s11 = inlined_call_operand.hbm [shape: f32[2,2,8,128], index: 11, kind: output, shape index: {1}]   ;;  %s9493_s12 = inlined_call_operand.hbm [shape: f32[2,2,8,128], index: 12, kind: output, shape index: {2}]  }
   0x1   :  { %9534 = sst [smem:[#allocation42_spill]] %s9482_s1 }
   0x2   :  { %9535 = sst [smem:[#allocation43_spill]] %s9484_s3 }
   0x3   :  { %9536 = sst [smem:[#allocation44_spill]] %s9486_s5 }
   0x4   :  { %9537 = sst [smem:[#allocation45_spill]] %s9488_s7 }
   0x5   :  { %9538 = sst [smem:[#allocation46_spill]] %s9490_s9 }
   0x6   :  { %9539 = sst [smem:[#allocation47_spill]] %s9491_s10 }
   0x7   :  { %9540 = sst [smem:[#allocation48_spill]] %s9492_s11 }
   0x8   :  { %9541 = sst [smem:[#allocation49_spill]] %s9493_s12 }
   0x9   :  { %18 = vsyncpa [#allocation4], 0 }
   0xa   :  { %19 = vsyncpa [#allocation7], 0 }
   0xb   :  { %21 = vsyncpa [#allocation7 + $0x1], 0 }
   0xc   :  { %22 = vsyncpa [#allocation10], 0 }
   0xd   :  { %24 = vsyncpa [#allocation10 + $0x1], 0 }
   0xe   :  { %25 = vsyncpa [#allocation13], 0 }
   0xf   :  { %27 = vsyncpa [#allocation13 + $0x1], 0 }
  0x10   :  { %28 = vsyncpa [#allocation16], 0 }
  0x11   :  { %30 = vsyncpa [#allocation16 + $0x1], 0 }
  0x12   :  { %31 = vsyncpa [#allocation19], 0 }
  0x13   :  { %33 = vsyncpa [#allocation19 + $0x1], 0 }
  0x14   :  { %34 = vsyncpa [#allocation5], 0 }
  0x15   :  { %35 = vsyncpa [#allocation22], 0 }
  0x16   :  { %37 = vsyncpa [#allocation22 + $0x1], 0  ;;  %s7965_s21 = smov 0   ;;  %s7967_s22 = smov 0  }
  0x17   :  { %s7969_s23 = smov 0   ;;  %s7971_s24 = smov 0  }
  0x18   :  { %s7973_s25 = smov 0   ;;  %s7975_s26 = smov 0  }
  0x19 LB: > { %9542 = sst [smem:[#allocation32_spill]] %s7850_s22  ;;  %s52_s27 = sadd.s32 1, %s7862_s25  ;;  %s7866_s26 = sphi %s7975_s26, %s43_s26   ;;  %s7862_s25 = sphi %s7973_s25, %s9608_s25   ;;  %s7858_s24 = sphi %s7971_s24, %s9607_s24   ;;  %s7854_s23 = sphi %s7969_s23, %s9605_s23   ;;  %s7850_s22 = sphi %s7967_s22, %s9604_s22   ;;  %s7846_s21 = sphi %s7965_s21, %s9603_s21  }
  0x1a   : > { %9543 = sst [smem:[#allocation33_spill]] %s7854_s23  ;;  %s90_s28 = sadd.s32 1, %s7854_s23 }
  0x1b   : > { %9544 = sst [smem:[#allocation34_spill]] %s7858_s24  ;;  %p53_p0 = scmp.ge.s32.totalorder %s52_s27, 2 }
  0x1c   : > { %9545 = sst [smem:[#allocation35_spill]] %s7866_s26  ;;  %p9497_p1 = scmp.ne.s32.totalorder %s7854_s23, %s7850_s22 }
  0x1d   : > { %p98_p2 = scmp.eq.s32.totalorder %s7866_s26, 0  ;;  %s9610_s27 = smov (%p53_p0, %s52_s27), 0 }
  0x1e   : > { %9546 = sst [smem:[#allocation36_spill]] %s9610_s27  ;;  %s85_s30 = ssub.s32 %s7862_s25, %s9610_s27 }
  0x1f   : > { %p8005_p3 = por %p98_p2, %p9497_p1  ;;  %p88_p5 = scmp.eq.s32.totalorder %s85_s30, 0 }
  0x20   : > { %p7101_p6 = scmp.lt.s32.totalorder %s7866_s26, 2  ;;  %s8014_s13 = sand.u32 1, %s7866_s26  }
  0x21   : > { %s8017_s14 = sand.u32 1, %s7854_s23   ;;  %s6622_s17 = sshll.u32 %s7862_s25, 8 }
  0x22   : > { %s8020_s15 = scalar_select %p88_p5, %s7854_s23, %s90_s28  }
  0x23   : > { %s6369_s16 = sshll.u32 %s8017_s14, 4  ;;  %s9549_s1 = sld [smem:[#allocation42_spill]] }
  0x24   : > { %9548 = sst [smem:[#allocation37_spill]] %s8020_s15  ;;  %s437_s30 = scalar_lea.vmem [#allocation6], %s6369_s16 }
  0x25   : > { %s446_s27 = sshll.u32 %s437_s30, 4  ;;  %p8033_p7 = pnand %p7101_p6, %p8005_p3  ;;  %s8029_s27 = int_to_ptr.vmem [resolvable:$true] %s446_s27 }
  0x26   : > { %s8038_s28 = sshll.u32 %s8017_s14, 6 }
  0x27   : > { %s9550_s10 = scalar_select %p8033_p7, 1, 0 }
  0x28   : > { %p8045_p9 = pneg %p8033_p7 }
  0x29   : > { %s8027_s20 = scalar_lea.hbm %s9549_s1, %s6622_s17  ;;  %s7413_s19 = scalar_lea.hbm %s9549_s1, 512 }
  0x2a   : > { %s7408_s18 = scalar_lea.hbm %s8027_s20, 256  ;;  %p7414_p12 = scmp.lt.u32.totalorder %s8027_s20, %s9549_s1 }
  0x2b   : > { %p7409_p8 = scmp.ne.s32.totalorder %s8027_s20, %s7408_s18  ;;  %p7415_p13 = scmp.lt.u32.totalorder %s7413_s19, %s7408_s18 }
  0x2c   : > { %s9551_s17 = scalar_select %p8045_p9, 1, 0 }
  0x2d   : > { %p7411_p10 = pnand %p8045_p9, %p7409_p8  ;;  %p7416_p0 = por %p7415_p13, %p7414_p12 }
  0x2e   : > { %p7417_p2 = scmp.lt.u32.totalorder %s7408_s18, %s8027_s20 }
  0x2f   : > { %p7412_p11 = pneg %p7411_p10 }
  0x30   : > { %p7418_p3 = por %p7417_p2, %p7416_p0 }
  0x32   : > { %p7419_p5 = pnand %p7418_p3, %p7412_p11 }
  0x34   : > { %7422 = shalt.err (!%p7419_p5)
}
  0x35   : > { %s7423_s15 = scalar_lea.vmem %s8029_s27, 256  ;;  %s7868_s29 = smov [#allocation6]  }
  0x36   : > { %p7424_p6 = scmp.ne.s32.totalorder %s8029_s27, %s7423_s15  ;;  %s7428_s16 = sshll.u32 %s7868_s29, 4  ;;  %s7429_s16 = int_to_ptr.vmem [resolvable:$false] %s7428_s16 }
  0x37   : > { %s7430_s12 = scalar_lea.vmem %s7429_s16, 512  ;;  %p7431_p4 = scmp.lt.s32.totalorder %s8029_s27, %s7429_s16 }
  0x38   : > { %p7426_p8 = pnand %p7424_p6, %p8045_p9  ;;  %p7432_p1 = scmp.lt.s32.totalorder %s7430_s12, %s7423_s15 }
  0x3a   : > { %p7427_p10 = pneg %p7426_p8  ;;  %p7433_p12 = por %p7432_p1, %p7431_p4 }
  0x3c   : > { %p7434_p13 = pnand %p7433_p12, %p7427_p10 }
  0x3e   : > { %7437 = shalt.err (!%p7434_p13)
}
  0x3f   : > { %s9501_s18 = smov 128   ;;  %s9503_s19 = smov 8  }
  0x40   : > { %s9552_s30 = scalar_lea.sflag [#allocation7], %s8014_s13  ;;  %s8074_s15 = sshll.u32 %s7862_s25, 10 }
  0x41   : > { %7068 = dma.hbm_to_vmem [thread:$0]  (!%p8033_p7), %s8027_s20, 256, %s8029_s27, %s9552_s30, %s9501_s18, %s9501_s18, %s9503_s19  }
  0x42   : > { %s481_s29 = scalar_lea.vmem [#allocation9], %s8038_s28  ;;  %s9553_s3 = sld [smem:[#allocation43_spill]] }
  0x43   : > { %s488_s16 = sshll.u32 %s481_s29, 4  ;;  %s9505_s24 = scalar_lea.sflag [#allocation10], %s8014_s13  ;;  %s8083_s16 = int_to_ptr.vmem [resolvable:$true] %s488_s16 }
  0x48   : > { %s8081_s11 = scalar_lea.hbm %s9553_s3, %s8074_s15  ;;  %s7443_s30 = scalar_lea.hbm %s9553_s3, 2048 }
  0x49   : > { %s7438_s9 = scalar_lea.hbm %s8081_s11, 1024  ;;  %p7444_p0 = scmp.lt.u32.totalorder %s8081_s11, %s9553_s3 }
  0x4a   : > { %p7439_p1 = scmp.ne.s32.totalorder %s8081_s11, %s7438_s9  ;;  %p7445_p2 = scmp.lt.u32.totalorder %s7443_s30, %s7438_s9 }
  0x4b   : > { %p7447_p5 = scmp.lt.u32.totalorder %s7438_s9, %s8081_s11 }
  0x4c   : > { %p7441_p4 = pnand %p7439_p1, %p8045_p9  ;;  %p7446_p3 = por %p7445_p2, %p7444_p0 }
  0x4e   : > { %p7442_p11 = pneg %p7441_p4  ;;  %p7448_p6 = por %p7447_p5, %p7446_p3 }
  0x50   : > { %p7449_p8 = pnand %p7448_p6, %p7442_p11 }
  0x52   : > { %7452 = shalt.err (!%p7449_p8)
}
  0x53   : > { %s7453_s12 = scalar_lea.vmem %s8083_s16, 1024  ;;  %s7871_s27 = smov [#allocation9]  }
  0x54   : > { %p7454_p10 = scmp.ne.s32.totalorder %s8083_s16, %s7453_s12  ;;  %s7458_s20 = sshll.u32 %s7871_s27, 4  ;;  %s7459_s20 = int_to_ptr.vmem [resolvable:$false] %s7458_s20 }
  0x55   : > { %s7460_s29 = scalar_lea.vmem %s7459_s20, 2048  ;;  %p7461_p1 = scmp.lt.s32.totalorder %s8083_s16, %s7459_s20 }
  0x56   : > { %p7456_p12 = pnand %p7454_p10, %p8045_p9  ;;  %p7462_p4 = scmp.lt.s32.totalorder %s7460_s29, %s7453_s12 }
  0x58   : > { %p7457_p13 = pneg %p7456_p12  ;;  %p7463_p0 = por %p7462_p4, %p7461_p1 }
  0x5a   : > { %p7464_p2 = pnand %p7463_p0, %p7457_p13 }
  0x5c   : > { %7467 = shalt.err (!%p7464_p2)
}
  0x5d   : > { %s9506_s9 = smov 64   ;;  %s9508_s30 = smov 4  }
  0x5e   : > { %7074 = dma.hbm_to_vmem [thread:$0]  (!%p8033_p7), %s8081_s11, 1024, %s8083_s16, %s9505_s24, %s9506_s9, %s9506_s9, %s9508_s30  }
  0x5f   : > { %s8113_s1 = sshll.u32 %s8017_s14, 7  ;;  %s8116_s12 = sshll.u32 %s7862_s25, 11 }
  0x60   : > { %s9554_s5 = sld [smem:[#allocation44_spill]]  ;;  %s523_s18 = scalar_lea.vmem [#allocation12], %s8113_s1 }
  0x61   : > { %s530_s19 = sshll.u32 %s523_s18, 4  ;;  %s9510_s11 = scalar_lea.sflag [#allocation13], %s8014_s13  ;;  %s8125_s19 = int_to_ptr.vmem [resolvable:$true] %s530_s19 }
  0x66   : > { %s8122_s29 = scalar_lea.hbm %s9554_s5, %s8116_s12  ;;  %s7473_s27 = scalar_lea.hbm %s9554_s5, 4096 }
  0x67   : > { %s7468_s16 = scalar_lea.hbm %s8122_s29, 2048  ;;  %p7474_p6 = scmp.lt.u32.totalorder %s8122_s29, %s9554_s5 }
  0x68   : > { %p7469_p11 = scmp.ne.s32.totalorder %s8122_s29, %s7468_s16  ;;  %p7475_p8 = scmp.lt.u32.totalorder %s7473_s27, %s7468_s16 }
  0x69   : > { %p7477_p12 = scmp.lt.u32.totalorder %s7468_s16, %s8122_s29 }
  0x6a   : > { %p7471_p3 = pnand %p7469_p11, %p8045_p9  ;;  %p7476_p10 = por %p7475_p8, %p7474_p6 }
  0x6c   : > { %p7472_p5 = pneg %p7471_p3  ;;  %p7478_p13 = por %p7477_p12, %p7476_p10 }
  0x6e   : > { %p7479_p1 = pnand %p7478_p13, %p7472_p5 }
  0x70   : > { %7482 = shalt.err (!%p7479_p1)
}
  0x71   : > { %s7483_s18 = scalar_lea.vmem %s8125_s19, 2048  ;;  %s7874_s24 = smov [#allocation12]  }
  0x72   : > { %p7484_p4 = scmp.ne.s32.totalorder %s8125_s19, %s7483_s18  ;;  %s7488_s9 = sshll.u32 %s7874_s24, 4  ;;  %s7489_s9 = int_to_ptr.vmem [resolvable:$false] %s7488_s9 }
  0x73   : > { %s7490_s30 = scalar_lea.vmem %s7489_s9, 4096  ;;  %p7491_p11 = scmp.lt.s32.totalorder %s8125_s19, %s7489_s9 }
  0x74   : > { %p7486_p0 = pnand %p7484_p4, %p8045_p9  ;;  %p7492_p3 = scmp.lt.s32.totalorder %s7490_s30, %s7483_s18 }
  0x76   : > { %p7487_p2 = pneg %p7486_p0  ;;  %p7493_p6 = por %p7492_p3, %p7491_p11 }
  0x78   : > { %p7494_p8 = pnand %p7493_p6, %p7487_p2 }
  0x7a   : > { %7497 = shalt.err (!%p7494_p8)
}
  0x7b   : > { %s9555_s16 = smov 8   ;;  %s9556_s27 = smov 128  }
  0x7c   : > { %7080 = dma.hbm_to_vmem [thread:$0]  (!%p8033_p7), %s8122_s29, 2048, %s8125_s19, %s9510_s11, %s9556_s27, %s9556_s27, %s9555_s16  }
  0x7d   : > { %s9557_s7 = sld [smem:[#allocation45_spill]]  ;;  %s565_s9 = scalar_lea.vmem [#allocation15], %s8113_s1 }
  0x7e   : > { %s572_s30 = sshll.u32 %s565_s9, 4  ;;  %s9512_s3 = scalar_lea.sflag [#allocation16], %s8014_s13  ;;  %s8161_s30 = int_to_ptr.vmem [resolvable:$true] %s572_s30 }
  0x83   : > { %s8158_s18 = scalar_lea.hbm %s9557_s7, %s8116_s12  ;;  %s7503_s20 = scalar_lea.hbm %s9557_s7, 4096 }
  0x84   : > { %s7498_s5 = scalar_lea.hbm %s8158_s18, 2048  ;;  %p7504_p13 = scmp.lt.u32.totalorder %s8158_s18, %s9557_s7 }
  0x85   : > { %p7499_p5 = scmp.ne.s32.totalorder %s8158_s18, %s7498_s5  ;;  %p7505_p1 = scmp.lt.u32.totalorder %s7503_s20, %s7498_s5 }
  0x86   : > { %p7507_p0 = scmp.lt.u32.totalorder %s7498_s5, %s8158_s18 }
  0x87   : > { %p7501_p10 = pnand %p7499_p5, %p8045_p9  ;;  %p7506_p4 = por %p7505_p1, %p7504_p13 }
  0x89   : > { %p7502_p12 = pneg %p7501_p10  ;;  %p7508_p2 = por %p7507_p0, %p7506_p4 }
  0x8b   : > { %p7509_p11 = pnand %p7508_p2, %p7502_p12 }
  0x8d   : > { %7512 = shalt.err (!%p7509_p11)
}
  0x8e   : > { %s7513_s9 = scalar_lea.vmem %s8161_s30, 2048  ;;  %s7875_s19 = smov [#allocation15]  }
  0x8f   : > { %p7514_p3 = scmp.ne.s32.totalorder %s8161_s30, %s7513_s9  ;;  %s7518_s29 = sshll.u32 %s7875_s19, 4  ;;  %s7519_s29 = int_to_ptr.vmem [resolvable:$false] %s7518_s29 }
  0x90   : > { %s7520_s11 = scalar_lea.vmem %s7519_s29, 4096  ;;  %p7521_p5 = scmp.lt.s32.totalorder %s8161_s30, %s7519_s29 }
  0x91   : > { %p7516_p6 = pnand %p7514_p3, %p8045_p9  ;;  %p7522_p10 = scmp.lt.s32.totalorder %s7520_s11, %s7513_s9 }
  0x93   : > { %p7517_p8 = pneg %p7516_p6  ;;  %p7523_p13 = por %p7522_p10, %p7521_p5 }
  0x95   : > { %p7524_p1 = pnand %p7523_p13, %p7517_p8 }
  0x97   : > { %7527 = shalt.err (!%p7524_p1)
}
  0x98   : > { %7086 = dma.hbm_to_vmem [thread:$0]  (!%p8033_p7), %s8158_s18, 2048, %s8161_s30, %s9512_s3, %s9556_s27, %s9556_s27, %s9555_s16  }
  0x99   : > { %s8191_s5 = sadd.s32 4294967295, %s7866_s26   ;;  %s9511_s20 = sadd.s32 4294967294, %s7866_s26  }
  0x9a   : > { %9558 = sst [smem:[#allocation38_spill]] %s8191_s5  ;;  %p103_p12 = scmp.ne.s32.totalorder %s7850_s22, %s7846_s21 }
  0x9b   : > { %p9526_p4 = scmp.eq.s32.totalorder %s8191_s5, 0  ;;  %p9525_p0 = scmp.eq.s32.totalorder %s8191_s5, 1 }
  0x9c   : > { %p369_p2 = scmp.eq.s32.totalorder %s9511_s20, 1  ;;  %p6366_p3 = scmp.ge.s32.totalorder %s7866_s26, 1 }
  0x9d   : > { %p8202_p11 = por %p9526_p4, %p103_p12  ;;  %p9561_p6 = scmp.ne.s32.totalorder %s7854_s23, %s7850_s22 }
  0x9e   : > { %p8216_p5 = por %p369_p2, %p103_p12  ;;  %p404_p10 = scmp.lt.s32.totalorder %s7866_s26, 3 }
  0x9f   : > { %s9559_s24 = scalar_select %p8202_p11, 1, 0 }
  0xa0   : > { %p8212_p8 = por %p9525_p0, %p9561_p6  ;;  %s7025_s21 = smul.u32 192, %s8017_s14 }
  0xa1   : > { %9560 = sst [smem:[#allocation39_spill]] %s9559_s24  ;;  %p8222_p13 = pnand %p6366_p3, %p404_p10 }
  0xa2   : > { %s9562_s18 = scalar_select %p8212_p8, 1, 0 }
  0xa3   : > { %s9564_s30 = scalar_select %p8216_p5, 1, 0 }
  0xa4   : > { %9563 = sst [smem:[#allocation40_spill]] %s9562_s18  ;;  %s7876_s19 = smov [#allocation3]  }
  0xa5   : > { %9565 = sst [smem:[#allocation41_spill]] %s9564_s30  ;;  %s419_s29 = sshll.u32 %s7876_s19, 4  ;;  %s420_s29 = int_to_ptr.vmem [resolvable:$true] %s419_s29 }
  0xa6   : > { %s9566_s9 = scalar_select %p8222_p13, 1, 0 }
  0xa7   : > { %p7061_p1 = pneg %p8222_p13  ;;  %s7026_s11 = smul.u32 3072, %s7862_s25 }
  0xa8   : > { %s460_s20 = scalar_lea.vmem [#allocation8], %s7025_s21  ;;  %s7528_s24 = scalar_lea.hbm %s9481_s0, 256 }
  0xa9   : > { %s467_s3 = sshll.u32 %s460_s20, 4  ;;  %p8231_p12 = pnand %p7061_p1, %p9526_p4  ;;  %s8240_s3 = int_to_ptr.vmem [resolvable:$true] %s467_s3 }
  0xaa   : > { %s8238_s26 = scalar_lea.hbm %s9483_s2, %s7026_s11  ;;  %p7529_p2 = scmp.ne.s32.totalorder %s9481_s0, %s7528_s24 }
  0xab   : > { %p7530_p3 = pneg %p8231_p12  ;;  %p7535_p1 = scmp.lt.u32.totalorder %s7528_s24, %s9481_s0 }
  0xad   : > { %p7531_p6 = pnand %p7530_p3, %p7529_p2 }
  0xaf   : > { %p7532_p10 = pneg %p7531_p6 }
  0xb1   : > { %p7537_p0 = pnand %p7535_p1, %p7532_p10 }
  0xb3   : > { %7540 = shalt.err (!%p7537_p0)
}
  0xb4   : > { %s7541_s23 = scalar_lea.vmem %s420_s29, 256  ;;  %p7549_p11 = scmp.lt.s32.totalorder %s420_s29, %s420_s29 }
  0xb5   : > { %p7542_p4 = scmp.ne.s32.totalorder %s420_s29, %s7541_s23  ;;  %p7550_p13 = scmp.lt.s32.totalorder %s7541_s23, %s7541_s23 }
  0xb7   : > { %p7544_p5 = pnand %p7542_p4, %p7530_p3  ;;  %p7551_p7 = por %p7550_p13, %p7549_p11 }
  0xb9   : > { %p7545_p8 = pneg %p7544_p5 }
  0xbb   : > { %p7552_p9 = pnand %p7551_p7, %p7545_p8 }
  0xbd   : > { %7555 = shalt.err (!%p7552_p9)
}
  0xbe   : > { %7064 = dma.hbm_to_vmem [thread:$0]  (!%p8231_p12), %s9481_s0, 256, %s420_s29, [#allocation4], %s9556_s27, %s9556_s27, %s9555_s16  }
  0xbf   : > { %s7556_s5 = scalar_lea.hbm %s8238_s26, 3072  ;;  %p9568_p0 = scmp.ne.s32.totalorder %s9551_s17, 0 }
  0xc0   : > { %p7557_p4 = scmp.ne.s32.totalorder %s8238_s26, %s7556_s5  ;;  %s7561_s7 = scalar_lea.hbm %s9483_s2, 6144 }
  0xc1   : > { %p7562_p9 = scmp.lt.u32.totalorder %s8238_s26, %s9483_s2  ;;  %p7563_p8 = scmp.lt.u32.totalorder %s7561_s7, %s7556_s5 }
  0xc2   : > { %p7559_p11 = pnand %p7557_p4, %p9568_p0  ;;  %p7565_p13 = scmp.lt.u32.totalorder %s7556_s5, %s8238_s26 }
  0xc3   : > { %p7564_p5 = por %p7563_p8, %p7562_p9 }
  0xc4   : > { %p7560_p7 = pneg %p7559_p11 }
  0xc5   : > { %p7566_p2 = por %p7565_p13, %p7564_p5 }
  0xc7   : > { %p7567_p3 = pnand %p7566_p2, %p7560_p7 }
  0xc9   : > { %7570 = shalt.err (!%p7567_p3)
}
  0xca   : > { %s7571_s16 = scalar_lea.vmem %s8240_s3, 3072  ;;  %s7877_s27 = smov [#allocation8]  }
  0xcb   : > { %p7572_p12 = scmp.ne.s32.totalorder %s8240_s3, %s7571_s16  ;;  %s7576_s29 = sshll.u32 %s7877_s27, 4  ;;  %s7577_s29 = int_to_ptr.vmem [resolvable:$false] %s7576_s29 }
  0xcc   : > { %s7578_s21 = scalar_lea.vmem %s7577_s29, 6144  ;;  %p7579_p1 = scmp.lt.s32.totalorder %s8240_s3, %s7577_s29 }
  0xcd   : > { %p7574_p6 = pnand %p7572_p12, %p9568_p0  ;;  %p7580_p4 = scmp.lt.s32.totalorder %s7578_s21, %s7571_s16 }
  0xcf   : > { %p7575_p10 = pneg %p7574_p6  ;;  %p7581_p11 = por %p7580_p4, %p7579_p1 }
  0xd1   : > { %p7582_p9 = pnand %p7581_p11, %p7575_p10 }
  0xd3   : > { %7585 = shalt.err (!%p7582_p9)
}
  0xd4   : > { %s7878_s20 = smov 192   ;;  %s7879_s23 = smov 12  }
  0xd5   : > { %p9569_p7 = scmp.ne.s32.totalorder %s9550_s10, 0  ;;  %s9570_s22 = scalar_lea.sflag [#allocation7], %s8014_s13 }
  0xd6   : > { %s8288_s24 = scalar_lea.hbm %s9485_s4, %s8074_s15  ;;  %s502_s30 = scalar_lea.vmem [#allocation11], %s8038_s28 }
  0xd7   : > { %7071 = dma.hbm_to_vmem [thread:$0]  (!%p9569_p7), %s8238_s26, 3072, %s8240_s3, %s9570_s22, %s7878_s20, %s7878_s20, %s7879_s23  }
  0xd8   : > { %s509_s7 = sshll.u32 %s502_s30, 4  ;;  %s7586_s11 = scalar_lea.hbm %s8288_s24, 1024  ;;  %s8291_s7 = int_to_ptr.vmem [resolvable:$true] %s509_s7 }
  0xd9   : > { %p7587_p8 = scmp.ne.s32.totalorder %s8288_s24, %s7586_s11  ;;  %s7591_s26 = scalar_lea.hbm %s9485_s4, 2048 }
  0xda   : > { %p7592_p2 = scmp.lt.u32.totalorder %s8288_s24, %s9485_s4  ;;  %p7593_p3 = scmp.lt.u32.totalorder %s7591_s26, %s7586_s11 }
  0xdb   : > { %p7589_p5 = pnand %p7587_p8, %p9568_p0  ;;  %p7595_p6 = scmp.lt.u32.totalorder %s7586_s11, %s8288_s24 }
  0xdc   : > { %p7594_p12 = por %p7593_p3, %p7592_p2 }
  0xdd   : > { %p7590_p13 = pneg %p7589_p5 }
  0xde   : > { %p7596_p10 = por %p7595_p6, %p7594_p12 }
  0xe0   : > { %p7597_p1 = pnand %p7596_p10, %p7590_p13 }
  0xe2   : > { %7600 = shalt.err (!%p7597_p1)
}
  0xe3   : > { %s7601_s29 = scalar_lea.vmem %s8291_s7, 1024  ;;  %s7880_s21 = smov [#allocation11]  }
  0xe4   : > { %p7602_p4 = scmp.ne.s32.totalorder %s8291_s7, %s7601_s29  ;;  %s7606_s20 = sshll.u32 %s7880_s21, 4  ;;  %s7607_s20 = int_to_ptr.vmem [resolvable:$false] %s7606_s20 }
  0xe5   : > { %s7608_s23 = scalar_lea.vmem %s7607_s20, 2048  ;;  %p7609_p8 = scmp.lt.s32.totalorder %s8291_s7, %s7607_s20 }
  0xe6   : > { %p7604_p11 = pnand %p7602_p4, %p9568_p0  ;;  %p7610_p5 = scmp.lt.s32.totalorder %s7608_s23, %s7601_s29 }
  0xe8   : > { %p7605_p9 = pneg %p7604_p11  ;;  %p7611_p2 = por %p7610_p5, %p7609_p8 }
  0xea   : > { %p7612_p3 = pnand %p7611_p2, %p7605_p9 }
  0xec   : > { %7615 = shalt.err (!%p7612_p3)
}
  0xed   : > { %s9571_s22 = smov 4   ;;  %s9572_s18 = smov 64  }
  0xee   : > { %s9573_s5 = scalar_lea.sflag [#allocation10], %s8014_s13  ;;  %s8323_s19 = scalar_lea.hbm %s9487_s6, %s8074_s15 }
  0xef   : > { %7077 = dma.hbm_to_vmem [thread:$0]  (!%p9569_p7), %s8288_s24, 1024, %s8291_s7, %s9573_s5, %s9572_s18, %s9572_s18, %s9571_s22  }
  0xf0   : > { %s544_s3 = scalar_lea.vmem [#allocation14], %s8038_s28  ;;  %s7616_s16 = scalar_lea.hbm %s8323_s19, 1024 }
  0xf1   : > { %s551_s26 = sshll.u32 %s544_s3, 4  ;;  %p7617_p13 = scmp.ne.s32.totalorder %s8323_s19, %s7616_s16  ;;  %s8326_s26 = int_to_ptr.vmem [resolvable:$true] %s551_s26 }
  0xf2   : > { %s7621_s7 = scalar_lea.hbm %s9487_s6, 2048  ;;  %p7622_p10 = scmp.lt.u32.totalorder %s8323_s19, %s9487_s6 }
  0xf3   : > { %p7619_p12 = pnand %p7617_p13, %p9568_p0  ;;  %p7623_p1 = scmp.lt.u32.totalorder %s7621_s7, %s7616_s16 }
  0xf4   : > { %p7625_p11 = scmp.lt.u32.totalorder %s7616_s16, %s8323_s19 }
  0xf5   : > { %p7620_p6 = pneg %p7619_p12  ;;  %p7624_p4 = por %p7623_p1, %p7622_p10 }
  0xf7   : > { %p7626_p9 = por %p7625_p11, %p7624_p4 }
  0xf9   : > { %p7627_p8 = pnand %p7626_p9, %p7620_p6 }
  0xfb   : > { %7630 = shalt.err (!%p7627_p8)
}
  0xfc   : > { %s7631_s28 = scalar_lea.vmem %s8326_s26, 1024  ;;  %s7881_s21 = smov [#allocation14]  }
  0xfd   : > { %p7632_p5 = scmp.ne.s32.totalorder %s8326_s26, %s7631_s28  ;;  %s7636_s20 = sshll.u32 %s7881_s21, 4  ;;  %s7637_s20 = int_to_ptr.vmem [resolvable:$false] %s7636_s20 }
  0xfe   : > { %s7638_s23 = scalar_lea.vmem %s7637_s20, 2048  ;;  %p7639_p13 = scmp.lt.s32.totalorder %s8326_s26, %s7637_s20 }
  0xff   : > { %p7634_p2 = pnand %p7632_p5, %p9568_p0  ;;  %p7640_p12 = scmp.lt.s32.totalorder %s7638_s23, %s7631_s28 }
 0x101   : > { %p7635_p3 = pneg %p7634_p2  ;;  %p7641_p10 = por %p7640_p12, %p7639_p13 }
 0x103   : > { %p7642_p1 = pnand %p7641_p10, %p7635_p3 }
 0x105   : > { %7645 = shalt.err (!%p7642_p1)
}
 0x106   : > { %s9574_s5 = scalar_lea.sflag [#allocation13], %s8014_s13  ;;  %s8358_s3 = scalar_lea.hbm %s9489_s8, %s8116_s12 }
 0x107   : > { %7083 = dma.hbm_to_vmem [thread:$0]  (!%p9569_p7), %s8323_s19, 1024, %s8326_s26, %s9574_s5, %s9572_s18, %s9572_s18, %s9571_s22  }
 0x108   : > { %s586_s16 = scalar_lea.vmem [#allocation17], %s8113_s1  ;;  %s7646_s24 = scalar_lea.hbm %s8358_s3, 2048 }
 0x109   : > { %s593_s27 = sshll.u32 %s586_s16, 4  ;;  %p7647_p6 = scmp.ne.s32.totalorder %s8358_s3, %s7646_s24  ;;  %s8361_s27 = int_to_ptr.vmem [resolvable:$true] %s593_s27 }
 0x10a   : > { %s7651_s26 = scalar_lea.hbm %s9489_s8, 4096  ;;  %p7652_p9 = scmp.lt.u32.totalorder %s8358_s3, %s9489_s8 }
 0x10b   : > { %p7649_p4 = pnand %p7647_p6, %p9568_p0  ;;  %p7653_p8 = scmp.lt.u32.totalorder %s7651_s26, %s7646_s24 }
 0x10c   : > { %p7655_p2 = scmp.lt.u32.totalorder %s7646_s24, %s8358_s3 }
 0x10d   : > { %p7650_p11 = pneg %p7649_p4  ;;  %p7654_p5 = por %p7653_p8, %p7652_p9 }
 0x10f   : > { %p7656_p3 = por %p7655_p2, %p7654_p5 }
 0x111   : > { %p7657_p13 = pnand %p7656_p3, %p7650_p11 }
 0x113   : > { %7660 = shalt.err (!%p7657_p13)
}
 0x114   : > { %s7661_s1 = scalar_lea.vmem %s8361_s27, 2048  ;;  %s7882_s15 = smov [#allocation17]  }
 0x115   : > { %p7662_p12 = scmp.ne.s32.totalorder %s8361_s27, %s7661_s1  ;;  %s7666_s28 = sshll.u32 %s7882_s15, 4  ;;  %s7667_s28 = int_to_ptr.vmem [resolvable:$false] %s7666_s28 }
 0x116   : > { %s7668_s21 = scalar_lea.vmem %s7667_s28, 4096  ;;  %p7669_p6 = scmp.lt.s32.totalorder %s8361_s27, %s7667_s28 }
 0x117   : > { %p7664_p10 = pnand %p7662_p12, %p9568_p0  ;;  %p7670_p4 = scmp.lt.s32.totalorder %s7668_s21, %s7661_s1 }
 0x119   : > { %p7665_p1 = pneg %p7664_p10  ;;  %p7671_p9 = por %p7670_p4, %p7669_p6 }
 0x11b   : > { %p7672_p8 = pnand %p7671_p9, %p7665_p1 }
 0x11d   : > { %7675 = shalt.err (!%p7672_p8)
}
 0x11e   : > { %s9575_s20 = scalar_lea.sflag [#allocation16], %s8014_s13  ;;  %s7027_s23 = smul.u32 48, %s8017_s14 }
 0x11f   : > { %7089 = dma.hbm_to_vmem [thread:$0]  (!%p9569_p7), %s8358_s3, 2048, %s8361_s27, %s9575_s20, %s9572_s18, %s9572_s18, %s9571_s22  }
 0x120   : > { %s7028_s5 = smul.u32 768, %s7862_s25  ;;  %s9576_s16 = sld [smem:[#allocation46_spill]] }
 0x121   : > { %s607_s7 = scalar_lea.vmem [#allocation18], %s7027_s23  ;;  %s604_s19 = scalar_lea.sflag [#allocation19], %s8017_s14 }
 0x122   : > { %s614_s13 = sshll.u32 %s607_s7, 4  ;;  %s8396_s13 = int_to_ptr.vmem [resolvable:$true] %s614_s13 }
 0x126   : > { %s8394_s24 = scalar_lea.hbm %s9576_s16, %s7028_s5  ;;  %s7681_s3 = scalar_lea.hbm %s9576_s16, 1536 }
 0x127   : > { %s7676_s26 = scalar_lea.hbm %s8394_s24, 768  ;;  %p7682_p3 = scmp.lt.u32.totalorder %s8394_s24, %s9576_s16 }
 0x128   : > { %p7677_p11 = scmp.ne.s32.totalorder %s8394_s24, %s7676_s26  ;;  %p7683_p13 = scmp.lt.u32.totalorder %s7681_s3, %s7676_s26 }
 0x129   : > { %p7685_p10 = scmp.lt.u32.totalorder %s7676_s26, %s8394_s24 }
 0x12a   : > { %p7679_p5 = pnand %p7677_p11, %p9568_p0  ;;  %p7684_p12 = por %p7683_p13, %p7682_p3 }
 0x12c   : > { %p7680_p2 = pneg %p7679_p5  ;;  %p7686_p1 = por %p7685_p10, %p7684_p12 }
 0x12e   : > { %p7687_p6 = pnand %p7686_p1, %p7680_p2 }
 0x130   : > { %7690 = shalt.err (!%p7687_p6)
}
 0x131   : > { %s7691_s12 = scalar_lea.vmem %s8396_s13, 768  ;;  %s7883_s1 = smov [#allocation18]  }
 0x132   : > { %p7692_p4 = scmp.ne.s32.totalorder %s8396_s13, %s7691_s12  ;;  %s7696_s15 = sshll.u32 %s7883_s1, 4  ;;  %s7697_s15 = int_to_ptr.vmem [resolvable:$false] %s7696_s15 }
 0x133   : > { %s7698_s28 = scalar_lea.vmem %s7697_s15, 1536  ;;  %p7699_p11 = scmp.lt.s32.totalorder %s8396_s13, %s7697_s15 }
 0x134   : > { %p7694_p9 = pnand %p7692_p4, %p9568_p0  ;;  %p7700_p5 = scmp.lt.s32.totalorder %s7698_s28, %s7691_s12 }
 0x136   : > { %p7695_p8 = pneg %p7694_p9  ;;  %p7701_p3 = por %p7700_p5, %p7699_p11 }
 0x138   : > { %p7702_p13 = pnand %p7701_p3, %p7695_p8 }
 0x13a   : > { %7705 = shalt.err (!%p7702_p13)
}
 0x13b   : > { %s7884_s21 = smov 384   ;;  %s7885_s20 = smov 24  }
 0x13c   : > { %7092 = dma.hbm_to_vmem [thread:$0]  (!%p9569_p7), %s8394_s24, 768, %s8396_s13, %s604_s19, %s7884_s21, %s7884_s21, %s7885_s20  }
 0x13d   : > { %p9577_p0 = scmp.ne.s32.totalorder %s9566_s9, 0 }
 0x13e   : > { %s9578_s17 = sld [smem:[#allocation38_spill]] (!%p9577_p0) }
 0x13f   : > { %626 = sbr.rel (%p9577_p0) target bundleno = 4841 (0x12e9), region = 60 }
 0x144   : > { %p9579_p2 = scmp.eq.s32.totalorder (!%p9577_p0), %s9578_s17, 0 }
 0x146   : > { %7813 = dma.done.wait (%p9579_p2), [#allocation4], 256   ;;  %p9580_p12 = pmov %p9579_p2 }
 0x147   : > { %s9581_s23 = sld [smem:[#allocation32_spill]]  ;;  %s9582_s5 = sld [smem:[#allocation39_spill]] }
 0x148   : > { %7815 = vsyncadd (%p9580_p12), [#allocation4], 4294967040  ;;  %s8429_s30 = sand.u32 1, %s9578_s17  }
 0x149   : > { %s633_s14 = scalar_lea.sflag [#allocation7], %s8429_s30 }
 0x14d   : > { %s8432_s11 = sand.u32 1, %s9581_s23   ;;  %p9583_p7 = scmp.ne.s32.totalorder %s9582_s5, 0 }
 0x14e   : > { %s8435_s10 = sshll.u32 %s8432_s11, 4 }
 0x14f   : > { %s636_s9 = scalar_lea.vmem [#allocation6], %s8435_s10 }
 0x150   : > { %7817 = dma.done.wait (%p9583_p7), %s633_s14, 3328  }
 0x151   : > { %7819 = vsyncadd (%p9583_p7), %s633_s14, 4294963968  ;;  %s7029_s24 = smul.u32 192, %s8432_s11  ;;  %s6395_s7 = sshll.u32 %s8432_s11, 6 }
 0x152   : > { %s651_s19 = scalar_lea.sflag [#allocation10], %s8429_s30  ;;  %s8448_s26 = scalar_lea.vmem [#allocation9], %s6395_s7 }
 0x153   : > { %s8445_s13 = scalar_lea.vmem [#allocation8], %s7029_s24 }
 0x154   : > { %7821 = dma.done.wait (%p9583_p7), %s651_s19, 2048  }
 0x155   : > { %7823 = vsyncadd (%p9583_p7), %s651_s19, 4294965248  ;;  %s6397_s22 = sshll.u32 %s8432_s11, 7  ;;  %s8455_s18 = scalar_lea.vmem [#allocation11], %s6395_s7 }
 0x156   : > { %s669_s3 = scalar_lea.sflag [#allocation13], %s8429_s30  ;;  %s8458_s27 = scalar_lea.vmem [#allocation12], %s6397_s22 }
 0x157   : > { %7825 = dma.done.wait (%p9583_p7), %s669_s3, 3072  }
 0x158   : > { %7827 = vsyncadd (%p9583_p7), %s669_s3, 4294964224  ;;  %s8464_s29 = scalar_lea.vmem [#allocation14], %s6395_s7  ;;  %s687_s12 = scalar_lea.sflag [#allocation16], %s8429_s30 }
 0x159   : > { %s8467_s1 = scalar_lea.vmem [#allocation15], %s6397_s22 }
 0x15a   : > { %7829 = dma.done.wait (%p9583_p7), %s687_s12, 4096  }
 0x15b   : > { %7831 = vsyncadd (%p9583_p7), %s687_s12, 4294963200  ;;  %s7030_s15 = smul.u32 48, %s8432_s11  ;;  %s8474_s28 = scalar_lea.vmem [#allocation17], %s6397_s22 }
 0x15c   : > { %s705_s21 = scalar_lea.sflag [#allocation19], %s8432_s11 }
 0x15d   : > { %s8477_s20 = scalar_lea.vmem [#allocation18], %s7030_s15 }
 0x15e   : > { %7833 = dma.done.wait (%p9583_p7), %s705_s21, 768  }
 0x15f   : > { %7835 = vsyncadd (%p9583_p7), %s705_s21, 4294966528  ;;  %s8484_s17 = scalar_lea.vmem [#allocation21], %s8435_s10  ;;  %s8487_s23 = scalar_lea.vmem [#allocation23], %s8435_s10 }
 0x160   : > { %s9584_s14 = sld [smem:[#allocation34_spill]] }
 0x166   : > { %p6403_p10 = scmp.ne.s32.totalorder %s9584_s14, 0 }
 0x167   : > { %v804_v0 = vld [vmem:[#allocation3] sm:$0xff] (!%p6403_p10)  ;;  %v805_v1 = vld [vmem:[#allocation3 + $0x8] sm:$0xff] (!%p6403_p10)  ;;  %v808_v2 = vlaneseq (!%p6403_p10)  ;;  %vm814_vm0 = vcmask (!%p6403_p10), 64512   ;;  %v7886_v5 = vmov (!%p6403_p10), -1e+30  }
 0x168   : > { %803 = sbr.rel (%p6403_p10) target bundleno = 367 (0x16f), region = 104  ;;  %806 = vst [vmem:[#allocation20] sm:$0xff] (!%p6403_p10), %v804_v0  ;;  %807 = vst [vmem:[#allocation20 + $0x8] sm:$0xff] (!%p6403_p10), %v805_v1 }
 0x169   : > { %v809_v3 = vshrl.u32 (!%p6403_p10), %v808_v2, 7  ;;  %v811_v4 = vand.u32 (!%p6403_p10), 127, %v808_v2 }
 0x16b   : > { %vm812_vm1 = vcmp.le.s32.totalorder (!%p6403_p10), %v811_v4, %v809_v3 }
 0x16c   : > { %v813_v6 = vsel (!%p6403_p10), %vm812_vm1, 0.0, %v7886_v5 }
 0x16d   : > { %815 = vst.msk [vmem:[#allocation2] sm:$0xff] (!%p6403_p10), %vm814_vm0, %v813_v6 }
 0x16f PF: > { %v7205_v7 = vld [vmem:[%s8445_s13 + $0x4] ss:$12 sps:$4 sm:$0xff]   ;;  %v7207_v8 = vld [vmem:[%s8445_s13] ss:$12 sps:$4 sm:$0xff]   ;;  %v7887_v9 = vmov 0   ;;  %v7888_v28 = vmov 0.0   ;;  %v859_v30 = vlaneseq }
 0x170   : > { %1031 = vmatprep.mubr.bf16.mxu0 %v7887_v9  ;;  %999 = vmatprep.subr.bf16.mxu0 %v7205_v7  ;;  %v7208_v10 = vld [vmem:[%s8445_s13 + $0x1c] ss:$12 sps:$4 sm:$0xff]   ;;  %v7210_v11 = vld [vmem:[%s8445_s13 + $0x18] ss:$12 sps:$4 sm:$0xff]   ;;  %v7211_v12 = vld [vmem:[%s8445_s13 + $0x34] ss:$12 sps:$4 sm:$0xff]   ;;  %v8554_v60 = vpack.i.b16 %v7887_v9, %v7887_v9 }
 0x171   : > { %1000 = vmatpush1.bf16.msra.mxu0 %v7207_v8  ;;  %v7213_v13 = vld [vmem:[%s8445_s13 + $0x30] ss:$12 sps:$4 sm:$0xff]   ;;  %v7214_v14 = vld [vmem:[%s8445_s13 + $0x4c] ss:$12 sps:$4 sm:$0xff]   ;;  %v7216_v15 = vld [vmem:[%s8445_s13 + $0x48] ss:$12 sps:$4 sm:$0xff]   ;;  %6753 = vmatprep.subr.bf16.mxu1 %v7888_v28 }
 0x172   : > { %1001 = vmatprep.subr.bf16.mxu0 %v7208_v10  ;;  %v7217_v16 = vld [vmem:[%s8445_s13 + $0x64] ss:$12 sps:$4 sm:$0xff]   ;;  %v7219_v17 = vld [vmem:[%s8445_s13 + $0x60] ss:$12 sps:$4 sm:$0xff]   ;;  %v7220_v18 = vld [vmem:[%s8445_s13 + $0x7c] ss:$12 sps:$4 sm:$0xff]  }
 0x173   : > { %v7222_v19 = vld [vmem:[%s8445_s13 + $0x78] ss:$12 sps:$4 sm:$0xff]   ;;  %v7223_v20 = vld [vmem:[%s8445_s13 + $0x94] ss:$12 sps:$4 sm:$0xff]   ;;  %v7225_v21 = vld [vmem:[%s8445_s13 + $0x90] ss:$12 sps:$4 sm:$0xff]  }
 0x174   : > { %v7226_v22 = vld [vmem:[%s8445_s13 + $0xac] ss:$12 sps:$4 sm:$0xff]   ;;  %v7228_v23 = vld [vmem:[%s8445_s13 + $0xa8] ss:$12 sps:$4 sm:$0xff]   ;;  %v821_v24 = vld [vmem:[#allocation20] sm:$0xff]  ;;  %v8516_v31 = vshrl.u32 %v859_v30, 7 }
 0x175   : > { %1002 = vmatpush1.bf16.msra.mxu0 %v7210_v11  ;;  %v822_v25 = vld [vmem:[#allocation20 + $0x8] sm:$0xff]  ;;  %v816_v33 = vld [vmem:[%s8477_s20] sm:$0xff]  ;;  %s7889_s5 = smov 32   ;;  %s7890_s11 = smov 96   ;;  %vm7892_vm2 = vmmov 0   ;;  %vm1943_vm3 = vcmask 261120  }
 0x176   : > { %1003 = vmatprep.subr.bf16.mxu0 %v7211_v12  ;;  %v8507_v26 = vpack.c.bf16 %v822_v25, %v821_v24  ;;  %v7229_v27 = vld [vmem:[%s8445_s13 + $0x8] ss:$12 sps:$4 sm:$0xff]   ;;  %v7230_v29 = vld [vmem:[%s8445_s13 + $0x20] ss:$12 sps:$4 sm:$0xff]   ;;  %v8519_v32 = vsub.s32 0, %v8516_v31  ;;  %s7891_s24 = smov 64   ;;  %6769 = vmatprep.mubr.msk.bf16.mxu1 %vm7892_vm2, %v7888_v28 }
 0x177   : > { %6754 = vmatpush3.bf16.msra.mxu1 %v7229_v27  ;;  %v817_v34 = vld [vmem:[%s8477_s20 + $0x8] sm:$0xff]  ;;  %v7893_v55 = vmov 1983009808   ;;  %v7894_v57 = vmov 1934713408   ;;  %vm2312_vm4 = vcmask 64512  }
 0x178   : > { %6755 = vmatprep.subr.bf16.mxu1 %v7888_v28  ;;  %v7231_v35 = vld [vmem:[%s8445_s13 + $0x38] ss:$12 sps:$4 sm:$0xff]   ;;  %v862_v36 = vrot.slane %v816_v33, %v8519_v32  ;;  %v866_v37 = vrot.slane %v817_v34, %v8519_v32  ;;  %v7232_v48 = vld [vmem:[%s8445_s13 + $0x50] ss:$12 sps:$4 sm:$0xff]   ;;  %v7233_v51 = vld [vmem:[%s8445_s13 + $0x68] ss:$12 sps:$4 sm:$0xff]   ;;  %v1117_v56 = vunpack.c.l.s4 %v7893_v55  ;;  %v1148_v58 = vunpack.c.l.s4 %v7894_v57 }
 0x179   : > { %1004 = vmatpush1.bf16.msra.mxu0 %v7213_v13  ;;  %v7234_v52 = vld [vmem:[%s8445_s13 + $0x80] ss:$12 sps:$4 sm:$0xff]   ;;  %v7235_v53 = vld [vmem:[%s8445_s13 + $0x98] ss:$12 sps:$4 sm:$0xff]   ;;  %v7236_v54 = vld [vmem:[%s8445_s13 + $0xb0] ss:$12 sps:$4 sm:$0xff]  }
 0x17a   : > { %1005 = vmatprep.subr.bf16.mxu0 %v7214_v14  ;;  %v1118_v59 = vunpack.c.0.s8 %v1117_v56  ;;  %v1149_v61 = vunpack.c.0.s8 %v1148_v58  ;;  %vm2412_vm5 = vcmask 1043456   ;;  %vm3076_vm6 = vcmask 523264   ;;  %s9585_s10 = sld [smem:[#allocation34_spill]]  ;;  %s6026_s3 = sshll.u32 %s8484_s17, 4  ;;  %s9360_s3 = int_to_ptr.vmem [resolvable:$true] %s6026_s3 }
 0x17b   : > { %6756 = vmatpush3.bf16.msra.mxu1 %v7230_v29  ;;  %vm3079_vm7 = vcmask 785408   ;;  %s7895_s12 = smov [#allocation21]  }
 0x17c   : > { %6757 = vmatprep.subr.bf16.mxu1 %v7888_v28  ;;  %v8557_v3 = vsub.s32 %v1118_v59, %v8516_v31  ;;  %v8561_v6 = vsub.s32 %v1149_v61, %v8516_v31 }
 0x17d   : > { %1006 = vmatpush1.bf16.msra.mxu0 %v7216_v15 }
 0x17e   : > { %1007 = vmatprep.subr.bf16.mxu0 %v7217_v16 }
 0x17f   : > { %6758 = vmatpush3.bf16.msra.mxu1 %v7231_v35 }
 0x180   : > { %6759 = vmatprep.subr.bf16.mxu1 %v7888_v28  ;;  %s6629_s7 = sshll.u32 %s9585_s10, 8 }
 0x181   : > { %1008 = vmatpush1.bf16.msra.mxu0 %v7219_v17 }
 0x182   : > { %1009 = vmatprep.subr.bf16.mxu0 %v7220_v18 }
 0x183   : > { %6760 = vmatpush3.bf16.msra.mxu1 %v7232_v48 }
 0x184   : > { %6761 = vmatprep.subr.bf16.mxu1 %v7888_v28 }
 0x185   : > { %1010 = vmatpush1.bf16.msra.mxu0 %v7222_v19 }
 0x186   : > { %1011 = vmatprep.subr.bf16.mxu0 %v7223_v20 }
 0x187   : > { %6762 = vmatpush3.bf16.msra.mxu1 %v7233_v51 }
 0x188   : > { %6763 = vmatprep.subr.bf16.mxu1 %v7888_v28 }
 0x189   : > { %1012 = vmatpush1.bf16.msra.mxu0 %v7225_v21 }
 0x18a   : > { %1013 = vmatprep.subr.bf16.mxu0 %v7226_v22 }
 0x18b   : > { %6764 = vmatpush3.bf16.msra.mxu1 %v7234_v52 }
 0x18c   : > { %6765 = vmatprep.subr.bf16.mxu1 %v7888_v28 }
 0x18d   : > { %1014 = vmatpush1.bf16.msra.mxu0 %v7228_v23 }
 0x18e   : > { %6797 = vmatprep.subr.bf16.mxu0 %v7888_v28 }
 0x18f   : > { %6766 = vmatpush3.bf16.msra.mxu1 %v7235_v53 }
 0x190   : > { %1032 = vmatmul.mubr.bf16.vlgmr.msra.gmra.mrb[0].mxu0 %v8507_v26  ;;  %6767 = vmatprep.subr.bf16.mxu1 %v7888_v28 }
 0x191   : > { %6799 = vmatprep.mubr.msk.bf16.mxu0 %vm7892_vm2, %v7888_v28 }
 0x193   : > { %6768 = vmatpush3.bf16.msra.mxu1 %v7236_v54 }
 0x194   : > { %6773 = vmatprep.subr.bf16.mxu1 %v7888_v28 }
 0x196   : > { %6770 = vmatmul.mubr.bf16.vlgmr.msra.gmra.mrb[0].mxu1 %v8507_v26 }
 0x197   : > { %6775 = vmatprep.mubr.msk.bf16.mxu1 %vm7892_vm2, %v7888_v28 }
 0x263   : > { %v1033_v38 = vpop.f32.mrb[0].mxu0 }
 0x264   : > { %v1034_v39 = vadd.f32 %v1033_v38, %v862_v36  ;;  %v1035_v40 = vpop.f32.mrb[1].mxu0 }
 0x265   : > { %v1036_v41 = vadd.f32 %v1035_v40, %v866_v37  ;;  %v1037_v42 = vpop.f32.mrb[2].mxu0 }
 0x266   : > { %v1038_v43 = vadd.f32 %v1037_v42, %v862_v36  ;;  %v1039_v44 = vpop.f32.mrb[3].mxu0  ;;  %v1083_v46 = vmul.f32 0.17677669, %v1034_v39 }
 0x267   : > { %5985 = vst [vmem:[%s8484_s17] sm:$0xff] %v1036_v41  ;;  %v1040_v45 = vadd.f32 %v1039_v44, %v866_v37 }
 0x268   : > { %v1084_v47 = vmul.f32 0.17677669, %v1038_v43 }
 0x269   : > { %v1375_v49 = vpack.c.bf16 %v1040_v45, %v1036_v41  ;;  %5986 = vst [vmem:[%s8484_s17 + $0x8] sm:$0xff] %v1040_v45 }
 0x26a   : > { %v1085_v50 = vpack.c.bf16 %v1084_v47, %v1083_v46 }
 0x26b   : > { %1381 = vrot.lane.b32.xlu1 %v1375_v49, %s7889_s5  ;;  %1377 = vrot.lane.b32.xlu0 %v1375_v49, %s7890_s11  ;;  %v1387_v1 = vshrl.u32 %v1375_v49, 16 }
 0x26c   : > { %v1097_v13 = vshrl.u32 %v1085_v50, 16 }
 0x26f   : > { %1379 = vrot.lane.b32.xlu0 %v1375_v49, %s7891_s24  ;;  %1087 = vrot.lane.b32.xlu1 %v1085_v50, %s7890_s11 }
 0x273   : > { %1089 = vrot.lane.b32.xlu0 %v1085_v50, %s7891_s24  ;;  %1091 = vrot.lane.b32.xlu1 %v1085_v50, %s7889_s5 }
 0x2dd   : > { %v1382_v62 = vpop.permute.xlu1 %1381  ;;  %v1378_v63 = vpop.permute.xlu0 %1377 }
 0x2de   : > { %v1385_v0 = vpack.i.b16 %v1378_v63, %v1375_v49  ;;  %v1388_v2 = vshrl.u32 %v1378_v63, 16  ;;  %v1396_v10 = vshrl.u32 %v1382_v62, 16 }
 0x2e0   : > { %v1389_v4 = vpack.i.b16 %v1388_v2, %v1387_v1  ;;  %v1399_v5 = vcombine.high %v1385_v0, %v8554_v60  ;;  %v1406_v14 = vrot.slane %v1385_v0, %v8557_v3 }
 0x2e1   : > { %v1380_v7 = vpop.permute.xlu0 %1379  ;;  %v1088_v8 = vpop.permute.xlu1 %1087 }
 0x2e2   : > { %v1465_v11 = vcombine.high %v1389_v4, %v8554_v60  ;;  %v1393_v12 = vpack.i.b16 %v1382_v62, %v1380_v7  ;;  %v1395_v15 = vshrl.u32 %v1380_v7, 16  ;;  %v1095_v16 = vpack.i.b16 %v1088_v8, %v1085_v50 }
 0x2e3   : > { %v1098_v17 = vshrl.u32 %v1088_v8, 16  ;;  %v1413_v18 = vrot.slane %v1399_v5, %v8557_v3  ;;  %v1472_v19 = vrot.slane %v1389_v4, %v8557_v3 }
 0x2e4   : > { %v1414_v20 = vcombine.high %v1393_v12, %v8554_v60  ;;  %v1421_v21 = vrot.slane %v1393_v12, %v8557_v3  ;;  %v1479_v22 = vrot.slane %v1465_v11, %v8557_v3  ;;  %v1397_v23 = vpack.i.b16 %v1396_v10, %v1395_v15 }
 0x2e5   : > { %v1099_v24 = vpack.i.b16 %v1098_v17, %v1097_v13  ;;  %v1115_v25 = vcombine.high %v1095_v16, %v8554_v60  ;;  %v1090_v26 = vpop.permute.xlu0 %1089  ;;  %v1122_v33 = vrot.slane %v1095_v16, %v8557_v3  ;;  %v1092_v54 = vpop.permute.xlu1 %1091 }
 0x2e6   : > { %v1428_v27 = vrot.slane %v1414_v20, %v8557_v3  ;;  %v1429_v29 = vcombine.low %v1406_v14, %v1421_v21  ;;  %v1430_v30 = vcombine.high %v1406_v14, %v1421_v21  ;;  %v1480_v34 = vcombine.high %v1397_v23, %v8554_v60 }
 0x2e7   : > { %v1487_v35 = vrot.slane %v1397_v23, %v8557_v3  ;;  %v1129_v36 = vrot.slane %v1115_v25, %v8557_v3  ;;  %v1105_v37 = vshrl.u32 %v1090_v26, 16  ;;  %v1181_v45 = vcombine.high %v1099_v24, %v8554_v60 }
 0x2e8   : > { %v1437_v38 = vrot.slane %v1429_v29, %v8561_v6  ;;  %v1444_v39 = vrot.slane %v1430_v30, %v8561_v6  ;;  %v1445_v40 = vcombine.low %v1413_v18, %v1428_v27  ;;  %v1446_v41 = vcombine.high %v1413_v18, %v1428_v27 }
 0x2e9   : > { %v1494_v42 = vrot.slane %v1480_v34, %v8557_v3  ;;  %v1495_v43 = vcombine.low %v1472_v19, %v1487_v35  ;;  %v1496_v44 = vcombine.high %v1472_v19, %v1487_v35  ;;  %v1188_v2 = vrot.slane %v1099_v24, %v8557_v3 }
 0x2ea   : > { %v1453_v46 = vrot.slane %v1445_v40, %v8561_v6  ;;  %v1460_v47 = vrot.slane %v1446_v41, %v8561_v6  ;;  %v1531_v48 = vcombine.low %v1437_v38, %v1444_v39  ;;  %v6440_v49 = vcombine.high %v1437_v38, %v1444_v39 }
 0x2eb   : > { %v1503_v50 = vrot.slane %v1495_v43, %v8561_v6  ;;  %v1510_v51 = vrot.slane %v1496_v44, %v8561_v6  ;;  %v1511_v52 = vcombine.low %v1479_v22, %v1494_v42  ;;  %v1512_v53 = vcombine.high %v1479_v22, %v1494_v42 }
 0x2ec   : > { %v1538_v55 = vrot.slane %v1531_v48, %v8557_v3  ;;  %v1546_v56 = vrot.slane %v6440_v49, %v8557_v3  ;;  %v1547_v57 = vcombine.low %v1453_v46, %v1460_v47  ;;  %v6441_v58 = vcombine.high %v1453_v46, %v1460_v47 }
 0x2ed   : > { %v1519_v59 = vrot.slane %v1511_v52, %v8561_v6  ;;  %v1526_v61 = vrot.slane %v1512_v53, %v8561_v6  ;;  %v1581_v62 = vcombine.low %v1503_v50, %v1510_v51  ;;  %v6442_v63 = vcombine.high %v1503_v50, %v1510_v51 }
 0x2ee   : > { %v1554_v0 = vrot.slane %v1547_v57, %v8557_v3  ;;  %v1562_v1 = vrot.slane %v6441_v58, %v8557_v3  ;;  %v1103_v4 = vpack.i.b16 %v1092_v54, %v1090_v26  ;;  %v1106_v11 = vshrl.u32 %v1092_v54, 16 }
 0x2ef   : > { %v1588_v5 = vrot.slane %v1581_v62, %v8557_v3  ;;  %v1596_v7 = vrot.slane %v6442_v63, %v8557_v3  ;;  %v1597_v8 = vcombine.low %v1519_v59, %v1526_v61  ;;  %v6443_v10 = vcombine.high %v1519_v59, %v1526_v61 }
 0x2f0   : > { %v1130_v12 = vcombine.high %v1103_v4, %v8554_v60  ;;  %v1137_v13 = vrot.slane %v1103_v4, %v8557_v3  ;;  %v1563_v14 = vcombine.low %v1538_v55, %v1546_v56  ;;  %v1571_v15 = vcombine.low %v1554_v0, %v1562_v1 }
 0x2f1   : > { %v1604_v16 = vrot.slane %v1597_v8, %v8557_v3  ;;  %v1612_v17 = vrot.slane %v6443_v10, %v8557_v3  ;;  %v1613_v18 = vcombine.low %v1588_v5, %v1596_v7  ;;  %v1107_v19 = vpack.i.b16 %v1106_v11, %v1105_v37 }
 0x2f2   : > { %v1144_v20 = vrot.slane %v1130_v12, %v8557_v3  ;;  %v1145_v21 = vcombine.low %v1122_v33, %v1137_v13  ;;  %v1146_v22 = vcombine.high %v1122_v33, %v1137_v13  ;;  %v1195_v23 = vrot.slane %v1181_v45, %v8557_v3 }
 0x2f3   : > { %v1570_v24 = vrot.slane %v1563_v14, %v8561_v6  ;;  %v1578_v25 = vrot.slane %v1571_v15, %v8561_v6  ;;  %v1621_v26 = vcombine.low %v1604_v16, %v1612_v17  ;;  %v1196_v35 = vcombine.high %v1107_v19, %v8554_v60 }
 0x2f4   : > { %v1153_v27 = vrot.slane %v1145_v21, %v8561_v6  ;;  %v1160_v29 = vrot.slane %v1146_v22, %v8561_v6  ;;  %v1161_v30 = vcombine.low %v1129_v36, %v1144_v20  ;;  %v1162_v34 = vcombine.high %v1129_v36, %v1144_v20 }
 0x2f5   : > { %v1203_v37 = vrot.slane %v1107_v19, %v8557_v3  ;;  %v1620_v33 = vrot.slane %v1613_v18, %v8561_v6  ;;  %v1628_v38 = vrot.slane %v1621_v26, %v8561_v6  ;;  %v1210_v43 = vrot.slane %v1196_v35, %v8557_v3 }
 0x2f6   : > { %v1169_v39 = vrot.slane %v1161_v30, %v8561_v6  ;;  %v1176_v40 = vrot.slane %v1162_v34, %v8561_v6  ;;  %v1247_v41 = vcombine.low %v1153_v27, %v1160_v29  ;;  %v6428_v42 = vcombine.high %v1153_v27, %v1160_v29 }
 0x2f7   : > { %v1211_v44 = vcombine.low %v1188_v2, %v1203_v37  ;;  %v1212_v45 = vcombine.high %v1188_v2, %v1203_v37  ;;  %v1629_v46 = vcombine.low %v1620_v33, %v1628_v38  ;;  %v1579_v49 = vcombine.low %v1570_v24, %v1578_v25 }
 0x2f8   : > { %v1254_v36 = vrot.slane %v1247_v41, %v8557_v3  ;;  %v1263_v47 = vcombine.low %v1169_v39, %v1176_v40  ;;  %v6429_v48 = vcombine.high %v1169_v39, %v1176_v40  ;;  %v1227_v52 = vcombine.low %v1195_v23, %v1210_v43 }
 0x2f9   : > { %v1219_v50 = vrot.slane %v1211_v44, %v8561_v6  ;;  %v1226_v51 = vrot.slane %v1212_v45, %v8561_v6  ;;  %v1228_v53 = vcombine.high %v1195_v23, %v1210_v43  ;;  %v1262_v54 = vrot.slane %v6428_v42, %v8557_v3 }
 0x2fa   : > { %v1270_v55 = vrot.slane %v1263_v47, %v8557_v3  ;;  %v1278_v56 = vrot.slane %v6429_v48, %v8557_v3  ;;  %v1633_v57 = vpack.i.b16 %v1629_v46, %v1579_v49  ;;  %v1235_v58 = vrot.slane %v1227_v52, %v8561_v6 }
 0x2fb   : > { %v1242_v59 = vrot.slane %v1228_v53, %v8561_v6  ;;  %v1297_v61 = vcombine.low %v1219_v50, %v1226_v51  ;;  %v6430_v62 = vcombine.high %v1219_v50, %v1226_v51  ;;  %v1580_v8 = vcombine.high %v1570_v24, %v1578_v25 }
 0x2fc   : > { %v1287_v63 = vcombine.low %v1270_v55, %v1278_v56  ;;  %v6444_v0 = vcombine.low %v1633_v57, %v1633_v57  ;;  %v1630_v10 = vcombine.high %v1620_v33, %v1628_v38  ;;  %v1279_v11 = vcombine.low %v1254_v36, %v1262_v54 }
 0x2fd   : > { %v1304_v1 = vrot.slane %v1297_v61, %v8557_v3  ;;  %v1312_v2 = vrot.slane %v6430_v62, %v8557_v3  ;;  %v1313_v4 = vcombine.low %v1235_v58, %v1242_v59  ;;  %v6431_v5 = vcombine.high %v1235_v58, %v1242_v59 }
 0x2fe   : > { %v1948_v7 = vsel %vm1943_vm3, %v6444_v0, 0  ;;  %v8623_v15 = vpack.i.b16 %v1630_v10, %v1580_v8  ;;  %v1294_v16 = vrot.slane %v1287_v63, %v8561_v6  ;;  %v1641_v18 = vshrl.u32 %v1630_v10, 16 }
 0x2ff   : > { %v1320_v12 = vrot.slane %v1313_v4, %v8557_v3  ;;  %v1328_v13 = vrot.slane %v6431_v5, %v8557_v3  ;;  %v1329_v14 = vcombine.low %v1304_v1, %v1312_v2  ;;  %6774 = vmatpush3.bf16.xpose.msra.mxu1 %v1948_v7  ;;  %v1640_v20 = vshrl.u32 %v1580_v8, 16  ;;  %v818_v1 = vld [vmem:[%s8477_s20 + $0x10] sm:$0xff]  ;;  %v1076_v4 = vpop.f32.mrb[0].mxu1 }
 0x300   : > { %6779 = vmatprep.subr.bf16.mxu1 %v7888_v28  ;;  %v6448_v19 = vcombine.low %v8623_v15, %v8623_v15  ;;  %v1286_v21 = vrot.slane %v1279_v11, %v8561_v6  ;;  %v6445_v37 = vcombine.high %v1633_v57, %v1633_v57  ;;  %v1635_v33 = vshrl.u32 %v1629_v46, 16  ;;  %v6771_v7 = vpop.f32.mrb[1].mxu1 }
 0x301   : > { %v1337_v17 = vcombine.low %v1320_v12, %v1328_v13  ;;  %v1336_v22 = vrot.slane %v1329_v14, %v8561_v6  ;;  %v1642_v25 = vpack.i.b16 %v1641_v18, %v1640_v20  ;;  %v1634_v40 = vshrl.u32 %v1579_v49, 16  ;;  %v1079_v8 = vpop.f32.mrb[2].mxu1  ;;  %v820_v13 = vld [vmem:[#allocation2] sm:$0xff] }
 0x302   : > { %v2132_v24 = vsel %vm1943_vm3, %v6448_v19, 0  ;;  %v1295_v26 = vcombine.low %v1286_v21, %v1294_v16  ;;  %v1296_v29 = vcombine.high %v1286_v21, %v1294_v16  ;;  %v1994_v43 = vsel %vm1943_vm3, %v6445_v37, 0  ;;  %v6772_v11 = vpop.f32.mrb[3].mxu1 }
 0x303   : > { %v1344_v23 = vrot.slane %v1337_v17, %v8561_v6  ;;  %6798 = vmatpush3.bf16.xpose.msra.mxu0 %v2132_v24  ;;  %v6450_v38 = vcombine.low %v1642_v25, %v1642_v25  ;;  %v1636_v44 = vpack.i.b16 %v1635_v33, %v1634_v40  ;;  %v6449_v57 = vcombine.high %v8623_v15, %v8623_v15 }
 0x304   : > { %6809 = vmatprep.subr.bf16.mxu0 %v7888_v28  ;;  %v1356_v36 = vshrl.u32 %v1296_v29, 16  ;;  %v1350_v52 = vshrl.u32 %v1295_v26, 16  ;;  %v6451_v61 = vcombine.high %v1642_v25, %v1642_v25  ;;  %v870_v2 = vrot.slane %v818_v1, %v8519_v32 }
 0x305   : > { %v1345_v27 = vcombine.low %v1336_v22, %v1344_v23  ;;  %v1346_v30 = vcombine.high %v1336_v22, %v1344_v23  ;;  %v2224_v45 = vsel %vm1943_vm3, %v6450_v38, 0  ;;  %v6446_v47 = vcombine.low %v1636_v44, %v1636_v44 }
 0x306   : > { %v6447_v54 = vcombine.high %v1636_v44, %v1636_v44  ;;  %v2178_v59 = vsel %vm1943_vm3, %v6449_v57, 0  ;;  %v2270_v63 = vsel %vm1943_vm3, %v6451_v61, 0  ;;  %v1077_v5 = vadd.f32 %v1076_v4, %v870_v2 }
 0x307   : > { %v1349_v34 = vpack.i.b16 %v1345_v27, %v1295_v26  ;;  %v1355_v35 = vpack.i.b16 %v1346_v30, %v1296_v29  ;;  %v1357_v42 = vshrl.u32 %v1346_v30, 16  ;;  %v1351_v49 = vshrl.u32 %v1345_v27, 16 }
 0x308   : > { %v2040_v51 = vsel %vm1943_vm3, %v6446_v47, 0  ;;  %v2086_v56 = vsel %vm1943_vm3, %v6447_v54, 0  ;;  %5987 = vst [vmem:[%s8487_s23] sm:$0xff] %v1077_v5  ;;  %v1080_v10 = vadd.f32 %v1079_v8, %v870_v2 }
 0x309   : > { %v6432_v39 = vcombine.low %v1349_v34, %v1349_v34  ;;  %v6436_v41 = vcombine.low %v1355_v35, %v1355_v35  ;;  %v1358_v46 = vpack.i.b16 %v1357_v42, %v1356_v36  ;;  %v6433_v48 = vcombine.high %v1349_v34, %v1349_v34 }
 0x30a   : > { %v1352_v53 = vpack.i.b16 %v1351_v49, %v1350_v52  ;;  %v6437_v62 = vcombine.high %v1355_v35, %v1355_v35  ;;  %v8675_v12 = vpack.c.bf16 %v1080_v10, %v1077_v5  ;;  %5988 = vst [vmem:[%s8487_s23 + $0x8] sm:$0xff] %v1080_v10 }
 0x30b   : > { %6776 = vmatmul.mubr.msk.bf16.vlgmr.msra.gmra.mrb[4].mxu1 %vm1943_vm3, %v6432_v39  ;;  %6800 = vmatmul.mubr.msk.bf16.vlgmr.msra.gmra.mrb[4].mxu0 %vm1943_vm3, %v6436_v41  ;;  %v6438_v50 = vcombine.low %v1358_v46, %v1358_v46  ;;  %v6439_v0 = vcombine.high %v1358_v46, %v1358_v46 }
 0x30c   : > { %6780 = vmatpush3.bf16.xpose.msra.mxu1 %v1994_v43  ;;  %6810 = vmatpush3.bf16.xpose.msra.mxu0 %v2224_v45  ;;  %v6434_v55 = vcombine.low %v1352_v53, %v1352_v53  ;;  %v6435_v58 = vcombine.high %v1352_v53, %v1352_v53 }
 0x30d   : > { %6781 = vmatprep.mubr.msk.bf16.mxu1 %vm7892_vm2, %v7888_v28  ;;  %6811 = vmatprep.mubr.msk.bf16.mxu0 %vm7892_vm2, %v7888_v28 }
 0x30e   : > { %6785 = vmatprep.subr.bf16.mxu1 %v7888_v28  ;;  %6821 = vmatprep.subr.bf16.mxu0 %v7888_v28 }
 0x313   : > { %6782 = vmatmul.mubr.msk.bf16.vlgmr.msra.gmra.mrb[8].mxu1 %vm1943_vm3, %v6433_v48  ;;  %6812 = vmatmul.mubr.msk.bf16.vlgmr.msra.gmra.mrb[8].mxu0 %vm1943_vm3, %v6438_v50 }
 0x314   : > { %6786 = vmatpush3.bf16.xpose.msra.mxu1 %v2040_v51  ;;  %6787 = vmatprep.mubr.msk.bf16.mxu1 %vm7892_vm2, %v7888_v28 }
 0x315   : > { %6791 = vmatprep.subr.bf16.mxu1 %v7888_v28  ;;  %6823 = vmatprep.mubr.msk.bf16.mxu0 %vm7892_vm2, %v7888_v28 }
 0x31b   : > { %6788 = vmatmul.mubr.msk.bf16.vlgmr.msra.gmra.mrb[12].mxu1 %vm1943_vm3, %v6434_v55 }
 0x31c   : > { %6792 = vmatpush3.bf16.xpose.msra.mxu1 %v2086_v56  ;;  %6793 = vmatprep.mubr.msk.bf16.mxu1 %vm7892_vm2, %v7888_v28 }
 0x31d   : > { %6803 = vmatprep.subr.bf16.mxu1 %v7888_v28 }
 0x323   : > { %6794 = vmatmul.mubr.msk.bf16.vlgmr.msra.gmra.mrb[16].mxu1 %vm1943_vm3, %v6435_v58 }
 0x324   : > { %6804 = vmatpush3.bf16.xpose.msra.mxu1 %v2178_v59  ;;  %6805 = vmatprep.mubr.msk.bf16.mxu1 %vm7892_vm2, %v7888_v28 }
 0x325   : > { %6815 = vmatprep.subr.bf16.mxu1 %v7888_v28 }
 0x32b   : > { %6806 = vmatmul.mubr.msk.bf16.vlgmr.msra.gmra.mrb[20].mxu1 %vm1943_vm3, %v6437_v62 }
 0x32c   : > { %6816 = vmatpush3.bf16.xpose.msra.mxu1 %v2270_v63  ;;  %6817 = vmatprep.mubr.msk.bf16.mxu1 %vm7892_vm2, %v7888_v28 }
 0x32d   : > { %6827 = vmatprep.subr.bf16.mxu1 %v7888_v28 }
 0x333   : > { %6818 = vmatmul.mubr.msk.bf16.vlgmr.msra.gmra.mrb[24].mxu1 %vm1943_vm3, %v6439_v0 }
 0x334   : > { %6829 = vmatprep.mubr.msk.bf16.mxu1 %vm7892_vm2, %v7888_v28 }
 0x3de   : > { %v1984_v14 = vpop.f32.mrb[4].mxu1  ;;  %v2168_v16 = vpop.f32.mrb[4].mxu0 }
 0x3df   : > { %v1985_v15 = vadd.f32 %v1984_v14, %v820_v13  ;;  %v6777_v17 = vpop.f32.mrb[5].mxu1  ;;  %v6801_v18 = vpop.f32.mrb[5].mxu0  ;;  %v2169_v34 = vadd.f32 %v2168_v16, %v820_v13 }
 0x3e0   : > { %v1987_v19 = vpop.f32.mrb[6].mxu1  ;;  %v2171_v20 = vpop.f32.mrb[6].mxu0 }
 0x3e1   : > { %v6778_v21 = vpop.f32.mrb[7].mxu1  ;;  %v2313_v22 = vsel %vm2312_vm4, %v1985_v15, -inf  ;;  %v6802_v23 = vpop.f32.mrb[7].mxu0  ;;  %v2325_v40 = vsel %vm2312_vm4, %v2169_v34, -inf }
 0x3e2   : > { %2314 = vmax.xlane.f32.xlu0 %v2313_v22 }
 0x3e6   : > { %v2030_v24 = vpop.f32.mrb[8].mxu1  ;;  %v2260_v26 = vpop.f32.mrb[8].mxu0 }
 0x3e7   : > { %v2031_v25 = vadd.f32 %v2030_v24, %v820_v13  ;;  %v6783_v27 = vpop.f32.mrb[9].mxu1  ;;  %v6813_v29 = vpop.f32.mrb[9].mxu0  ;;  %v2261_v39 = vadd.f32 %v2260_v26, %v820_v13 }
 0x3e8   : > { %v2033_v30 = vpop.f32.mrb[10].mxu1  ;;  %v2263_v35 = vpop.f32.mrb[10].mxu0 }
 0x3e9   : > { %v6784_v37 = vpop.f32.mrb[11].mxu1  ;;  %v2316_v33 = vsel %vm2312_vm4, %v2031_v25, -inf  ;;  %v6814_v38 = vpop.f32.mrb[11].mxu0  ;;  %v2331_v36 = vsel %vm2312_vm4, %v2261_v39, -inf }
 0x3ea   : > { %2317 = vmax.xlane.f32.xlu1 %v2316_v33 }
 0x3ee   : > { %2326 = vmax.xlane.f32.xlu1 %v2325_v40  ;;  %v2076_v41 = vpop.f32.mrb[12].mxu1 }
 0x3ef   : > { %v2077_v42 = vadd.f32 %v2076_v41, %v820_v13  ;;  %v6789_v43 = vpop.f32.mrb[13].mxu1 }
 0x3f0   : > { %v2079_v44 = vpop.f32.mrb[14].mxu1 }
 0x3f1   : > { %v6790_v45 = vpop.f32.mrb[15].mxu1  ;;  %v2319_v46 = vsel %vm2312_vm4, %v2077_v42, -inf }
 0x3f2   : > { %2332 = vmax.xlane.f32.xlu1 %v2331_v36  ;;  %2320 = vmax.xlane.f32.xlu0 %v2319_v46 }
 0x3f6   : > { %v2122_v47 = vpop.f32.mrb[16].mxu1 }
 0x3f7   : > { %v2123_v48 = vadd.f32 %v2122_v47, %v820_v13  ;;  %v6795_v49 = vpop.f32.mrb[17].mxu1  ;;  %v1671_v47 = vshrl.u32 %v8675_v12, 16 }
 0x3f8   : > { %v2125_v50 = vpop.f32.mrb[18].mxu1 }
 0x3f9   : > { %v6796_v51 = vpop.f32.mrb[19].mxu1  ;;  %v2322_v52 = vsel %vm2312_vm4, %v2123_v48, -inf }
 0x3fa   : > { %2323 = vmax.xlane.f32.xlu0 %v2322_v52 }
 0x3fe   : > { %v2214_v53 = vpop.f32.mrb[20].mxu1 }
 0x3ff   : > { %v2215_v54 = vadd.f32 %v2214_v53, %v820_v13  ;;  %v6807_v55 = vpop.f32.mrb[21].mxu1 }
 0x400   : > { %v2217_v56 = vpop.f32.mrb[22].mxu1 }
 0x401   : > { %v6808_v57 = vpop.f32.mrb[23].mxu1  ;;  %v2328_v58 = vsel %vm2312_vm4, %v2215_v54, -inf }
 0x402   : > { %2329 = vmax.xlane.f32.xlu0 %v2328_v58 }
 0x403   : > { %1661 = vrot.lane.b32.xlu1 %v8675_v12, %s7890_s11 }
 0x406   : > { %v2306_v59 = vpop.f32.mrb[24].mxu1 }
 0x407   : > { %v2307_v61 = vadd.f32 %v2306_v59, %v820_v13  ;;  %1665 = vrot.lane.b32.xlu1 %v8675_v12, %s7889_s5  ;;  %v6819_v62 = vpop.f32.mrb[25].mxu1 }
 0x408   : > { %v2309_v63 = vpop.f32.mrb[26].mxu1 }
 0x409   : > { %v6820_v0 = vpop.f32.mrb[27].mxu1  ;;  %v2334_v1 = vsel %vm2312_vm4, %v2307_v61, -inf }
 0x40a   : > { %2335 = vmax.xlane.f32.xlu0 %v2334_v1 }
 0x420   : > { %1663 = vrot.lane.b32.xlu0 %v8675_v12, %s7891_s24 }
 0x46f   : > { %v2315_v2 = vpop.xlane.xlu0 %2314 }
 0x470   : > { %v2337_v4 = vsub.f32 %v1985_v15, %v2315_v2 }
 0x472   : > { %v2345_v5 = vmul.f32 1.442695, %v2337_v4 }
 0x474   : > { %7325 = vpow2.f32 %v2345_v5 }
 0x477   : > { %v2318_v7 = vpop.xlane.xlu1 %2317 }
 0x478   : > { %v2338_v8 = vsub.f32 %v2031_v25, %v2318_v7 }
 0x47a   : > { %v2347_v10 = vmul.f32 1.442695, %v2338_v8 }
 0x47b   : > { %v2327_v11 = vpop.xlane.xlu1 %2326 }
 0x47c   : > { %7327 = vpow2.f32 %v2347_v10  ;;  %v2341_v14 = vsub.f32 %v2169_v34, %v2327_v11 }
 0x47e   : > { %v8692_v13 = vpop.eup %7325  ;;  %v2353_v21 = vmul.f32 1.442695, %v2341_v14 }
 0x47f   : > { %v2321_v16 = vpop.xlane.xlu0 %2320  ;;  %v2361_v17 = vsel %vm2312_vm4, %v8692_v13, 0.0  ;;  %v2333_v18 = vpop.xlane.xlu1 %2332 }
 0x480   : > { %v2339_v19 = vsub.f32 %v2077_v42, %v2321_v16  ;;  %2362 = vadd.xlane.f32.xlu1 %v2361_v17  ;;  %v2343_v15 = vsub.f32 %v2261_v39, %v2333_v18 }
 0x482   : > { %v2349_v20 = vmul.f32 1.442695, %v2339_v19  ;;  %v2357_v23 = vmul.f32 1.442695, %v2343_v15 }
 0x483   : > { %v1662_v38 = vpop.permute.xlu1 %1661 }
 0x484   : > { %7329 = vpow2.f32 %v2349_v20  ;;  %v1669_v42 = vpack.i.b16 %v1662_v38, %v8675_v12  ;;  %v1672_v43 = vshrl.u32 %v1662_v38, 16 }
 0x485   : > { %7331 = vpow2.f32 %v2353_v21 }
 0x486   : > { %v8696_v22 = vpop.eup %7327  ;;  %7333 = vpow2.f32 %v2357_v23  ;;  %v1673_v50 = vpack.i.b16 %v1672_v43, %v1671_v47  ;;  %v1683_v51 = vcombine.high %v1669_v42, %v8554_v60  ;;  %v1690_v57 = vrot.slane %v1669_v42, %v8557_v3 }
 0x487   : > { %v2324_v24 = vpop.xlane.xlu0 %2323  ;;  %v2364_v25 = vsel %vm2312_vm4, %v8696_v22, 0.0 }
 0x488   : > { %2365 = vadd.xlane.f32.xlu0 %v2364_v25  ;;  %v2340_v26 = vsub.f32 %v2123_v48, %v2324_v24  ;;  %v1666_v48 = vpop.permute.xlu1 %1665  ;;  %v1749_v62 = vcombine.high %v1673_v50, %v8554_v60  ;;  %v1756_v5 = vrot.slane %v1673_v50, %v8557_v3 }
 0x489   : > { %v1680_v53 = vshrl.u32 %v1666_v48, 16 }
 0x48a   : > { %v2351_v27 = vmul.f32 1.442695, %v2340_v26  ;;  %v1763_v16 = vrot.slane %v1749_v62, %v8557_v3 }
 0x48c   : > { %7335 = vpow2.f32 %v2351_v27 }
 0x48e   : > { %v8700_v29 = vpop.eup %7329 }
 0x48f   : > { %v2330_v30 = vpop.xlane.xlu0 %2329  ;;  %v2367_v35 = vsel %vm2312_vm4, %v8700_v29, 0.0  ;;  %v8704_v37 = vpop.eup %7331 }
 0x490   : > { %v2342_v34 = vsub.f32 %v2215_v54, %v2330_v30  ;;  %2368 = vadd.xlane.f32.xlu0 %v2367_v35  ;;  %v2373_v39 = vsel %vm2312_vm4, %v8704_v37, 0.0  ;;  %v8708_v40 = vpop.eup %7333 }
 0x491   : > { %v2379_v46 = vsel %vm2312_vm4, %v8708_v40, 0.0 }
 0x492   : > { %v2355_v33 = vmul.f32 1.442695, %v2342_v34 }
 0x494   : > { %7337 = vpow2.f32 %v2355_v33  ;;  %2374 = vadd.xlane.f32.xlu0 %v2373_v39 }
 0x496   : > { %v8710_v41 = vpop.eup %7335 }
 0x497   : > { %v2336_v44 = vpop.xlane.xlu0 %2335  ;;  %v2370_v36 = vsel %vm2312_vm4, %v8710_v41, 0.0 }
 0x498   : > { %v2344_v45 = vsub.f32 %v2307_v61, %v2336_v44  ;;  %2371 = vadd.xlane.f32.xlu1 %v2370_v36  ;;  %2380 = vadd.xlane.f32.xlu0 %v2379_v46  ;;  %v1697_v61 = vrot.slane %v1683_v51, %v8557_v3 }
 0x49a   : > { %v2359_v49 = vmul.f32 1.442695, %v2344_v45 }
 0x49b   : > { %v1664_v52 = vpop.permute.xlu0 %1663 }
 0x49c   : > { %7339 = vpow2.f32 %v2359_v49  ;;  %v1677_v54 = vpack.i.b16 %v1666_v48, %v1664_v52  ;;  %v1679_v55 = vshrl.u32 %v1664_v52, 16 }
 0x49e   : > { %v8719_v56 = vpop.eup %7337  ;;  %v1681_v58 = vpack.i.b16 %v1680_v53, %v1679_v55  ;;  %v1698_v59 = vcombine.high %v1677_v54, %v8554_v60  ;;  %v1705_v12 = vrot.slane %v1677_v54, %v8557_v3 }
 0x49f   : > { %v2376_v63 = vsel %vm2312_vm4, %v8719_v56, 0.0 }
 0x4a0   : > { %v1712_v0 = vrot.slane %v1698_v59, %v8557_v3  ;;  %v1713_v1 = vcombine.low %v1690_v57, %v1705_v12  ;;  %v1714_v2 = vcombine.high %v1690_v57, %v1705_v12  ;;  %v1764_v4 = vcombine.high %v1681_v58, %v8554_v60  ;;  %2377 = vadd.xlane.f32.xlu1 %v2376_v63 }
 0x4a1   : > { %v1771_v7 = vrot.slane %v1681_v58, %v8557_v3 }
 0x4a2   : > { %v1721_v8 = vrot.slane %v1713_v1, %v8561_v6  ;;  %v1728_v10 = vrot.slane %v1714_v2, %v8561_v6  ;;  %v1729_v11 = vcombine.low %v1697_v61, %v1712_v0  ;;  %v1730_v14 = vcombine.high %v1697_v61, %v1712_v0 }
 0x4a3   : > { %v1778_v17 = vrot.slane %v1764_v4, %v8557_v3  ;;  %v1779_v18 = vcombine.low %v1756_v5, %v1771_v7  ;;  %v1780_v19 = vcombine.high %v1756_v5, %v1771_v7 }
 0x4a4   : > { %v1737_v20 = vrot.slane %v1729_v11, %v8561_v6  ;;  %v1744_v21 = vrot.slane %v1730_v14, %v8561_v6  ;;  %v1815_v15 = vcombine.low %v1721_v8, %v1728_v10  ;;  %v6452_v23 = vcombine.high %v1721_v8, %v1728_v10 }
 0x4a5   : > { %v1787_v24 = vrot.slane %v1779_v18, %v8561_v6  ;;  %v1794_v25 = vrot.slane %v1780_v19, %v8561_v6  ;;  %v1795_v26 = vcombine.low %v1763_v16, %v1778_v17  ;;  %v1796_v27 = vcombine.high %v1763_v16, %v1778_v17 }
 0x4a6   : > { %v8740_v30 = vpop.eup %7339  ;;  %v1822_v34 = vrot.slane %v1815_v15, %v8557_v3  ;;  %v1830_v35 = vrot.slane %v6452_v23, %v8557_v3  ;;  %v1831_v33 = vcombine.low %v1737_v20, %v1744_v21  ;;  %v6453_v38 = vcombine.high %v1737_v20, %v1744_v21 }
 0x4a7   : > { %v1803_v39 = vrot.slane %v1795_v26, %v8561_v6  ;;  %v1810_v42 = vrot.slane %v1796_v27, %v8561_v6  ;;  %v1865_v43 = vcombine.low %v1787_v24, %v1794_v25  ;;  %v6454_v44 = vcombine.high %v1787_v24, %v1794_v25 }
 0x4a8   : > { %v1838_v45 = vrot.slane %v1831_v33, %v8557_v3  ;;  %v1846_v36 = vrot.slane %v6453_v38, %v8557_v3  ;;  %v2382_v46 = vsel %vm2312_vm4, %v8740_v30, 0.0  ;;  %v1847_v47 = vcombine.low %v1822_v34, %v1830_v35 }
 0x4a9   : > { %v1872_v48 = vrot.slane %v1865_v43, %v8557_v3  ;;  %v1880_v49 = vrot.slane %v6454_v44, %v8557_v3  ;;  %v1881_v50 = vcombine.low %v1803_v39, %v1810_v42  ;;  %v6455_v51 = vcombine.high %v1803_v39, %v1810_v42  ;;  %2383 = vadd.xlane.f32.xlu1 %v2382_v46 }
 0x4aa   : > { %v1855_v52 = vcombine.low %v1838_v45, %v1846_v36  ;;  %v1854_v57 = vrot.slane %v1847_v47, %v8561_v6 }
 0x4ab   : > { %v1888_v53 = vrot.slane %v1881_v50, %v8557_v3  ;;  %v1896_v54 = vrot.slane %v6455_v51, %v8557_v3  ;;  %v1897_v55 = vcombine.low %v1872_v48, %v1880_v49 }
 0x4ac   : > { %v1862_v58 = vrot.slane %v1855_v52, %v8561_v6 }
 0x4ad   : > { %v1905_v59 = vcombine.low %v1888_v53, %v1896_v54  ;;  %v1904_v62 = vrot.slane %v1897_v55, %v8561_v6 }
 0x4ae   : > { %v1863_v12 = vcombine.low %v1854_v57, %v1862_v58  ;;  %v1864_v61 = vcombine.high %v1854_v57, %v1862_v58 }
 0x4af   : > { %v1912_v63 = vrot.slane %v1905_v59, %v8561_v6 }
 0x4b0   : > { %v1918_v2 = vshrl.u32 %v1863_v12, 16  ;;  %v1924_v10 = vshrl.u32 %v1864_v61, 16 }
 0x4b1   : > { %v1913_v0 = vcombine.low %v1904_v62, %v1912_v63  ;;  %v1914_v1 = vcombine.high %v1904_v62, %v1912_v63 }
 0x4b3   : > { %v1917_v4 = vpack.i.b16 %v1913_v0, %v1863_v12  ;;  %v1919_v5 = vshrl.u32 %v1913_v0, 16  ;;  %v8758_v7 = vpack.i.b16 %v1914_v1, %v1864_v61  ;;  %v1925_v8 = vshrl.u32 %v1914_v1, 16 }
 0x4b5   : > { %v6456_v11 = vcombine.low %v1917_v4, %v1917_v4  ;;  %v6457_v14 = vcombine.high %v1917_v4, %v1917_v4  ;;  %v1920_v16 = vpack.i.b16 %v1919_v5, %v1918_v2  ;;  %v8760_v17 = vpack.i.b16 %v1925_v8, %v1924_v10  ;;  %v7237_v2 = vld [vmem:[%s8448_s26] sm:$0xff]   ;;  %v7238_v4 = vld [vmem:[%s8448_s26 + $0x8] sm:$0xff]   ;;  %v7239_v5 = vld [vmem:[%s8448_s26 + $0x10] sm:$0xff]  }
 0x4b6   : > { %v6460_v45 = vcombine.low %v8758_v7, %v8758_v7  ;;  %v6461_v51 = vcombine.high %v8758_v7, %v8758_v7  ;;  %v7240_v7 = vld [vmem:[%s8448_s26 + $0x18] sm:$0xff]   ;;  %v7242_v8 = vld [vmem:[%s8448_s26 + $0x28] sm:$0xff]  }
 0x4b7   : > { %v2414_v18 = vsel %vm2412_vm5, %v6456_v11, 0  ;;  %v2460_v19 = vsel %vm2412_vm5, %v6457_v14, 0  ;;  %v6458_v24 = vcombine.low %v1920_v16, %v1920_v16  ;;  %v6459_v33 = vcombine.high %v1920_v16, %v1920_v16 }
 0x4b8   : > { %6822 = vmatpush3.bf16.msra.mxu0 %v2414_v18  ;;  %6828 = vmatpush3.bf16.msra.mxu1 %v2460_v19  ;;  %v2598_v48 = vsel %vm2412_vm5, %v6460_v45, 0  ;;  %v6462_v52 = vcombine.low %v8760_v17, %v8760_v17  ;;  %v6463_v61 = vcombine.high %v8760_v17, %v8760_v17 }
 0x4b9   : > { %6833 = vmatprep.subr.bf16.mxu0 %v7888_v28  ;;  %6839 = vmatprep.subr.bf16.mxu1 %v7888_v28  ;;  %v2506_v26 = vsel %vm2412_vm5, %v6458_v24, 0  ;;  %v2552_v39 = vsel %vm2412_vm5, %v6459_v33, 0 }
 0x4ba   : > { %v2690_v58 = vsel %vm2412_vm5, %v6462_v52, 0 }
 0x50d   : > { %v2363_v20 = vpop.xlane.xlu1 %2362 }
 0x50e   : > { %7341 = vrcp.f32 %v2363_v20 }
 0x515   : > { %v2366_v21 = vpop.xlane.xlu0 %2365 }
 0x516   : > { %7343 = vrcp.f32 %v2366_v21 }
 0x518   : > { %v7342_v15 = vpop.eup %7341 }
 0x519   : > { %v2393_v23 = vmul.f32 %v7342_v15, %v8692_v13 }
 0x51b   : > { %v2401_v25 = vpack.c.bf16 %v2393_v23, %v2393_v23 }
 0x51d   : > { %6824 = vmatmul.mubr.msk.bf16.vlgmr.msra.gmra.mrb[12].mxu0 %vm2312_vm4, %v2401_v25  ;;  %v2369_v27 = vpop.xlane.xlu0 %2368 }
 0x51e   : > { %6834 = vmatpush3.bf16.msra.mxu0 %v2506_v26  ;;  %6835 = vmatprep.mubr.msk.bf16.mxu0 %vm7892_vm2, %v7888_v28  ;;  %7345 = vrcp.f32 %v2369_v27 }
 0x51f   : > { %6845 = vmatprep.subr.bf16.mxu0 %v7888_v28 }
 0x520   : > { %v7344_v34 = vpop.eup %7343 }
 0x521   : > { %v2394_v35 = vmul.f32 %v7344_v34, %v8696_v22  ;;  %v2375_v38 = vpop.xlane.xlu0 %2374 }
 0x522   : > { %7347 = vrcp.f32 %v2375_v38 }
 0x523   : > { %v2402_v13 = vpack.c.bf16 %v2394_v35, %v2394_v35 }
 0x525   : > { %6830 = vmatmul.mubr.msk.bf16.vlgmr.msra.gmra.mrb[28].mxu1 %vm2312_vm4, %v2402_v13  ;;  %v2372_v42 = vpop.xlane.xlu1 %2371  ;;  %v2381_v43 = vpop.xlane.xlu0 %2380 }
 0x526   : > { %6840 = vmatpush3.bf16.msra.mxu1 %v2552_v39  ;;  %6841 = vmatprep.mubr.msk.bf16.mxu1 %vm7892_vm2, %v7888_v28  ;;  %7349 = vrcp.f32 %v2372_v42 }
 0x527   : > { %6851 = vmatprep.subr.bf16.mxu1 %v7888_v28  ;;  %7351 = vrcp.f32 %v2381_v43 }
 0x528   : > { %v7346_v44 = vpop.eup %7345 }
 0x529   : > { %v2395_v22 = vmul.f32 %v7346_v44, %v8700_v29 }
 0x52b   : > { %v2403_v36 = vpack.c.bf16 %v2395_v22, %v2395_v22 }
 0x52c   : > { %v7348_v46 = vpop.eup %7347 }
 0x52d   : > { %v2378_v47 = vpop.xlane.xlu1 %2377  ;;  %6836 = vmatmul.mubr.msk.bf16.vlgmr.msra.gmra.mrb[16].mxu0 %vm2312_vm4, %v2403_v36  ;;  %v2397_v49 = vmul.f32 %v7348_v46, %v8704_v37  ;;  %v2644_v37 = vsel %vm2412_vm5, %v6461_v51, 0 }
 0x52e   : > { %7353 = vrcp.f32 %v2378_v47  ;;  %6846 = vmatpush3.bf16.msra.mxu0 %v2598_v48  ;;  %6847 = vmatprep.mubr.msk.bf16.mxu0 %vm7892_vm2, %v7888_v28 }
 0x52f   : > { %6857 = vmatprep.subr.bf16.mxu0 %v7888_v28  ;;  %v2405_v54 = vpack.c.bf16 %v2397_v49, %v2397_v49 }
 0x530   : > { %v7350_v29 = vpop.eup %7349 }
 0x531   : > { %v2396_v50 = vmul.f32 %v7350_v29, %v8710_v41  ;;  %v7352_v55 = vpop.eup %7351 }
 0x532   : > { %v2399_v59 = vmul.f32 %v7352_v55, %v8708_v40  ;;  %v2736_v40 = vsel %vm2412_vm5, %v6463_v61, 0 }
 0x533   : > { %v2404_v53 = vpack.c.bf16 %v2396_v50, %v2396_v50 }
 0x534   : > { %v2407_v63 = vpack.c.bf16 %v2399_v59, %v2399_v59 }
 0x535   : > { %6842 = vmatmul.mubr.msk.bf16.vlgmr.msra.gmra.mrb[32].mxu1 %vm2312_vm4, %v2404_v53  ;;  %6848 = vmatmul.mubr.msk.bf16.vlgmr.msra.gmra.mrb[20].mxu0 %vm2312_vm4, %v2405_v54 }
 0x536   : > { %v2384_v57 = vpop.xlane.xlu1 %2383  ;;  %6852 = vmatpush3.bf16.msra.mxu1 %v2644_v37  ;;  %6858 = vmatpush3.bf16.msra.mxu0 %v2690_v58 }
 0x537   : > { %7355 = vrcp.f32 %v2384_v57  ;;  %6853 = vmatprep.mubr.msk.bf16.mxu1 %vm7892_vm2, %v7888_v28  ;;  %6859 = vmatprep.mubr.msk.bf16.mxu0 %vm7892_vm2, %v7888_v28 }
 0x538   : > { %v7354_v41 = vpop.eup %7353  ;;  %6863 = vmatprep.subr.bf16.mxu1 %v7888_v28  ;;  %6869 = vmatprep.subr.bf16.mxu0 %v7888_v28 }
 0x539   : > { %v2398_v12 = vmul.f32 %v7354_v41, %v8719_v56 }
 0x53b   : > { %v2406_v62 = vpack.c.bf16 %v2398_v12, %v2398_v12 }
 0x53d   : > { %6854 = vmatmul.mubr.msk.bf16.vlgmr.msra.gmra.mrb[36].mxu1 %vm2312_vm4, %v2406_v62  ;;  %6860 = vmatmul.mubr.msk.bf16.vlgmr.msra.gmra.mrb[24].mxu0 %vm2312_vm4, %v2407_v63 }
 0x53e   : > { %6864 = vmatpush3.bf16.msra.mxu1 %v2736_v40  ;;  %6865 = vmatprep.mubr.msk.bf16.mxu1 %vm7892_vm2, %v7888_v28 }
 0x53f   : > { %6885 = vmatprep.mubr.msk.bf16.mxu0 %vm7892_vm2, %v7888_v28  ;;  %6889 = vmatprep.subr.bf16.mxu1 %v7888_v28 }
 0x540   : > { %6870 = vmatpush3.bf16.msra.mxu0 %v7237_v2 }
 0x541   : > { %v7356_v56 = vpop.eup %7355  ;;  %6871 = vmatprep.subr.bf16.mxu0 %v7888_v28 }
 0x542   : > { %v2400_v0 = vmul.f32 %v7356_v56, %v8740_v30  ;;  %v7241_v30 = vld [vmem:[%s8448_s26 + $0x20] sm:$0xff]  }
 0x544   : > { %v2408_v1 = vpack.c.bf16 %v2400_v0, %v2400_v0  ;;  %6872 = vmatpush3.bf16.msra.mxu0 %v7238_v4 }
 0x545   : > { %6873 = vmatprep.subr.bf16.mxu0 %v7888_v28 }
 0x546   : > { %6866 = vmatmul.mubr.msk.bf16.vlgmr.msra.gmra.mrb[40].mxu1 %vm2312_vm4, %v2408_v1 }
 0x547   : > { %6905 = vmatprep.mubr.msk.bf16.mxu1 %vm7892_vm2, %v7888_v28 }
 0x548   : > { %6874 = vmatpush3.bf16.msra.mxu0 %v7239_v5 }
 0x549   : > { %6875 = vmatprep.subr.bf16.mxu0 %v7888_v28 }
 0x54c   : > { %6876 = vmatpush3.bf16.msra.mxu0 %v7240_v7 }
 0x54d   : > { %6877 = vmatprep.subr.bf16.mxu0 %v7888_v28 }
 0x550   : > { %6878 = vmatpush3.bf16.msra.mxu0 %v7241_v30 }
 0x551   : > { %6879 = vmatprep.subr.bf16.mxu0 %v7888_v28 }
 0x554   : > { %6880 = vmatpush3.bf16.msra.mxu0 %v7242_v8 }
 0x555   : > { %6881 = vmatprep.subr.bf16.mxu0 %v7888_v28 }
 0x5f0   : > { %v2450_v10 = vpop.f32.mrb[12].mxu0 }
 0x5f1   : > { %v6825_v11 = vpop.f32.mrb[13].mxu0 }
 0x5f2   : > { %v2453_v14 = vpop.f32.mrb[14].mxu0 }
 0x5f3   : > { %v6826_v16 = vpop.f32.mrb[15].mxu0 }
 0x5f8   : > { %v2496_v17 = vpop.f32.mrb[28].mxu1 }
 0x5f9   : > { %v6831_v18 = vpop.f32.mrb[29].mxu1 }
 0x5fa   : > { %v2499_v19 = vpop.f32.mrb[30].mxu1 }
 0x5fb   : > { %v6832_v20 = vpop.f32.mrb[31].mxu1 }
 0x600   : > { %v2542_v21 = vpop.f32.mrb[16].mxu0 }
 0x601   : > { %v6837_v15 = vpop.f32.mrb[17].mxu0 }
 0x602   : > { %v2545_v23 = vpop.f32.mrb[18].mxu0 }
 0x603   : > { %v6838_v24 = vpop.f32.mrb[19].mxu0 }
 0x608   : > { %v2588_v25 = vpop.f32.mrb[32].mxu1  ;;  %v2634_v26 = vpop.f32.mrb[20].mxu0 }
 0x609   : > { %v2778_v27 = vcombine.low %v2450_v10, %v2634_v26  ;;  %v2779_v34 = vcombine.high %v2450_v10, %v2634_v26  ;;  %v6843_v35 = vpop.f32.mrb[33].mxu1  ;;  %v6849_v33 = vpop.f32.mrb[21].mxu0 }
 0x60a   : > { %v2591_v38 = vpop.f32.mrb[34].mxu1  ;;  %v2637_v13 = vpop.f32.mrb[22].mxu0 }
 0x60b   : > { %v6844_v39 = vpop.f32.mrb[35].mxu1  ;;  %v6850_v42 = vpop.f32.mrb[23].mxu0  ;;  %v2786_v50 = vrot.slane %v2778_v27, %v8557_v3  ;;  %v2793_v51 = vrot.slane %v2779_v34, %v8557_v3 }
 0x610   : > { %v2680_v43 = vpop.f32.mrb[36].mxu1  ;;  %v2726_v44 = vpop.f32.mrb[24].mxu0 }
 0x611   : > { %v2846_v22 = vcombine.low %v2496_v17, %v2680_v43  ;;  %v2847_v45 = vcombine.high %v2496_v17, %v2680_v43  ;;  %v2794_v36 = vcombine.low %v2542_v21, %v2726_v44  ;;  %v2795_v46 = vcombine.high %v2542_v21, %v2726_v44  ;;  %v6855_v47 = vpop.f32.mrb[37].mxu1  ;;  %v6861_v48 = vpop.f32.mrb[25].mxu0 }
 0x612   : > { %v2683_v49 = vpop.f32.mrb[38].mxu1  ;;  %v2729_v29 = vpop.f32.mrb[26].mxu0 }
 0x613   : > { %v2802_v52 = vrot.slane %v2794_v36, %v8557_v3  ;;  %v2809_v53 = vrot.slane %v2795_v46, %v8557_v3  ;;  %v6856_v54 = vpop.f32.mrb[39].mxu1  ;;  %v6862_v55 = vpop.f32.mrb[27].mxu0  ;;  %v2854_v16 = vrot.slane %v2846_v22, %v8557_v3  ;;  %v2861_v17 = vrot.slane %v2847_v45, %v8557_v3  ;;  %v7243_v29 = vld [vmem:[%s8448_s26 + $0x30] sm:$0xff]  }
 0x614   : > { %6882 = vmatpush3.bf16.msra.mxu0 %v7243_v29  ;;  %v7256_v29 = vld [vmem:[%s8458_s27 + $0x34] ss:$8 sps:$4 sm:$0xff]  }
 0x615   : > { %v2810_v57 = vcombine.low %v2786_v50, %v2802_v52  ;;  %v2811_v37 = vcombine.high %v2786_v50, %v2802_v52  ;;  %v2826_v58 = vcombine.low %v2793_v51, %v2809_v53  ;;  %v2827_v41 = vcombine.high %v2793_v51, %v2809_v53  ;;  %6883 = vmatprep.subr.bf16.mxu0 %v7888_v28 }
 0x617   : > { %v2818_v59 = vrot.slane %v2810_v57, %v8561_v6  ;;  %v2825_v12 = vrot.slane %v2811_v37, %v8561_v6  ;;  %v2834_v61 = vrot.slane %v2826_v58, %v8561_v6  ;;  %v2841_v62 = vrot.slane %v2827_v41, %v8561_v6 }
 0x619   : > { %v2772_v63 = vpop.f32.mrb[40].mxu1  ;;  %v2914_v40 = vcombine.low %v2818_v59, %v2825_v12  ;;  %v6480_v56 = vcombine.high %v2818_v59, %v2825_v12  ;;  %v2930_v0 = vcombine.low %v2834_v61, %v2841_v62  ;;  %v6481_v1 = vcombine.high %v2834_v61, %v2841_v62  ;;  %v7244_v61 = vld [vmem:[%s8448_s26 + $0x38] sm:$0xff]   ;;  %s9587_s26 = sld [smem:[#allocation48_spill]] }
 0x61a   : > { %v6867_v2 = vpop.f32.mrb[41].mxu1  ;;  %v2862_v4 = vcombine.low %v2588_v25, %v2772_v63  ;;  %v2863_v5 = vcombine.high %v2588_v25, %v2772_v63  ;;  %6884 = vmatpush3.bf16.msra.mxu0 %v7244_v61 }
 0x61b   : > { %v2775_v7 = vpop.f32.mrb[42].mxu1  ;;  %v2921_v30 = vrot.slane %v2914_v40, %v8557_v3  ;;  %v2929_v8 = vrot.slane %v6480_v56, %v8557_v3  ;;  %v2937_v10 = vrot.slane %v2930_v0, %v8557_v3  ;;  %v2945_v11 = vrot.slane %v6481_v1, %v8557_v3 }
 0x61c   : > { %v6868_v14 = vpop.f32.mrb[43].mxu1  ;;  %v2870_v18 = vrot.slane %v2862_v4, %v8557_v3  ;;  %v2877_v19 = vrot.slane %v2863_v5, %v8557_v3 }
 0x61d   : > { %v2947_v20 = vcombine.high %v2921_v30, %v2929_v8  ;;  %v2963_v21 = vcombine.high %v2937_v10, %v2945_v11  ;;  %v2946_v15 = vcombine.low %v2921_v30, %v2929_v8  ;;  %v2962_v23 = vcombine.low %v2937_v10, %v2945_v11 }
 0x61e   : > { %v2878_v24 = vcombine.low %v2854_v16, %v2870_v18  ;;  %v2879_v25 = vcombine.high %v2854_v16, %v2870_v18  ;;  %v2894_v26 = vcombine.low %v2861_v17, %v2877_v19  ;;  %v2895_v27 = vcombine.high %v2861_v17, %v2877_v19 }
 0x61f   : > { %v2961_v34 = vrot.slane %v2947_v20, %v8561_v6  ;;  %v2977_v35 = vrot.slane %v2963_v21, %v8561_v6  ;;  %v2954_v33 = vrot.slane %v2946_v15, %v8561_v6  ;;  %v2970_v38 = vrot.slane %v2962_v23, %v8561_v6  ;;  %s9357_s22 = scalar_lea.hbm %s9587_s26, %s6629_s7 }
 0x620   : > { %v2886_v13 = vrot.slane %v2878_v24, %v8561_v6  ;;  %v2893_v39 = vrot.slane %v2879_v25, %v8561_v6  ;;  %v2902_v42 = vrot.slane %v2894_v26, %v8561_v6  ;;  %v2909_v43 = vrot.slane %v2895_v27, %v8561_v6  ;;  %v8877_v25 = vld [vmem:[%s8477_s20] sm:$0xff] }
 0x621   : > { %v2980_v44 = vcombine.low %v2961_v34, %v2977_v35  ;;  %v2978_v22 = vcombine.low %v2954_v33, %v2970_v38  ;;  %v2979_v45 = vcombine.high %v2954_v33, %v2970_v38  ;;  %v2981_v36 = vcombine.high %v2961_v34, %v2977_v35 }
 0x622   : > { %v2982_v46 = vcombine.low %v2886_v13, %v2893_v39  ;;  %v6482_v47 = vcombine.high %v2886_v13, %v2893_v39  ;;  %v2998_v48 = vcombine.low %v2902_v42, %v2909_v43  ;;  %v6483_v49 = vcombine.high %v2902_v42, %v2909_v43  ;;  %v7402_v39 = vld [vmem:[#allocation20] sm:$0xff]  ;;  %v7403_v43 = vld [vmem:[#allocation20 + $0x8] sm:$0xff] }
 0x623   : > { %v3101_v24 = vsub.s32 1, %v8516_v31 }
 0x624   : > { %v2989_v50 = vrot.slane %v2982_v46, %v8557_v3  ;;  %v2997_v51 = vrot.slane %v6482_v47, %v8557_v3  ;;  %v3005_v52 = vrot.slane %v2998_v48, %v8557_v3  ;;  %v3013_v53 = vrot.slane %v6483_v49, %v8557_v3  ;;  %v7248_v46 = vld [vmem:[%s8458_s27 + $0x10] ss:$8 sps:$4 sm:$0xff]   ;;  %v7253_v47 = vld [vmem:[%s8458_s27 + $0x24] ss:$8 sps:$4 sm:$0xff]   ;;  %v7251_v49 = vld [vmem:[%s8458_s27 + $0x20] ss:$8 sps:$4 sm:$0xff]  }
 0x625   : > { %v3102_v26 = vrot.slane %v8877_v25, %v3101_v24  ;;  %v7269_v48 = vld [vmem:[%s8455_s18] sm:$0xff]  }
 0x626   : > { %v3015_v54 = vcombine.high %v2989_v50, %v2997_v51  ;;  %v3031_v55 = vcombine.high %v3005_v52, %v3013_v53  ;;  %v3014_v57 = vcombine.low %v2989_v50, %v2997_v51  ;;  %v3030_v37 = vcombine.low %v3005_v52, %v3013_v53  ;;  %6890 = vmatpush3.bf16.msra.mxu1 %v7269_v48  ;;  %v7254_v50 = vld [vmem:[%s8458_s27 + $0x30] ss:$8 sps:$4 sm:$0xff]   ;;  %v7259_v51 = vld [vmem:[%s8458_s27 + $0x44] ss:$8 sps:$4 sm:$0xff]   ;;  %v7257_v52 = vld [vmem:[%s8458_s27 + $0x40] ss:$8 sps:$4 sm:$0xff]  }
 0x627   : > { %6891 = vmatprep.subr.bf16.mxu1 %v7888_v28  ;;  %v7262_v53 = vld [vmem:[%s8458_s27 + $0x54] ss:$8 sps:$4 sm:$0xff]  }
 0x628   : > { %v3029_v58 = vrot.slane %v3015_v54, %v8561_v6  ;;  %v3045_v41 = vrot.slane %v3031_v55, %v8561_v6  ;;  %v3022_v59 = vrot.slane %v3014_v57, %v8561_v6  ;;  %v3038_v12 = vrot.slane %v3030_v37, %v8561_v6  ;;  %v7260_v54 = vld [vmem:[%s8458_s27 + $0x50] ss:$8 sps:$4 sm:$0xff]   ;;  %v7265_v55 = vld [vmem:[%s8458_s27 + $0x64] ss:$8 sps:$4 sm:$0xff]   ;;  %v7263_v57 = vld [vmem:[%s8458_s27 + $0x60] ss:$8 sps:$4 sm:$0xff]  }
 0x629   : > { %v7268_v37 = vld [vmem:[%s8458_s27 + $0x74] ss:$8 sps:$4 sm:$0xff]  }
 0x62a   : > { %v3048_v62 = vcombine.low %v3029_v58, %v3045_v41  ;;  %v3047_v63 = vcombine.high %v3022_v59, %v3038_v12  ;;  %v3046_v40 = vcombine.low %v3022_v59, %v3038_v12  ;;  %v3049_v56 = vcombine.high %v3029_v58, %v3045_v41  ;;  %v7266_v58 = vld [vmem:[%s8458_s27 + $0x70] ss:$8 sps:$4 sm:$0xff]  }
 0x62b   : > { %v824_v41 = vld [vmem:[%s636_s9] sm:$0xff]  ;;  %v825_v59 = vld [vmem:[%s636_s9 + $0x8] sm:$0xff]  ;;  %s9586_s9 = sld [smem:[#allocation40_spill]] }
 0x62c   : > { %v7180_v0 = vpack.i.bf16 %v3048_v62, %v2980_v44  ;;  %v7175_v1 = vpack.i.bf16 %v3047_v63, %v2979_v45  ;;  %v7185_v2 = vpack.i.bf16 %v3049_v56, %v2981_v36  ;;  %v7247_v45 = vld [vmem:[%s8458_s27 + $0x4] ss:$8 sps:$4 sm:$0xff]   ;;  %v7250_v36 = vld [vmem:[%s8458_s27 + $0x14] ss:$8 sps:$4 sm:$0xff]   ;;  %v826_v12 = vpack.c.bf16 %v825_v59, %v824_v41 }
 0x62d   : > { %3443 = vmatprep.subr.bf16.mxu0 %v7247_v45 }
 0x62e   : > { %7181 = vrot.lane.b32.xlu1 %v7180_v0, %s7891_s24  ;;  %7176 = vrot.lane.b32.xlu0 %v7175_v1, %s7889_s5 }
 0x631   : > { %p9589_p6 = scmp.ne.s32.totalorder %s9586_s9, 0 }
 0x632   : > { %7186 = vrot.lane.b32.xlu1 %v7185_v2, %s7890_s11 }
 0x6a0   : > { %v7182_v4 = vpop.permute.xlu1 %7181  ;;  %v7177_v5 = vpop.permute.xlu0 %7176 }
 0x6a1   : > { %v7179_v7 = vunpack.i.h.bf16 %v7177_v5  ;;  %v7178_v30 = vunpack.i.l.bf16 %v7177_v5  ;;  %v7184_v8 = vunpack.i.h.bf16 %v7182_v4  ;;  %v7183_v10 = vunpack.i.l.bf16 %v7182_v4  ;;  %v7270_v4 = vld [vmem:[%s8455_s18 + $0x8] sm:$0xff]   ;;  %v7271_v5 = vld [vmem:[%s8455_s18 + $0x10] sm:$0xff]  }
 0x6a2   : > { %6892 = vmatpush3.bf16.msra.mxu1 %v7270_v4 }
 0x6a3   : > { %v3074_v11 = vsel %vm1943_vm3, %v2978_v22, %v7178_v30  ;;  %v3075_v14 = vsel %vm1943_vm3, %v3046_v40, %v7179_v7  ;;  %v7245_v22 = vld [vmem:[%s8458_s27] ss:$8 sps:$4 sm:$0xff]   ;;  %6893 = vmatprep.subr.bf16.mxu1 %v7888_v28  ;;  %v7272_v7 = vld [vmem:[%s8455_s18 + $0x18] sm:$0xff]   ;;  %s5990_s27 = scalar_lea.sflag [#allocation22], %s8429_s30 }
 0x6a4   : > { %v7187_v16 = vpop.permute.xlu1 %7186  ;;  %v3077_v19 = vsel %vm3076_vm6, %v3074_v11, %v7183_v10  ;;  %v3078_v20 = vsel %vm3076_vm6, %v3075_v14, %v7184_v8  ;;  %v7273_v30 = vld [vmem:[%s8455_s18 + $0x20] sm:$0xff]   ;;  %v7274_v8 = vld [vmem:[%s8455_s18 + $0x28] sm:$0xff]   ;;  %v7275_v10 = vld [vmem:[%s8455_s18 + $0x30] sm:$0xff]   ;;  %v8922_v14 = vsub.s32 3, %v8516_v31 }
 0x6a5   : > { %v7189_v17 = vunpack.i.h.bf16 %v7187_v16  ;;  %v7188_v18 = vunpack.i.l.bf16 %v7187_v16  ;;  %v7276_v11 = vld [vmem:[%s8455_s18 + $0x38] sm:$0xff]   ;;  %s9588_s18 = smov %s9587_s26 }
 0x6a6   : > { %6894 = vmatpush3.bf16.msra.mxu1 %v7271_v5  ;;  %v3358_v16 = vrot.slane %v8877_v25, %v8922_v14 }
 0x6a7   : > { %v3080_v21 = vsel %vm3079_vm7, %v3077_v19, %v7188_v18  ;;  %v3081_v15 = vsel %vm3079_vm7, %v3078_v20, %v7189_v17  ;;  %6895 = vmatprep.subr.bf16.mxu1 %v7888_v28  ;;  %v7404_v17 = vld [vmem:[%s8477_s20 + $0x8] sm:$0xff] }
 0x6a8   : > { %v3082_v23 = vpack.c.bf16 %v3081_v15, %v3080_v21  ;;  %v3362_v18 = vrot.slane %v7404_v17, %v8922_v14 }
 0x6aa   : > { %6886 = vmatmul.mubr.bf16.vlgmr.msra.gmra.mrb[28].mxu0 %v3082_v23  ;;  %6896 = vmatpush3.bf16.msra.mxu1 %v7272_v7 }
 0x6ab   : > { %3475 = vmatprep.mubr.bf16.mxu0 %v7887_v9  ;;  %3444 = vmatpush1.bf16.msra.mxu0 %v7245_v22  ;;  %v3219_v22 = vsub.s32 7, %v8516_v31 }
 0x6ac   : > { %3445 = vmatprep.subr.bf16.mxu0 %v7250_v36  ;;  %6897 = vmatprep.subr.bf16.mxu1 %v7888_v28 }
 0x6ae   : > { %6898 = vmatpush3.bf16.msra.mxu1 %v7273_v30 }
 0x6af   : > { %3446 = vmatpush1.bf16.msra.mxu0 %v7248_v46  ;;  %6899 = vmatprep.subr.bf16.mxu1 %v7888_v28  ;;  %v3220_v46 = vrot.slane %v8877_v25, %v3219_v22 }
 0x6b0   : > { %3447 = vmatprep.subr.bf16.mxu0 %v7253_v47  ;;  %v819_v47 = vld [vmem:[%s8477_s20 + $0x18] sm:$0xff] }
 0x6b2   : > { %6900 = vmatpush3.bf16.msra.mxu1 %v7274_v8 }
 0x6b3   : > { %3448 = vmatpush1.bf16.msra.mxu0 %v7251_v49  ;;  %6901 = vmatprep.subr.bf16.mxu1 %v7888_v28 }
 0x6b4   : > { %3449 = vmatprep.subr.bf16.mxu0 %v7256_v29 }
 0x6b6   : > { %6902 = vmatpush3.bf16.msra.mxu1 %v7275_v10 }
 0x6b7   : > { %3450 = vmatpush1.bf16.msra.mxu0 %v7254_v50  ;;  %6903 = vmatprep.subr.bf16.mxu1 %v7888_v28  ;;  %v3226_v50 = vrot.slane %v819_v47, %v8519_v32 }
 0x6b8   : > { %3451 = vmatprep.subr.bf16.mxu0 %v7259_v51 }
 0x6ba   : > { %6904 = vmatpush3.bf16.msra.mxu1 %v7276_v11 }
 0x6bb   : > { %3452 = vmatpush1.bf16.msra.mxu0 %v7257_v52  ;;  %6909 = vmatprep.subr.bf16.mxu1 %v7888_v28 }
 0x6bc   : > { %3453 = vmatprep.subr.bf16.mxu0 %v7262_v53 }
 0x6bf   : > { %3454 = vmatpush1.bf16.msra.mxu0 %v7260_v54 }
 0x6c0   : > { %3455 = vmatprep.subr.bf16.mxu0 %v7265_v55 }
 0x6c3   : > { %3456 = vmatpush1.bf16.msra.mxu0 %v7263_v57 }
 0x6c4   : > { %3457 = vmatprep.subr.bf16.mxu0 %v7268_v37 }
 0x6c7   : > { %3458 = vmatpush1.bf16.msra.mxu0 %v7266_v58 }
 0x6c8   : > { %6933 = vmatprep.subr.bf16.mxu0 %v7888_v28 }
 0x6ca   : > { %3476 = vmatmul.mubr.bf16.vlgmr.msra.gmra.mrb[32].mxu0 %v826_v12 }
 0x6cb   : > { %6935 = vmatprep.mubr.msk.bf16.mxu0 %vm7892_vm2, %v7888_v28 }
 0x77d   : > { %v3185_v27 = vpop.f32.mrb[28].mxu0 }
 0x77e   : > { %v3186_v34 = vadd.f32 %v3185_v27, %v3102_v26  ;;  %v6887_v35 = vpop.f32.mrb[29].mxu0 }
 0x77f   : > { %v3188_v33 = vpop.f32.mrb[30].mxu0 }
 0x780   : > { %v3189_v38 = vadd.f32 %v3188_v33, %v3102_v26  ;;  %v6888_v13 = vpop.f32.mrb[31].mxu0  ;;  %v3192_v42 = vadd.f32 %v7402_v39, %v3186_v34 }
 0x782   : > { %3194 = vadd.xlane.f32.xlu0 %v3192_v42  ;;  %v3193_v44 = vadd.f32 %v7403_v43, %v3189_v38 }
 0x784   : > { %3196 = vadd.xlane.f32.xlu1 %v3193_v44 }
 0x79d   : > { %v3477_v19 = vpop.f32.mrb[32].mxu0 }
 0x79e   : > { %v3478_v20 = vadd.f32 %v3477_v19, %v3358_v16  ;;  %v3479_v21 = vpop.f32.mrb[33].mxu0 }
 0x79f   : > { %v3480_v15 = vadd.f32 %v3479_v21, %v3362_v18  ;;  %v3481_v23 = vpop.f32.mrb[34].mxu0 }
 0x7a0   : > { %v3482_v26 = vadd.f32 %v3481_v23, %v3358_v16  ;;  %v3483_v27 = vpop.f32.mrb[35].mxu0 }
 0x7a1   : > { %v3484_v34 = vadd.f32 %v3483_v27, %v3362_v18 }
 0x7a2   : > { %v3772_v35 = vpack.c.bf16 %v3482_v26, %v3478_v20 }
 0x7a3   : > { %v8928_v33 = vpack.c.bf16 %v3484_v34, %v3480_v15 }
 0x7a4   : > { %3774 = vrot.lane.b32.xlu1 %v3772_v35, %s7890_s11  ;;  %v3784_v55 = vshrl.u32 %v3772_v35, 16 }
 0x7a8   : > { %3778 = vrot.lane.b32.xlu1 %v3772_v35, %s7889_s5 }
 0x80f   : > { %v3195_v61 = vpop.xlane.xlu0 %3194 }
 0x810   : > { %v3199_v62 = vmul.f32 0.0078125, %v3195_v61 }
 0x811   : > { %v3197_v63 = vpop.xlane.xlu1 %3196 }
 0x812   : > { %v3201_v40 = vsub.f32 %v3192_v42, %v3199_v62  ;;  %v3200_v56 = vmul.f32 0.0078125, %v3197_v63 }
 0x814   : > { %v3202_v0 = vsub.f32 %v3193_v44, %v3200_v56  ;;  %v3203_v1 = vmul.f32 %v3201_v40, %v3201_v40 }
 0x816   : > { %3205 = vadd.xlane.f32.xlu0 %v3203_v1  ;;  %v3204_v2 = vmul.f32 %v3202_v0, %v3202_v0  ;;  %v3775_v57 = vpop.permute.xlu1 %3774 }
 0x817   : > { %v3782_v37 = vpack.i.b16 %v3775_v57, %v3772_v35  ;;  %v3785_v58 = vshrl.u32 %v3775_v57, 16 }
 0x819   : > { %v3786_v59 = vpack.i.b16 %v3785_v58, %v3784_v55  ;;  %v3796_v32 = vcombine.high %v3782_v37, %v8554_v60  ;;  %v3803_v62 = vrot.slane %v3782_v37, %v8557_v3 }
 0x81a   : > { %3207 = vadd.xlane.f32.xlu0 %v3204_v2  ;;  %v3779_v61 = vpop.permute.xlu1 %3778 }
 0x81b   : > { %v3793_v56 = vshrl.u32 %v3779_v61, 16  ;;  %v3869_v4 = vrot.slane %v3786_v59, %v8557_v3 }
 0x830   : > { %3776 = vrot.lane.b32.xlu0 %v3772_v35, %s7891_s24 }
 0x8a3   : > { %v3206_v38 = vpop.xlane.xlu0 %3205 }
 0x8a4   : > { %v3209_v13 = vmul.f32 0.0078125, %v3206_v38 }
 0x8a6   : > { %v3211_v39 = vadd.f32 1e-05, %v3209_v13 }
 0x8a7   : > { %v3208_v42 = vpop.xlane.xlu0 %3207 }
 0x8a8   : > { %7357 = vrsqrt.f32 %v3211_v39  ;;  %v3210_v43 = vmul.f32 0.0078125, %v3208_v42 }
 0x8aa   : > { %v3212_v44 = vadd.f32 1e-05, %v3210_v43 }
 0x8ab   : > { %v3777_v41 = vpop.permute.xlu0 %3776 }
 0x8ac   : > { %7359 = vrsqrt.f32 %v3212_v44  ;;  %v3792_v12 = vshrl.u32 %v3777_v41, 16  ;;  %v3790_v63 = vpack.i.b16 %v3779_v61, %v3777_v41 }
 0x8ae   : > { %v3811_v1 = vcombine.high %v3790_v63, %v8554_v60  ;;  %v3818_v2 = vrot.slane %v3790_v63, %v8557_v3  ;;  %v3794_v5 = vpack.i.b16 %v3793_v56, %v3792_v12 }
 0x8b0   : > { %v3825_v7 = vrot.slane %v3811_v1, %v8557_v3  ;;  %v3826_v30 = vcombine.low %v3803_v62, %v3818_v2  ;;  %v3827_v8 = vcombine.high %v3803_v62, %v3818_v2  ;;  %v3877_v11 = vcombine.high %v3794_v5, %v8554_v60 }
 0x8b1   : > { %v3884_v16 = vrot.slane %v3794_v5, %v8557_v3 }
 0x8b2   : > { %v7358_v45 = vpop.eup %7357  ;;  %v3834_v17 = vrot.slane %v3826_v30, %v8561_v6  ;;  %v3841_v18 = vrot.slane %v3827_v8, %v8561_v6  ;;  %v3891_v21 = vrot.slane %v3877_v11, %v8557_v3 }
 0x8b3   : > { %v3215_v36 = vmul.f32 %v7358_v45, %v3201_v40  ;;  %v3862_v40 = vcombine.high %v3786_v59, %v8554_v60  ;;  %v3892_v15 = vcombine.low %v3869_v4, %v3884_v16  ;;  %v3893_v23 = vcombine.high %v3869_v4, %v3884_v16 }
 0x8b4   : > { %v3928_v34 = vcombine.low %v3834_v17, %v3841_v18  ;;  %v6528_v35 = vcombine.high %v3834_v17, %v3841_v18 }
 0x8b5   : > { %v3221_v29 = vmul.f32 %v3220_v46, %v3215_v36  ;;  %v3876_v10 = vrot.slane %v3862_v40, %v8557_v3  ;;  %v3900_v38 = vrot.slane %v3892_v15, %v8561_v6  ;;  %v3907_v13 = vrot.slane %v3893_v23, %v8561_v6 }
 0x8b6   : > { %v7360_v48 = vpop.eup %7359  ;;  %v3935_v47 = vrot.slane %v3928_v34, %v8557_v3 }
 0x8b7   : > { %v3216_v49 = vmul.f32 %v7360_v48, %v3202_v0  ;;  %v8937_v52 = vadd.f32 %v3226_v50, %v3221_v29  ;;  %v3810_v0 = vrot.slane %v3796_v32, %v8557_v3  ;;  %v3908_v39 = vcombine.low %v3876_v10, %v3891_v21 }
 0x8b8   : > { %v3909_v42 = vcombine.high %v3876_v10, %v3891_v21  ;;  %v3978_v36 = vcombine.low %v3900_v38, %v3907_v13  ;;  %v3943_v48 = vrot.slane %v6528_v35, %v8557_v3 }
 0x8b9   : > { %v3222_v51 = vmul.f32 %v3220_v46, %v3216_v49  ;;  %v3842_v19 = vcombine.low %v3810_v0, %v3825_v7  ;;  %v3843_v20 = vcombine.high %v3810_v0, %v3825_v7  ;;  %v3916_v22 = vrot.slane %v3908_v39, %v8561_v6 }
 0x8ba   : > { %v3923_v45 = vrot.slane %v3909_v42, %v8561_v6  ;;  %v6530_v46 = vcombine.high %v3900_v38, %v3907_v13  ;;  %v3960_v58 = vcombine.low %v3935_v47, %v3943_v48 }
 0x8bb   : > { %v8939_v53 = vadd.f32 %v3226_v50, %v3222_v51  ;;  %v3850_v26 = vrot.slane %v3842_v19, %v8561_v6  ;;  %v3857_v27 = vrot.slane %v3843_v20, %v8561_v6  ;;  %v3248_v20 = vsub.s32 2, %v8516_v31 }
 0x8bc   : > { %v3994_v49 = vcombine.low %v3916_v22, %v3923_v45  ;;  %v6531_v29 = vcombine.high %v3916_v22, %v3923_v45  ;;  %v3993_v55 = vrot.slane %v6530_v46, %v8557_v3  ;;  %v3967_v12 = vrot.slane %v3960_v58, %v8561_v6 }
 0x8bd   : > { %v3229_v54 = vpack.c.bf16 %v8939_v53, %v8937_v52  ;;  %v3944_v43 = vcombine.low %v3850_v26, %v3857_v27  ;;  %v6529_v44 = vcombine.high %v3850_v26, %v3857_v27  ;;  %v3249_v21 = vrot.slane %v8877_v25, %v3248_v20 }
 0x8be   : > { %v4001_v57 = vrot.slane %v3994_v49, %v8557_v3  ;;  %v4009_v37 = vrot.slane %v6531_v29, %v8557_v3 }
 0x8bf   : > { %6906 = vmatmul.mubr.bf16.vlgmr.msra.gmra.mrb[44].mxu1 %v3229_v54  ;;  %v3951_v50 = vrot.slane %v3944_v43, %v8557_v3  ;;  %v3959_v51 = vrot.slane %v6529_v44, %v8557_v3  ;;  %v3985_v54 = vrot.slane %v3978_v36, %v8557_v3 }
 0x8c0   : > { %6911 = vmatprep.mubr.msk.bf16.mxu1 %vm7892_vm2, %v7888_v28  ;;  %v4018_v32 = vcombine.low %v4001_v57, %v4009_v37 }
 0x8c1   : > { %v3968_v41 = vcombine.low %v3951_v50, %v3959_v51  ;;  %v4010_v59 = vcombine.low %v3985_v54, %v3993_v55 }
 0x8c2   : > { %v4025_v63 = vrot.slane %v4018_v32, %v8561_v6 }
 0x8c3   : > { %v3975_v61 = vrot.slane %v3968_v41, %v8561_v6  ;;  %v4017_v62 = vrot.slane %v4010_v59, %v8561_v6 }
 0x8c5   : > { %v3976_v40 = vcombine.low %v3967_v12, %v3975_v61  ;;  %v3977_v56 = vcombine.high %v3967_v12, %v3975_v61  ;;  %v4026_v0 = vcombine.low %v4017_v62, %v4025_v63  ;;  %v4027_v1 = vcombine.high %v4017_v62, %v4025_v63 }
 0x8c7   : > { %v8977_v2 = vpack.i.b16 %v4026_v0, %v3976_v40  ;;  %v8979_v4 = vpack.i.b16 %v4027_v1, %v3977_v56  ;;  %v4037_v5 = vshrl.u32 %v3977_v56, 16  ;;  %v4038_v7 = vshrl.u32 %v4027_v1, 16 }
 0x8c8   : > { %v4031_v30 = vshrl.u32 %v3976_v40, 16  ;;  %v4032_v8 = vshrl.u32 %v4026_v0, 16 }
 0x8c9   : > { %v6532_v10 = vcombine.low %v8977_v2, %v8977_v2  ;;  %v6536_v11 = vcombine.low %v8979_v4, %v8979_v4  ;;  %v8985_v16 = vpack.i.b16 %v4038_v7, %v4037_v5 }
 0x8ca   : > { %v8987_v17 = vpack.i.b16 %v4032_v8, %v4031_v30 }
 0x8cb   : > { %v4344_v18 = vsel %vm1943_vm3, %v6532_v10, 0  ;;  %v4528_v19 = vsel %vm1943_vm3, %v6536_v11, 0 }
 0x8cc   : > { %6910 = vmatpush3.bf16.xpose.msra.mxu1 %v4344_v18  ;;  %6934 = vmatpush3.bf16.xpose.msra.mxu0 %v4528_v19 }
 0x8cd   : > { %6915 = vmatprep.subr.bf16.mxu1 %v7888_v28  ;;  %6945 = vmatprep.subr.bf16.mxu0 %v7888_v28 }
 0x992   : > { %v3332_v15 = vpop.f32.mrb[44].mxu1 }
 0x993   : > { %v3333_v23 = vadd.f32 %v3332_v15, %v3249_v21  ;;  %v6907_v26 = vpop.f32.mrb[45].mxu1 }
 0x994   : > { %v3335_v27 = vpop.f32.mrb[46].mxu1 }
 0x995   : > { %v3336_v34 = vadd.f32 %v3335_v27, %v3249_v21  ;;  %v6908_v35 = vpop.f32.mrb[47].mxu1  ;;  %v3486_v38 = vmul.f32 0.17677669, %v3333_v23 }
 0x997   : > { %v3487_v13 = vmul.f32 0.17677669, %v3336_v34 }
 0x999   : > { %v3488_v39 = vpack.c.bf16 %v3487_v13, %v3486_v38 }
 0x99b   : > { %3492 = vrot.lane.b32.xlu0 %v3488_v39, %s7891_s24  ;;  %3490 = vrot.lane.b32.xlu1 %v3488_v39, %s7890_s11  ;;  %v3500_v22 = vshrl.u32 %v3488_v39, 16 }
 0x99f   : > { %3494 = vrot.lane.b32.xlu1 %v3488_v39, %s7889_s5 }
 0xa0d   : > { %v3491_v42 = vpop.permute.xlu1 %3490  ;;  %v3493_v25 = vpop.permute.xlu0 %3492 }
 0xa0e   : > { %v3498_v43 = vpack.i.b16 %v3491_v42, %v3488_v39  ;;  %v3501_v44 = vshrl.u32 %v3491_v42, 16  ;;  %v3508_v48 = vshrl.u32 %v3493_v25, 16 }
 0xa10   : > { %v3502_v45 = vpack.i.b16 %v3501_v44, %v3500_v22  ;;  %v3512_v46 = vcombine.high %v3498_v43, %v8554_v60  ;;  %v3519_v29 = vrot.slane %v3498_v43, %v8557_v3 }
 0xa11   : > { %v3495_v36 = vpop.permute.xlu1 %3494 }
 0xa12   : > { %v3506_v47 = vpack.i.b16 %v3495_v36, %v3493_v25  ;;  %v3509_v49 = vshrl.u32 %v3495_v36, 16  ;;  %v3578_v54 = vcombine.high %v3502_v45, %v8554_v60  ;;  %v3526_v57 = vrot.slane %v3512_v46, %v8557_v3 }
 0xa13   : > { %v3585_v59 = vrot.slane %v3502_v45, %v8557_v3 }
 0xa14   : > { %v3527_v50 = vcombine.high %v3506_v47, %v8554_v60  ;;  %v3534_v51 = vrot.slane %v3506_v47, %v8557_v3  ;;  %v3510_v55 = vpack.i.b16 %v3509_v49, %v3508_v48  ;;  %v3592_v56 = vrot.slane %v3578_v54, %v8557_v3 }
 0xa16   : > { %v3541_v37 = vrot.slane %v3527_v50, %v8557_v3  ;;  %v3542_v58 = vcombine.low %v3519_v29, %v3534_v51  ;;  %v3543_v41 = vcombine.high %v3519_v29, %v3534_v51  ;;  %v3593_v32 = vcombine.high %v3510_v55, %v8554_v60 }
 0xa17   : > { %v3600_v12 = vrot.slane %v3510_v55, %v8557_v3 }
 0xa18   : > { %v3550_v61 = vrot.slane %v3542_v58, %v8561_v6  ;;  %v3557_v62 = vrot.slane %v3543_v41, %v8561_v6  ;;  %v3558_v63 = vcombine.low %v3526_v57, %v3541_v37  ;;  %v3559_v40 = vcombine.high %v3526_v57, %v3541_v37 }
 0xa19   : > { %v3607_v0 = vrot.slane %v3593_v32, %v8557_v3  ;;  %v3608_v1 = vcombine.low %v3585_v59, %v3600_v12  ;;  %v3609_v5 = vcombine.high %v3585_v59, %v3600_v12  ;;  %v6533_v59 = vcombine.high %v8977_v2, %v8977_v2 }
 0xa1a   : > { %v3566_v7 = vrot.slane %v3558_v63, %v8561_v6  ;;  %v3573_v30 = vrot.slane %v3559_v40, %v8561_v6  ;;  %v3644_v8 = vcombine.low %v3550_v61, %v3557_v62  ;;  %v6516_v10 = vcombine.high %v3550_v61, %v3557_v62 }
 0xa1b   : > { %v3616_v11 = vrot.slane %v3608_v1, %v8561_v6  ;;  %v3623_v18 = vrot.slane %v3609_v5, %v8561_v6  ;;  %v3624_v19 = vcombine.low %v3592_v56, %v3607_v0  ;;  %v3625_v21 = vcombine.high %v3592_v56, %v3607_v0 }
 0xa1c   : > { %v3651_v15 = vrot.slane %v3644_v8, %v8557_v3  ;;  %v3659_v23 = vrot.slane %v6516_v10, %v8557_v3  ;;  %v3660_v26 = vcombine.low %v3566_v7, %v3573_v30  ;;  %v6517_v27 = vcombine.high %v3566_v7, %v3573_v30 }
 0xa1d   : > { %v3632_v34 = vrot.slane %v3624_v19, %v8561_v6  ;;  %v3639_v35 = vrot.slane %v3625_v21, %v8561_v6  ;;  %v3694_v38 = vcombine.low %v3616_v11, %v3623_v18  ;;  %v6518_v13 = vcombine.high %v3616_v11, %v3623_v18 }
 0xa1e   : > { %v3667_v39 = vrot.slane %v3660_v26, %v8557_v3  ;;  %v3675_v42 = vrot.slane %v6517_v27, %v8557_v3  ;;  %v3676_v36 = vcombine.low %v3651_v15, %v3659_v23  ;;  %v6538_v12 = vcombine.low %v8985_v16, %v8985_v16 }
 0xa1f   : > { %v3701_v43 = vrot.slane %v3694_v38, %v8557_v3  ;;  %v3709_v44 = vrot.slane %v6518_v13, %v8557_v3  ;;  %v3710_v22 = vcombine.low %v3632_v34, %v3639_v35  ;;  %v6519_v25 = vcombine.high %v3632_v34, %v3639_v35 }
 0xa20   : > { %v3684_v45 = vcombine.low %v3667_v39, %v3675_v42  ;;  %v3683_v50 = vrot.slane %v3676_v36, %v8561_v6  ;;  %v4390_v40 = vsel %vm1943_vm3, %v6533_v59, 0  ;;  %v4620_v56 = vsel %vm1943_vm3, %v6538_v12, 0 }
 0xa21   : > { %v3717_v46 = vrot.slane %v3710_v22, %v8557_v3  ;;  %v3725_v47 = vrot.slane %v6519_v25, %v8557_v3  ;;  %v3726_v48 = vcombine.low %v3701_v43, %v3709_v44  ;;  %v6534_v1 = vcombine.low %v8987_v17, %v8987_v17 }
 0xa22   : > { %v3691_v49 = vrot.slane %v3684_v45, %v8561_v6  ;;  %v6535_v18 = vcombine.high %v8987_v17, %v8987_v17  ;;  %v6537_v15 = vcombine.high %v8979_v4, %v8979_v4  ;;  %v6539_v17 = vcombine.high %v8985_v16, %v8985_v16 }
 0xa23   : > { %v3734_v29 = vcombine.low %v3717_v46, %v3725_v47  ;;  %v3733_v51 = vrot.slane %v3726_v48, %v8561_v6  ;;  %v4436_v8 = vsel %vm1943_vm3, %v6534_v1, 0 }
 0xa24   : > { %v3692_v55 = vcombine.low %v3683_v50, %v3691_v49  ;;  %v3693_v37 = vcombine.high %v3683_v50, %v3691_v49  ;;  %v4482_v21 = vsel %vm1943_vm3, %v6535_v18, 0  ;;  %v4574_v26 = vsel %vm1943_vm3, %v6537_v15, 0 }
 0xa25   : > { %v3741_v54 = vrot.slane %v3734_v29, %v8561_v6  ;;  %v4666_v34 = vsel %vm1943_vm3, %v6539_v17, 0 }
 0xa26   : > { %v3753_v0 = vshrl.u32 %v3693_v37, 16  ;;  %v3747_v10 = vshrl.u32 %v3692_v55, 16 }
 0xa27   : > { %v3742_v57 = vcombine.low %v3733_v51, %v3741_v54  ;;  %v3743_v58 = vcombine.high %v3733_v51, %v3741_v54 }
 0xa29   : > { %v3746_v41 = vpack.i.b16 %v3742_v57, %v3692_v55  ;;  %v3752_v32 = vpack.i.b16 %v3743_v58, %v3693_v37  ;;  %v3754_v63 = vshrl.u32 %v3743_v58, 16  ;;  %v3748_v30 = vshrl.u32 %v3742_v57, 16 }
 0xa2b   : > { %v6520_v61 = vcombine.low %v3746_v41, %v3746_v41  ;;  %v6524_v62 = vcombine.low %v3752_v32, %v3752_v32  ;;  %v3755_v2 = vpack.i.b16 %v3754_v63, %v3753_v0  ;;  %v6521_v5 = vcombine.high %v3746_v41, %v3746_v41 }
 0xa2c   : > { %v3749_v11 = vpack.i.b16 %v3748_v30, %v3747_v10  ;;  %v6525_v27 = vcombine.high %v3752_v32, %v3752_v32 }
 0xa2d   : > { %6912 = vmatmul.mubr.msk.bf16.vlgmr.msra.gmra.mrb[48].mxu1 %vm1943_vm3, %v6520_v61  ;;  %6936 = vmatmul.mubr.msk.bf16.vlgmr.msra.gmra.mrb[36].mxu0 %vm1943_vm3, %v6524_v62  ;;  %v6526_v7 = vcombine.low %v3755_v2, %v3755_v2  ;;  %v6527_v4 = vcombine.high %v3755_v2, %v3755_v2 }
 0xa2e   : > { %6916 = vmatpush3.bf16.xpose.msra.mxu1 %v4390_v40  ;;  %6946 = vmatpush3.bf16.xpose.msra.mxu0 %v4620_v56  ;;  %v6522_v19 = vcombine.low %v3749_v11, %v3749_v11  ;;  %v6523_v23 = vcombine.high %v3749_v11, %v3749_v11 }
 0xa2f   : > { %6917 = vmatprep.mubr.msk.bf16.mxu1 %vm7892_vm2, %v7888_v28  ;;  %6921 = vmatprep.subr.bf16.mxu1 %v7888_v28 }
 0xa30   : > { %6947 = vmatprep.mubr.msk.bf16.mxu0 %vm7892_vm2, %v7888_v28  ;;  %6957 = vmatprep.subr.bf16.mxu0 %v7888_v28 }
 0xa35   : > { %6918 = vmatmul.mubr.msk.bf16.vlgmr.msra.gmra.mrb[52].mxu1 %vm1943_vm3, %v6521_v5  ;;  %6948 = vmatmul.mubr.msk.bf16.vlgmr.msra.gmra.mrb[40].mxu0 %vm1943_vm3, %v6526_v7 }
 0xa36   : > { %6922 = vmatpush3.bf16.xpose.msra.mxu1 %v4436_v8  ;;  %6923 = vmatprep.mubr.msk.bf16.mxu1 %vm7892_vm2, %v7888_v28 }
 0xa37   : > { %6927 = vmatprep.subr.bf16.mxu1 %v7888_v28  ;;  %6959 = vmatprep.mubr.msk.bf16.mxu0 %vm7892_vm2, %v7888_v28 }
 0xa3d   : > { %6924 = vmatmul.mubr.msk.bf16.vlgmr.msra.gmra.mrb[56].mxu1 %vm1943_vm3, %v6522_v19 }
 0xa3e   : > { %6928 = vmatpush3.bf16.xpose.msra.mxu1 %v4482_v21  ;;  %6929 = vmatprep.mubr.msk.bf16.mxu1 %vm7892_vm2, %v7888_v28 }
 0xa3f   : > { %6939 = vmatprep.subr.bf16.mxu1 %v7888_v28 }
 0xa45   : > { %6930 = vmatmul.mubr.msk.bf16.vlgmr.msra.gmra.mrb[60].mxu1 %vm1943_vm3, %v6523_v23 }
 0xa46   : > { %6940 = vmatpush3.bf16.xpose.msra.mxu1 %v4574_v26  ;;  %6941 = vmatprep.mubr.msk.bf16.mxu1 %vm7892_vm2, %v7888_v28 }
 0xa47   : > { %6951 = vmatprep.subr.bf16.mxu1 %v7888_v28 }
 0xa4d   : > { %6942 = vmatmul.mubr.msk.bf16.vlgmr.msra.gmra.mrb[64].mxu1 %vm1943_vm3, %v6525_v27 }
 0xa4e   : > { %6952 = vmatpush3.bf16.xpose.msra.mxu1 %v4666_v34  ;;  %6953 = vmatprep.mubr.msk.bf16.mxu1 %vm7892_vm2, %v7888_v28 }
 0xa4f   : > { %6963 = vmatprep.subr.bf16.mxu1 %v7888_v28 }
 0xa55   : > { %6954 = vmatmul.mubr.msk.bf16.vlgmr.msra.gmra.mrb[68].mxu1 %vm1943_vm3, %v6527_v4 }
 0xa56   : > { %6965 = vmatprep.mubr.msk.bf16.mxu1 %vm7892_vm2, %v7888_v28 }
 0xb00   : > { %v4380_v35 = vpop.f32.mrb[48].mxu1  ;;  %v9080_v38 = vpop.f32.mrb[36].mxu0 }
 0xb01   : > { %v6913_v16 = vpop.f32.mrb[49].mxu1  ;;  %v6937_v13 = vpop.f32.mrb[37].mxu0  ;;  %v4708_v39 = vsel %vm2312_vm4, %v4380_v35, -inf  ;;  %v4720_v51 = vsel %vm2312_vm4, %v9080_v38, -inf }
 0xb02   : > { %v4567_v42 = vpop.f32.mrb[38].mxu0  ;;  %4709 = vmax.xlane.f32.xlu0 %v4708_v39  ;;  %v4383_v43 = vpop.f32.mrb[50].mxu1 }
 0xb03   : > { %v6914_v44 = vpop.f32.mrb[51].mxu1  ;;  %v6938_v22 = vpop.f32.mrb[39].mxu0 }
 0xb08   : > { %v4426_v25 = vpop.f32.mrb[52].mxu1  ;;  %v4656_v45 = vpop.f32.mrb[40].mxu0 }
 0xb09   : > { %v6919_v36 = vpop.f32.mrb[53].mxu1  ;;  %v6949_v46 = vpop.f32.mrb[41].mxu0  ;;  %v4711_v47 = vsel %vm2312_vm4, %v4426_v25, -inf  ;;  %v4726_v57 = vsel %vm2312_vm4, %v4656_v45, -inf }
 0xb0a   : > { %v4659_v48 = vpop.f32.mrb[42].mxu0  ;;  %4712 = vmax.xlane.f32.xlu1 %v4711_v47  ;;  %v4429_v49 = vpop.f32.mrb[54].mxu1 }
 0xb0b   : > { %v6920_v29 = vpop.f32.mrb[55].mxu1  ;;  %v6950_v50 = vpop.f32.mrb[43].mxu0 }
 0xb0e   : > { %4721 = vmax.xlane.f32.xlu1 %v4720_v51 }
 0xb10   : > { %v4472_v54 = vpop.f32.mrb[56].mxu1 }
 0xb11   : > { %v6925_v55 = vpop.f32.mrb[57].mxu1  ;;  %v4714_v37 = vsel %vm2312_vm4, %v4472_v54, -inf }
 0xb12   : > { %4727 = vmax.xlane.f32.xlu1 %v4726_v57  ;;  %4715 = vmax.xlane.f32.xlu0 %v4714_v37  ;;  %v4475_v58 = vpop.f32.mrb[58].mxu1 }
 0xb13   : > { %v6926_v41 = vpop.f32.mrb[59].mxu1 }
 0xb18   : > { %v4518_v59 = vpop.f32.mrb[60].mxu1 }
 0xb19   : > { %v6931_v32 = vpop.f32.mrb[61].mxu1  ;;  %v4717_v12 = vsel %vm2312_vm4, %v4518_v59, -inf }
 0xb1a   : > { %4718 = vmax.xlane.f32.xlu0 %v4717_v12  ;;  %v4521_v61 = vpop.f32.mrb[62].mxu1  ;;  %v4068_v32 = vshrl.u32 %v8928_v33, 16 }
 0xb1b   : > { %v6932_v62 = vpop.f32.mrb[63].mxu1 }
 0xb20   : > { %v4610_v63 = vpop.f32.mrb[64].mxu1 }
 0xb21   : > { %v6943_v40 = vpop.f32.mrb[65].mxu1  ;;  %v4723_v56 = vsel %vm2312_vm4, %v4610_v63, -inf }
 0xb22   : > { %4724 = vmax.xlane.f32.xlu0 %v4723_v56  ;;  %v4613_v0 = vpop.f32.mrb[66].mxu1 }
 0xb23   : > { %4058 = vrot.lane.b32.xlu1 %v8928_v33, %s7890_s11  ;;  %v6944_v2 = vpop.f32.mrb[67].mxu1 }
 0xb27   : > { %4062 = vrot.lane.b32.xlu1 %v8928_v33, %s7889_s5 }
 0xb28   : > { %v4702_v1 = vpop.f32.mrb[68].mxu1 }
 0xb29   : > { %v6955_v5 = vpop.f32.mrb[69].mxu1  ;;  %v4729_v7 = vsel %vm2312_vm4, %v4702_v1, -inf }
 0xb2a   : > { %4730 = vmax.xlane.f32.xlu0 %v4729_v7  ;;  %v4705_v30 = vpop.f32.mrb[70].mxu1 }
 0xb2b   : > { %v6956_v8 = vpop.f32.mrb[71].mxu1 }
 0xb40   : > { %4060 = vrot.lane.b32.xlu0 %v8928_v33, %s7891_s24 }
 0xb8f   : > { %v4710_v10 = vpop.xlane.xlu0 %4709 }
 0xb90   : > { %v4732_v11 = vsub.f32 %v4380_v35, %v4710_v10 }
 0xb92   : > { %v4740_v18 = vmul.f32 1.442695, %v4732_v11 }
 0xb94   : > { %7361 = vpow2.f32 %v4740_v18 }
 0xb97   : > { %v4713_v19 = vpop.xlane.xlu1 %4712 }
 0xb98   : > { %v4733_v21 = vsub.f32 %v4426_v25, %v4713_v19 }
 0xb9a   : > { %v4742_v15 = vmul.f32 1.442695, %v4733_v21 }
 0xb9b   : > { %v4722_v23 = vpop.xlane.xlu1 %4721 }
 0xb9c   : > { %7363 = vpow2.f32 %v4742_v15  ;;  %v4736_v17 = vsub.f32 %v9080_v38, %v4722_v23 }
 0xb9e   : > { %v9097_v26 = vpop.eup %7361  ;;  %v4748_v35 = vmul.f32 1.442695, %v4736_v17 }
 0xb9f   : > { %v4716_v27 = vpop.xlane.xlu0 %4715  ;;  %v4756_v34 = vsel %vm2312_vm4, %v9097_v26, 0.0  ;;  %v4728_v4 = vpop.xlane.xlu1 %4727 }
 0xba0   : > { %v4734_v16 = vsub.f32 %v4472_v54, %v4716_v27  ;;  %4757 = vadd.xlane.f32.xlu1 %v4756_v34  ;;  %v4738_v39 = vsub.f32 %v4656_v45, %v4728_v4 }
 0xba2   : > { %v4744_v13 = vmul.f32 1.442695, %v4734_v16  ;;  %v4752_v43 = vmul.f32 1.442695, %v4738_v39 }
 0xba3   : > { %v4059_v29 = vpop.permute.xlu1 %4058 }
 0xba4   : > { %7365 = vpow2.f32 %v4744_v13  ;;  %v4066_v55 = vpack.i.b16 %v4059_v29, %v8928_v33  ;;  %v4069_v57 = vshrl.u32 %v4059_v29, 16 }
 0xba5   : > { %7367 = vpow2.f32 %v4748_v35 }
 0xba6   : > { %v9102_v42 = vpop.eup %7363  ;;  %7369 = vpow2.f32 %v4752_v43  ;;  %v4070_v62 = vpack.i.b16 %v4069_v57, %v4068_v32  ;;  %v4087_v5 = vrot.slane %v4066_v55, %v8557_v3 }
 0xba7   : > { %v4719_v44 = vpop.xlane.xlu0 %4718  ;;  %v4759_v22 = vsel %vm2312_vm4, %v9102_v42, 0.0  ;;  %v4063_v12 = vpop.permute.xlu1 %4062 }
 0xba8   : > { %4760 = vadd.xlane.f32.xlu0 %v4759_v22  ;;  %v4735_v38 = vsub.f32 %v4518_v59, %v4719_v44  ;;  %v4077_v56 = vshrl.u32 %v4063_v12, 16  ;;  %v4146_v10 = vcombine.high %v4070_v62, %v8554_v60  ;;  %v4153_v23 = vrot.slane %v4070_v62, %v8557_v3 }
 0xbaa   : > { %v4746_v25 = vmul.f32 1.442695, %v4735_v38  ;;  %v4160_v13 = vrot.slane %v4146_v10, %v8557_v3 }
 0xbac   : > { %7371 = vpow2.f32 %v4746_v25 }
 0xbae   : > { %v9106_v36 = vpop.eup %7365 }
 0xbaf   : > { %v4725_v46 = vpop.xlane.xlu0 %4724  ;;  %v4762_v45 = vsel %vm2312_vm4, %v9106_v36, 0.0  ;;  %v9110_v48 = vpop.eup %7367 }
 0xbb0   : > { %v4737_v47 = vsub.f32 %v4610_v63, %v4725_v46  ;;  %4763 = vadd.xlane.f32.xlu0 %v4762_v45  ;;  %v4768_v50 = vsel %vm2312_vm4, %v9110_v48, 0.0  ;;  %v9114_v51 = vpop.eup %7369  ;;  %v4080_v63 = vcombine.high %v4066_v55, %v8554_v60 }
 0xbb1   : > { %v4774_v59 = vsel %vm2312_vm4, %v9114_v51, 0.0 }
 0xbb2   : > { %v4750_v49 = vmul.f32 1.442695, %v4737_v47  ;;  %v4094_v8 = vrot.slane %v4080_v63, %v8557_v3 }
 0xbb4   : > { %7373 = vpow2.f32 %v4750_v49  ;;  %4769 = vadd.xlane.f32.xlu0 %v4768_v50 }
 0xbb6   : > { %v9116_v54 = vpop.eup %7371 }
 0xbb7   : > { %v4731_v37 = vpop.xlane.xlu0 %4730  ;;  %v4765_v41 = vsel %vm2312_vm4, %v9116_v54, 0.0 }
 0xbb8   : > { %v4739_v58 = vsub.f32 %v4702_v1, %v4731_v37  ;;  %4766 = vadd.xlane.f32.xlu1 %v4765_v41  ;;  %4775 = vadd.xlane.f32.xlu0 %v4774_v59 }
 0xbba   : > { %v4754_v61 = vmul.f32 1.442695, %v4739_v58 }
 0xbbb   : > { %v4061_v40 = vpop.permute.xlu0 %4060 }
 0xbbc   : > { %7375 = vpow2.f32 %v4754_v61  ;;  %v4074_v0 = vpack.i.b16 %v4063_v12, %v4061_v40  ;;  %v4076_v2 = vshrl.u32 %v4061_v40, 16 }
 0xbbe   : > { %v9125_v1 = vpop.eup %7373  ;;  %v4078_v7 = vpack.i.b16 %v4077_v56, %v4076_v2  ;;  %v4095_v30 = vcombine.high %v4074_v0, %v8554_v60  ;;  %v4102_v33 = vrot.slane %v4074_v0, %v8557_v3 }
 0xbbf   : > { %v4771_v11 = vsel %vm2312_vm4, %v9125_v1, 0.0 }
 0xbc0   : > { %v4109_v18 = vrot.slane %v4095_v30, %v8557_v3  ;;  %v4110_v19 = vcombine.low %v4087_v5, %v4102_v33  ;;  %v4111_v21 = vcombine.high %v4087_v5, %v4102_v33  ;;  %v4161_v15 = vcombine.high %v4078_v7, %v8554_v60  ;;  %4772 = vadd.xlane.f32.xlu1 %v4771_v11 }
 0xbc1   : > { %v4168_v17 = vrot.slane %v4078_v7, %v8557_v3 }
 0xbc2   : > { %v4118_v27 = vrot.slane %v4110_v19, %v8561_v6  ;;  %v4125_v34 = vrot.slane %v4111_v21, %v8561_v6  ;;  %v4126_v4 = vcombine.low %v4094_v8, %v4109_v18  ;;  %v4127_v16 = vcombine.high %v4094_v8, %v4109_v18 }
 0xbc3   : > { %v4175_v35 = vrot.slane %v4161_v15, %v8557_v3  ;;  %v4176_v39 = vcombine.low %v4153_v23, %v4168_v17  ;;  %v4177_v43 = vcombine.high %v4153_v23, %v4168_v17 }
 0xbc4   : > { %v4134_v44 = vrot.slane %v4126_v4, %v8561_v6  ;;  %v4141_v60 = vrot.slane %v4127_v16, %v8561_v6  ;;  %v4212_v22 = vcombine.low %v4118_v27, %v4125_v34  ;;  %v6540_v38 = vcombine.high %v4118_v27, %v4125_v34 }
 0xbc5   : > { %v4184_v25 = vrot.slane %v4176_v39, %v8561_v6  ;;  %v4191_v46 = vrot.slane %v4177_v43, %v8561_v6  ;;  %v4192_v47 = vcombine.low %v4160_v13, %v4175_v35  ;;  %v4193_v45 = vcombine.high %v4160_v13, %v4175_v35 }
 0xbc6   : > { %v9146_v49 = vpop.eup %7375  ;;  %v4219_v29 = vrot.slane %v4212_v22, %v8557_v3  ;;  %v4227_v50 = vrot.slane %v6540_v38, %v8557_v3  ;;  %v4228_v55 = vcombine.low %v4134_v44, %v4141_v60  ;;  %v6541_v57 = vcombine.high %v4134_v44, %v4141_v60 }
 0xbc7   : > { %v4200_v37 = vrot.slane %v4192_v47, %v8561_v6  ;;  %v4207_v58 = vrot.slane %v4193_v45, %v8561_v6  ;;  %v4262_v41 = vcombine.low %v4184_v25, %v4191_v46  ;;  %v6542_v59 = vcombine.high %v4184_v25, %v4191_v46 }
 0xbc8   : > { %v4235_v32 = vrot.slane %v4228_v55, %v8557_v3  ;;  %v4243_v12 = vrot.slane %v6541_v57, %v8557_v3  ;;  %v4777_v61 = vsel %vm2312_vm4, %v9146_v49, 0.0  ;;  %v4244_v62 = vcombine.low %v4219_v29, %v4227_v50 }
 0xbc9   : > { %v4269_v63 = vrot.slane %v4262_v41, %v8557_v3  ;;  %v4277_v40 = vrot.slane %v6542_v59, %v8557_v3  ;;  %v4278_v56 = vcombine.low %v4200_v37, %v4207_v58  ;;  %v6543_v0 = vcombine.high %v4200_v37, %v4207_v58  ;;  %4778 = vadd.xlane.f32.xlu1 %v4777_v61 }
 0xbca   : > { %v4252_v2 = vcombine.low %v4235_v32, %v4243_v12  ;;  %v4251_v33 = vrot.slane %v4244_v62, %v8561_v6 }
 0xbcb   : > { %v4285_v5 = vrot.slane %v4278_v56, %v8557_v3  ;;  %v4293_v7 = vrot.slane %v6543_v0, %v8557_v3  ;;  %v4294_v30 = vcombine.low %v4269_v63, %v4277_v40 }
 0xbcc   : > { %v4259_v8 = vrot.slane %v4252_v2, %v8561_v6 }
 0xbcd   : > { %v4302_v10 = vcombine.low %v4285_v5, %v4293_v7  ;;  %v4301_v19 = vrot.slane %v4294_v30, %v8561_v6 }
 0xbce   : > { %v4260_v11 = vcombine.low %v4251_v33, %v4259_v8  ;;  %v4261_v18 = vcombine.high %v4251_v33, %v4259_v8 }
 0xbcf   : > { %v4309_v21 = vrot.slane %v4302_v10, %v8561_v6 }
 0xbd0   : > { %v4315_v17 = vshrl.u32 %v4260_v11, 16  ;;  %v4321_v13 = vshrl.u32 %v4261_v18, 16 }
 0xbd1   : > { %v4310_v15 = vcombine.low %v4301_v19, %v4309_v21  ;;  %v4311_v23 = vcombine.high %v4301_v19, %v4309_v21 }
 0xbd3   : > { %v4314_v27 = vpack.i.b16 %v4310_v15, %v4260_v11  ;;  %v4316_v34 = vshrl.u32 %v4310_v15, 16  ;;  %v9164_v4 = vpack.i.b16 %v4311_v23, %v4261_v18  ;;  %v4322_v16 = vshrl.u32 %v4311_v23, 16 }
 0xbd5   : > { %v6544_v35 = vcombine.low %v4314_v27, %v4314_v27  ;;  %v6545_v39 = vcombine.high %v4314_v27, %v4314_v27  ;;  %v4317_v43 = vpack.i.b16 %v4316_v34, %v4315_v17  ;;  %v9166_v44 = vpack.i.b16 %v4322_v16, %v4321_v13  ;;  %v7278_v16 = vld [vmem:[%s8464_s29 + $0x8] sm:$0xff]   ;;  %v7279_v13 = vld [vmem:[%s8464_s29 + $0x10] sm:$0xff]  }
 0xbd6   : > { %v6548_v62 = vcombine.low %v9164_v4, %v9164_v4  ;;  %v6549_v7 = vcombine.high %v9164_v4, %v9164_v4  ;;  %v7277_v4 = vld [vmem:[%s8464_s29] sm:$0xff]  }
 0xbd7   : > { %v4808_v60 = vsel %vm2412_vm5, %v6544_v35, 0  ;;  %v4854_v22 = vsel %vm2412_vm5, %v6545_v39, 0  ;;  %v6546_v45 = vcombine.low %v4317_v43, %v4317_v43  ;;  %v6547_v58 = vcombine.high %v4317_v43, %v4317_v43  ;;  %v7280_v35 = vld [vmem:[%s8464_s29 + $0x18] sm:$0xff]   ;;  %v7282_v39 = vld [vmem:[%s8464_s29 + $0x28] sm:$0xff]  }
 0xbd8   : > { %6958 = vmatpush3.bf16.msra.mxu0 %v4808_v60  ;;  %6964 = vmatpush3.bf16.msra.mxu1 %v4854_v22  ;;  %v4992_v0 = vsel %vm2412_vm5, %v6548_v62, 0  ;;  %v6550_v30 = vcombine.low %v9166_v44, %v9166_v44  ;;  %v6551_v15 = vcombine.high %v9166_v44, %v9166_v44 }
 0xbd9   : > { %6969 = vmatprep.subr.bf16.mxu0 %v7888_v28  ;;  %6975 = vmatprep.subr.bf16.mxu1 %v7888_v28  ;;  %v4900_v50 = vsel %vm2412_vm5, %v6546_v45, 0  ;;  %v4946_v59 = vsel %vm2412_vm5, %v6547_v58, 0 }
 0xbda   : > { %v5084_v18 = vsel %vm2412_vm5, %v6550_v30, 0 }
 0xc2d   : > { %v4758_v38 = vpop.xlane.xlu1 %4757 }
 0xc2e   : > { %7377 = vrcp.f32 %v4758_v38 }
 0xc35   : > { %v4761_v25 = vpop.xlane.xlu0 %4760 }
 0xc36   : > { %7379 = vrcp.f32 %v4761_v25 }
 0xc38   : > { %v7378_v46 = vpop.eup %7377 }
 0xc39   : > { %v4788_v47 = vmul.f32 %v7378_v46, %v9097_v26 }
 0xc3b   : > { %v4796_v29 = vpack.c.bf16 %v4788_v47, %v4788_v47 }
 0xc3d   : > { %6960 = vmatmul.mubr.msk.bf16.vlgmr.msra.gmra.mrb[44].mxu0 %vm2312_vm4, %v4796_v29  ;;  %v4764_v55 = vpop.xlane.xlu0 %4763 }
 0xc3e   : > { %6970 = vmatpush3.bf16.msra.mxu0 %v4900_v50  ;;  %6971 = vmatprep.mubr.msk.bf16.mxu0 %vm7892_vm2, %v7888_v28  ;;  %7381 = vrcp.f32 %v4764_v55 }
 0xc3f   : > { %6981 = vmatprep.subr.bf16.mxu0 %v7888_v28 }
 0xc40   : > { %v7380_v57 = vpop.eup %7379 }
 0xc41   : > { %v4789_v37 = vmul.f32 %v7380_v57, %v9102_v42  ;;  %v4770_v41 = vpop.xlane.xlu0 %4769 }
 0xc42   : > { %7383 = vrcp.f32 %v4770_v41 }
 0xc43   : > { %v4797_v26 = vpack.c.bf16 %v4789_v37, %v4789_v37 }
 0xc45   : > { %6966 = vmatmul.mubr.msk.bf16.vlgmr.msra.gmra.mrb[72].mxu1 %vm2312_vm4, %v4797_v26  ;;  %v4767_v32 = vpop.xlane.xlu1 %4766  ;;  %v4776_v12 = vpop.xlane.xlu0 %4775 }
 0xc46   : > { %6976 = vmatpush3.bf16.msra.mxu1 %v4946_v59  ;;  %6977 = vmatprep.mubr.msk.bf16.mxu1 %vm7892_vm2, %v7888_v28  ;;  %7385 = vrcp.f32 %v4767_v32 }
 0xc47   : > { %6987 = vmatprep.subr.bf16.mxu1 %v7888_v28  ;;  %7387 = vrcp.f32 %v4776_v12 }
 0xc48   : > { %v7382_v61 = vpop.eup %7381 }
 0xc49   : > { %v4790_v42 = vmul.f32 %v7382_v61, %v9106_v36 }
 0xc4b   : > { %v4798_v63 = vpack.c.bf16 %v4790_v42, %v4790_v42 }
 0xc4c   : > { %v7384_v40 = vpop.eup %7383 }
 0xc4d   : > { %v4773_v56 = vpop.xlane.xlu1 %4772  ;;  %6972 = vmatmul.mubr.msk.bf16.vlgmr.msra.gmra.mrb[48].mxu0 %vm2312_vm4, %v4798_v63  ;;  %v4792_v2 = vmul.f32 %v7384_v40, %v9110_v48  ;;  %v5038_v48 = vsel %vm2412_vm5, %v6549_v7, 0 }
 0xc4e   : > { %7389 = vrcp.f32 %v4773_v56  ;;  %6982 = vmatpush3.bf16.msra.mxu0 %v4992_v0  ;;  %6983 = vmatprep.mubr.msk.bf16.mxu0 %vm7892_vm2, %v7888_v28 }
 0xc4f   : > { %6993 = vmatprep.subr.bf16.mxu0 %v7888_v28  ;;  %v4800_v8 = vpack.c.bf16 %v4792_v2, %v4792_v2 }
 0xc50   : > { %v7386_v36 = vpop.eup %7385 }
 0xc51   : > { %v4791_v5 = vmul.f32 %v7386_v36, %v9116_v54  ;;  %v7388_v10 = vpop.eup %7387 }
 0xc52   : > { %v4794_v19 = vmul.f32 %v7388_v10, %v9114_v51  ;;  %v5130_v51 = vsel %vm2412_vm5, %v6551_v15, 0 }
 0xc53   : > { %v4799_v33 = vpack.c.bf16 %v4791_v5, %v4791_v5 }
 0xc54   : > { %v4802_v17 = vpack.c.bf16 %v4794_v19, %v4794_v19 }
 0xc55   : > { %6978 = vmatmul.mubr.msk.bf16.vlgmr.msra.gmra.mrb[76].mxu1 %vm2312_vm4, %v4799_v33  ;;  %6984 = vmatmul.mubr.msk.bf16.vlgmr.msra.gmra.mrb[52].mxu0 %vm2312_vm4, %v4800_v8 }
 0xc56   : > { %v4779_v11 = vpop.xlane.xlu1 %4778  ;;  %6988 = vmatpush3.bf16.msra.mxu1 %v5038_v48  ;;  %6994 = vmatpush3.bf16.msra.mxu0 %v5084_v18 }
 0xc57   : > { %7391 = vrcp.f32 %v4779_v11  ;;  %6989 = vmatprep.mubr.msk.bf16.mxu1 %vm7892_vm2, %v7888_v28  ;;  %6995 = vmatprep.mubr.msk.bf16.mxu0 %vm7892_vm2, %v7888_v28 }
 0xc58   : > { %v7390_v54 = vpop.eup %7389  ;;  %6999 = vmatprep.subr.bf16.mxu1 %v7888_v28  ;;  %7005 = vmatprep.subr.bf16.mxu0 %v7888_v28 }
 0xc59   : > { %v4793_v21 = vmul.f32 %v7390_v54, %v9125_v1 }
 0xc5b   : > { %v4801_v23 = vpack.c.bf16 %v4793_v21, %v4793_v21 }
 0xc5d   : > { %6990 = vmatmul.mubr.msk.bf16.vlgmr.msra.gmra.mrb[80].mxu1 %vm2312_vm4, %v4801_v23  ;;  %6996 = vmatmul.mubr.msk.bf16.vlgmr.msra.gmra.mrb[56].mxu0 %vm2312_vm4, %v4802_v17 }
 0xc5e   : > { %7000 = vmatpush3.bf16.msra.mxu1 %v5130_v51  ;;  %7001 = vmatprep.mubr.msk.bf16.mxu1 %vm7892_vm2, %v7888_v28 }
 0xc5f   : > { %7021 = vmatprep.mubr.msk.bf16.mxu0 %vm7892_vm2, %v7888_v28  ;;  %7006 = vmatpush3.bf16.msra.mxu0 %v7277_v4 }
 0xc60   : > { %7007 = vmatprep.subr.bf16.mxu0 %v7888_v28 }
 0xc61   : > { %v7392_v1 = vpop.eup %7391 }
 0xc62   : > { %v4795_v27 = vmul.f32 %v7392_v1, %v9146_v49  ;;  %v7281_v49 = vld [vmem:[%s8464_s29 + $0x20] sm:$0xff]  }
 0xc63   : > { %7008 = vmatpush3.bf16.msra.mxu0 %v7278_v16 }
 0xc64   : > { %v4803_v34 = vpack.c.bf16 %v4795_v27, %v4795_v27  ;;  %7009 = vmatprep.subr.bf16.mxu0 %v7888_v28 }
 0xc66   : > { %7002 = vmatmul.mubr.msk.bf16.vlgmr.msra.gmra.mrb[84].mxu1 %vm2312_vm4, %v4803_v34 }
 0xc67   : > { %5757 = vmatprep.mubr.bf16.mxu1 %v7887_v9  ;;  %7010 = vmatpush3.bf16.msra.mxu0 %v7279_v13 }
 0xc68   : > { %7011 = vmatprep.subr.bf16.mxu0 %v7888_v28 }
 0xc6b   : > { %7012 = vmatpush3.bf16.msra.mxu0 %v7280_v35 }
 0xc6c   : > { %7013 = vmatprep.subr.bf16.mxu0 %v7888_v28 }
 0xc6f   : > { %7014 = vmatpush3.bf16.msra.mxu0 %v7281_v49 }
 0xc70   : > { %7015 = vmatprep.subr.bf16.mxu0 %v7888_v28 }
 0xc73   : > { %7016 = vmatpush3.bf16.msra.mxu0 %v7282_v39 }
 0xc74   : > { %7017 = vmatprep.subr.bf16.mxu0 %v7888_v28 }
 0xd10   : > { %v4844_v9 = vpop.f32.mrb[44].mxu0 }
 0xd11   : > { %v6961_v43 = vpop.f32.mrb[45].mxu0 }
 0xd12   : > { %v4847_v44 = vpop.f32.mrb[46].mxu0 }
 0xd13   : > { %v6962_v60 = vpop.f32.mrb[47].mxu0 }
 0xd18   : > { %v4890_v22 = vpop.f32.mrb[72].mxu1 }
 0xd19   : > { %v6967_v38 = vpop.f32.mrb[73].mxu1 }
 0xd1a   : > { %v4893_v25 = vpop.f32.mrb[74].mxu1 }
 0xd1b   : > { %v6968_v46 = vpop.f32.mrb[75].mxu1 }
 0xd20   : > { %v4936_v47 = vpop.f32.mrb[48].mxu0 }
 0xd21   : > { %v6973_v45 = vpop.f32.mrb[49].mxu0 }
 0xd22   : > { %v4939_v29 = vpop.f32.mrb[50].mxu0 }
 0xd23   : > { %v6974_v50 = vpop.f32.mrb[51].mxu0 }
 0xd28   : > { %v4982_v55 = vpop.f32.mrb[76].mxu1  ;;  %v5028_v57 = vpop.f32.mrb[52].mxu0 }
 0xd29   : > { %v5172_v37 = vcombine.low %v4844_v9, %v5028_v57  ;;  %v5173_v58 = vcombine.high %v4844_v9, %v5028_v57  ;;  %v6979_v41 = vpop.f32.mrb[77].mxu1  ;;  %v6985_v26 = vpop.f32.mrb[53].mxu0 }
 0xd2a   : > { %v4985_v59 = vpop.f32.mrb[78].mxu1  ;;  %v5031_v32 = vpop.f32.mrb[54].mxu0 }
 0xd2b   : > { %v6980_v12 = vpop.f32.mrb[79].mxu1  ;;  %v6986_v61 = vpop.f32.mrb[55].mxu0  ;;  %v5180_v30 = vrot.slane %v5172_v37, %v8557_v3  ;;  %v5187_v33 = vrot.slane %v5173_v58, %v8557_v3 }
 0xd30   : > { %v5074_v42 = vpop.f32.mrb[80].mxu1  ;;  %v5120_v62 = vpop.f32.mrb[56].mxu0 }
 0xd31   : > { %v5240_v63 = vcombine.low %v4890_v22, %v5074_v42  ;;  %v5241_v40 = vcombine.high %v4890_v22, %v5074_v42  ;;  %v5188_v56 = vcombine.low %v4936_v47, %v5120_v62  ;;  %v5189_v0 = vcombine.high %v4936_v47, %v5120_v62  ;;  %v6991_v2 = vpop.f32.mrb[81].mxu1  ;;  %v6997_v36 = vpop.f32.mrb[57].mxu0 }
 0xd32   : > { %v5077_v5 = vpop.f32.mrb[82].mxu1  ;;  %v5123_v7 = vpop.f32.mrb[58].mxu0  ;;  %v7283_v36 = vld [vmem:[%s8464_s29 + $0x30] sm:$0xff]  }
 0xd33   : > { %v5196_v8 = vrot.slane %v5188_v56, %v8557_v3  ;;  %v5203_v10 = vrot.slane %v5189_v0, %v8557_v3  ;;  %v6992_v11 = vpop.f32.mrb[83].mxu1  ;;  %v6998_v48 = vpop.f32.mrb[59].mxu0  ;;  %v5248_v38 = vrot.slane %v5240_v63, %v8557_v3  ;;  %v5255_v25 = vrot.slane %v5241_v40, %v8557_v3  ;;  %7018 = vmatpush3.bf16.msra.mxu0 %v7283_v36 }
 0xd34   : > { %7019 = vmatprep.subr.bf16.mxu0 %v7888_v28 }
 0xd35   : > { %v5204_v18 = vcombine.low %v5180_v30, %v5196_v8  ;;  %v5205_v54 = vcombine.high %v5180_v30, %v5196_v8  ;;  %v5220_v19 = vcombine.low %v5187_v33, %v5203_v10  ;;  %v5221_v21 = vcombine.high %v5187_v33, %v5203_v10 }
 0xd37   : > { %v5212_v15 = vrot.slane %v5204_v18, %v8561_v6  ;;  %v5219_v23 = vrot.slane %v5205_v54, %v8561_v6  ;;  %v5228_v17 = vrot.slane %v5220_v19, %v8561_v6  ;;  %v5235_v51 = vrot.slane %v5221_v21, %v8561_v6  ;;  %v7284_v18 = vld [vmem:[%s8464_s29 + $0x38] sm:$0xff]   ;;  %s7706_s29 = scalar_lea.vmem %s9360_s3, 256 }
 0xd38   : > { %7020 = vmatpush3.bf16.msra.mxu0 %v7284_v18  ;;  %v7297_v18 = vld [vmem:[%s8467_s1 + $0x40] ss:$8 sps:$4 sm:$0xff]   ;;  %p7707_p1 = scmp.ne.s32.totalorder %s9360_s3, %s7706_s29 }
 0xd39   : > { %v5166_v1 = vpop.f32.mrb[84].mxu1  ;;  %v5308_v27 = vcombine.low %v5212_v15, %v5219_v23  ;;  %v6568_v34 = vcombine.high %v5212_v15, %v5219_v23  ;;  %v5324_v4 = vcombine.low %v5228_v17, %v5235_v51  ;;  %v6569_v16 = vcombine.high %v5228_v17, %v5235_v51 }
 0xd3a   : > { %v7003_v13 = vpop.f32.mrb[85].mxu1  ;;  %v5256_v35 = vcombine.low %v4982_v55, %v5166_v1  ;;  %v5257_v49 = vcombine.high %v4982_v55, %v5166_v1  ;;  %p7708_p4 = pnand %p7707_p1, %p9589_p6 }
 0xd3b   : > { %v5169_v39 = vpop.f32.mrb[86].mxu1  ;;  %v5315_v9 = vrot.slane %v5308_v27, %v8557_v3  ;;  %v5323_v43 = vrot.slane %v6568_v34, %v8557_v3  ;;  %v5331_v44 = vrot.slane %v5324_v4, %v8557_v3  ;;  %v5339_v60 = vrot.slane %v6569_v16, %v8557_v3 }
 0xd3c   : > { %v7004_v22 = vpop.f32.mrb[87].mxu1  ;;  %v5264_v46 = vrot.slane %v5256_v35, %v8557_v3  ;;  %v5271_v47 = vrot.slane %v5257_v49, %v8557_v3  ;;  %p7709_p9 = pneg %p7708_p4 }
 0xd3d   : > { %v5341_v45 = vcombine.high %v5315_v9, %v5323_v43  ;;  %v5357_v29 = vcombine.high %v5331_v44, %v5339_v60  ;;  %v5340_v50 = vcombine.low %v5315_v9, %v5323_v43  ;;  %v5356_v55 = vcombine.low %v5331_v44, %v5339_v60 }
 0xd3e   : > { %v5272_v57 = vcombine.low %v5248_v38, %v5264_v46  ;;  %v5273_v37 = vcombine.high %v5248_v38, %v5264_v46  ;;  %v5288_v58 = vcombine.low %v5255_v25, %v5271_v47  ;;  %v5289_v41 = vcombine.high %v5255_v25, %v5271_v47 }
 0xd3f   : > { %v5355_v26 = vrot.slane %v5341_v45, %v8561_v6  ;;  %v5371_v59 = vrot.slane %v5357_v29, %v8561_v6  ;;  %v5348_v32 = vrot.slane %v5340_v50, %v8561_v6  ;;  %v5364_v12 = vrot.slane %v5356_v55, %v8561_v6 }
 0xd40   : > { %v5280_v61 = vrot.slane %v5272_v57, %v8561_v6  ;;  %v5287_v42 = vrot.slane %v5273_v37, %v8561_v6  ;;  %v5296_v62 = vrot.slane %v5288_v58, %v8561_v6  ;;  %v5303_v63 = vrot.slane %v5289_v41, %v8561_v6  ;;  %v9280_v57 = vld [vmem:[%s8477_s20] sm:$0xff] }
 0xd41   : > { %v5374_v40 = vcombine.low %v5355_v26, %v5371_v59  ;;  %v5372_v56 = vcombine.low %v5348_v32, %v5364_v12  ;;  %v5373_v0 = vcombine.high %v5348_v32, %v5364_v12  ;;  %v5375_v2 = vcombine.high %v5355_v26, %v5371_v59 }
 0xd42   : > { %v5376_v5 = vcombine.low %v5280_v61, %v5287_v42  ;;  %v6570_v7 = vcombine.high %v5280_v61, %v5287_v42  ;;  %v5392_v30 = vcombine.low %v5296_v62, %v5303_v63  ;;  %v6571_v33 = vcombine.high %v5296_v62, %v5303_v63  ;;  %v7285_v62 = vld [vmem:[%s8467_s1] ss:$8 sps:$4 sm:$0xff]   ;;  %v7287_v63 = vld [vmem:[%s8467_s1 + $0x4] ss:$8 sps:$4 sm:$0xff]  }
 0xd43   : > { %v5493_v55 = vsub.s32 4, %v8516_v31  ;;  %5725 = vmatprep.subr.bf16.mxu1 %v7287_v63 }
 0xd44   : > { %v5383_v8 = vrot.slane %v5376_v5, %v8557_v3  ;;  %v5391_v10 = vrot.slane %v6570_v7, %v8557_v3  ;;  %v5399_v11 = vrot.slane %v5392_v30, %v8557_v3  ;;  %v5407_v48 = vrot.slane %v6571_v33, %v8557_v3  ;;  %5726 = vmatpush1.bf16.msra.mxu1 %v7285_v62  ;;  %v7293_v33 = vld [vmem:[%s8467_s1 + $0x24] ss:$8 sps:$4 sm:$0xff]  }
 0xd45   : > { %v5494_v37 = vrot.slane %v9280_v57, %v5493_v55  ;;  %v7407_v62 = vld [vmem:[%s8477_s20 + $0x8] sm:$0xff] }
 0xd46   : > { %v5409_v54 = vcombine.high %v5383_v8, %v5391_v10  ;;  %v5425_v19 = vcombine.high %v5399_v11, %v5407_v48  ;;  %v5408_v21 = vcombine.low %v5383_v8, %v5391_v10  ;;  %v5424_v15 = vcombine.low %v5399_v11, %v5407_v48  ;;  %v7291_v8 = vld [vmem:[%s8467_s1 + $0x20] ss:$8 sps:$4 sm:$0xff]   ;;  %v7296_v10 = vld [vmem:[%s8467_s1 + $0x34] ss:$8 sps:$4 sm:$0xff]   ;;  %v7294_v11 = vld [vmem:[%s8467_s1 + $0x30] ss:$8 sps:$4 sm:$0xff]  }
 0xd47   : > { %v7299_v48 = vld [vmem:[%s8467_s1 + $0x44] ss:$8 sps:$4 sm:$0xff]  }
 0xd48   : > { %v5423_v23 = vrot.slane %v5409_v54, %v8561_v6  ;;  %v5439_v17 = vrot.slane %v5425_v19, %v8561_v6  ;;  %v5416_v51 = vrot.slane %v5408_v21, %v8561_v6  ;;  %v5432_v1 = vrot.slane %v5424_v15, %v8561_v6  ;;  %v7302_v54 = vld [vmem:[%s8467_s1 + $0x54] ss:$8 sps:$4 sm:$0xff]   ;;  %v7300_v19 = vld [vmem:[%s8467_s1 + $0x50] ss:$8 sps:$4 sm:$0xff]   ;;  %v7305_v21 = vld [vmem:[%s8467_s1 + $0x64] ss:$8 sps:$4 sm:$0xff]  }
 0xd49   : > { %v7303_v15 = vld [vmem:[%s8467_s1 + $0x60] ss:$8 sps:$4 sm:$0xff]  }
 0xd4a   : > { %v5442_v27 = vcombine.low %v5423_v23, %v5439_v17  ;;  %v5441_v34 = vcombine.high %v5416_v51, %v5432_v1  ;;  %v5440_v4 = vcombine.low %v5416_v51, %v5432_v1  ;;  %v5443_v3 = vcombine.high %v5423_v23, %v5439_v17  ;;  %v7308_v23 = vld [vmem:[%s8467_s1 + $0x74] ss:$8 sps:$4 sm:$0xff]   ;;  %v7306_v17 = vld [vmem:[%s8467_s1 + $0x70] ss:$8 sps:$4 sm:$0xff]   ;;  %v7309_v51 = vld [vmem:[%s8474_s28 + $0x40] sm:$0xff]  }
 0xd4b   : > { %v7310_v1 = vld [vmem:[%s8474_s28] sm:$0xff]   ;;  %6731 = vmatprep.subr.bf16.mxu0 %v7309_v51 }
 0xd4c   : > { %v7195_v16 = vpack.i.bf16 %v5442_v27, %v5374_v40  ;;  %v7190_v28 = vpack.i.bf16 %v5441_v34, %v5373_v0  ;;  %v7200_v13 = vpack.i.bf16 %v5443_v3, %v5375_v2  ;;  %v7290_v40 = vld [vmem:[%s8467_s1 + $0x14] ss:$8 sps:$4 sm:$0xff]   ;;  %v7311_v27 = vld [vmem:[%s8474_s28 + $0x48] sm:$0xff]  }
 0xd4d   : > { %5727 = vmatprep.subr.bf16.mxu1 %v7290_v40  ;;  %v7312_v34 = vld [vmem:[%s8474_s28 + $0x8] sm:$0xff]   ;;  %v7314_v3 = vld [vmem:[%s8474_s28 + $0x10] sm:$0xff]  }
 0xd4e   : > { %7196 = vrot.lane.b32.xlu1 %v7195_v16, %s7891_s24  ;;  %7191 = vrot.lane.b32.xlu0 %v7190_v28, %s7889_s5  ;;  %v7315_v16 = vld [vmem:[%s8474_s28 + $0x58] sm:$0xff]  }
 0xd4f   : > { %v7316_v28 = vld [vmem:[%s8474_s28 + $0x18] sm:$0xff]  }
 0xd52   : > { %7201 = vrot.lane.b32.xlu1 %v7200_v13, %s7890_s11  ;;  %v7317_v13 = vld [vmem:[%s8474_s28 + $0x60] sm:$0xff]  }
 0xdc0   : > { %v7197_v35 = vpop.permute.xlu1 %7196  ;;  %v7192_v49 = vpop.permute.xlu0 %7191 }
 0xdc1   : > { %v7194_v39 = vunpack.i.h.bf16 %v7192_v49  ;;  %v7193_v9 = vunpack.i.l.bf16 %v7192_v49  ;;  %v7199_v43 = vunpack.i.h.bf16 %v7197_v35  ;;  %v7198_v6 = vunpack.i.l.bf16 %v7197_v35  ;;  %v7318_v35 = vld [vmem:[%s8474_s28 + $0x20] sm:$0xff]   ;;  %v7319_v49 = vld [vmem:[%s8474_s28 + $0x68] sm:$0xff]  }
 0xdc3   : > { %v5468_v44 = vsel %vm1943_vm3, %v5372_v56, %v7193_v9  ;;  %v5469_v60 = vsel %vm1943_vm3, %v5440_v4, %v7194_v39  ;;  %v7288_v56 = vld [vmem:[%s8467_s1 + $0x10] ss:$8 sps:$4 sm:$0xff]   ;;  %s7710_s1 = sshll.u32 %s7895_s12, 4  ;;  %s7711_s1 = int_to_ptr.vmem [resolvable:$false] %s7710_s1 }
 0xdc4   : > { %v7202_v22 = vpop.permute.xlu1 %7201  ;;  %v5470_v46 = vsel %vm3076_vm6, %v5468_v44, %v7198_v6  ;;  %v5471_v47 = vsel %vm3076_vm6, %v5469_v60, %v7199_v43  ;;  %5728 = vmatpush1.bf16.msra.mxu1 %v7288_v56  ;;  %v7313_v4 = vld [vmem:[%s8474_s28 + $0x50] sm:$0xff]   ;;  %s7712_s15 = scalar_lea.vmem %s7711_s1, 512  ;;  %p7713_p8 = scmp.lt.s32.totalorder %s9360_s3, %s7711_s1 }
 0xdc5   : > { %v7204_v38 = vunpack.i.h.bf16 %v7202_v22  ;;  %v7203_v25 = vunpack.i.l.bf16 %v7202_v22  ;;  %5729 = vmatprep.subr.bf16.mxu1 %v7293_v33  ;;  %p7714_p11 = scmp.lt.s32.totalorder %s7712_s15, %s7706_s29 }
 0xdc7   : > { %v5472_v45 = vsel %vm3079_vm7, %v5470_v46, %v7203_v25  ;;  %v5473_v29 = vsel %vm3079_vm7, %v5471_v47, %v7204_v38  ;;  %v9323_v38 = vld [vmem:[%s8477_s20 + $0x18] sm:$0xff]  ;;  %p7715_p5 = por %p7714_p11, %p7713_p8 }
 0xdc8   : > { %v5474_v50 = vpack.c.bf16 %v5473_v29, %v5472_v45  ;;  %5730 = vmatpush1.bf16.msra.mxu1 %v7291_v8  ;;  %v5611_v25 = vrot.slane %v9323_v38, %v3101_v24  ;;  %v5617_v45 = vrot.slane %v9323_v38, %v3248_v20  ;;  %v7321_v24 = vld [vmem:[%s8474_s28 + $0x70] sm:$0xff]   ;;  %v5639_v20 = vsub.s32 5, %v8516_v31 }
 0xdc9   : > { %5731 = vmatprep.subr.bf16.mxu1 %v7296_v10  ;;  %p7716_p3 = pnand %p7715_p5, %p7709_p9 }
 0xdca   : > { %7022 = vmatmul.mubr.bf16.vlgmr.msra.gmra.mrb[60].mxu0 %v5474_v50  ;;  %v5644_v63 = vrot.slane %v7407_v62, %v5639_v20 }
 0xdcb   : > { %6732 = vmatpush3.bf16.msra.mxu0 %v7310_v1 }
 0xdcc   : > { %5732 = vmatpush1.bf16.msra.mxu1 %v7294_v11  ;;  %6733 = vmatprep.subr.bf16.mxu0 %v7311_v27 }
 0xdcd   : > { %5733 = vmatprep.subr.bf16.mxu1 %v7299_v48  ;;  %v5808_v48 = vsub.s32 6, %v8516_v31 }
 0xdcf   : > { %6734 = vmatpush3.bf16.msra.mxu0 %v7312_v34 }
 0xdd0   : > { %5734 = vmatpush1.bf16.msra.mxu1 %v7297_v18  ;;  %6735 = vmatprep.subr.bf16.mxu0 %v7313_v4 }
 0xdd1   : > { %5735 = vmatprep.subr.bf16.mxu1 %v7302_v54  ;;  %v5809_v54 = vrot.slane %v9280_v57, %v5808_v48 }
 0xdd3   : > { %6736 = vmatpush3.bf16.msra.mxu0 %v7314_v3 }
 0xdd4   : > { %5736 = vmatpush1.bf16.msra.mxu1 %v7300_v19  ;;  %6737 = vmatprep.subr.bf16.mxu0 %v7315_v16 }
 0xdd5   : > { %5737 = vmatprep.subr.bf16.mxu1 %v7305_v21 }
 0xdd7   : > { %6738 = vmatpush3.bf16.msra.mxu0 %v7316_v28 }
 0xdd8   : > { %5738 = vmatpush1.bf16.msra.mxu1 %v7303_v15  ;;  %6739 = vmatprep.subr.bf16.mxu0 %v7317_v13 }
 0xdd9   : > { %5739 = vmatprep.subr.bf16.mxu1 %v7308_v23 }
 0xddb   : > { %6740 = vmatpush3.bf16.msra.mxu0 %v7318_v35 }
 0xddc   : > { %5740 = vmatpush1.bf16.msra.mxu1 %v7306_v17  ;;  %6741 = vmatprep.subr.bf16.mxu0 %v7319_v49 }
 0xe9d   : > { %v5577_v58 = vpop.f32.mrb[60].mxu0 }
 0xe9e   : > { %v5578_v41 = vadd.f32 %v5577_v58, %v5494_v37  ;;  %v7023_v26 = vpop.f32.mrb[61].mxu0 }
 0xe9f   : > { %v5580_v59 = vpop.f32.mrb[62].mxu0 }
 0xea0   : > { %v5581_v32 = vadd.f32 %v5580_v59, %v5494_v37  ;;  %v7024_v12 = vpop.f32.mrb[63].mxu0  ;;  %v5584_v61 = vadd.f32 %v5578_v41, %v8937_v52  ;;  %v7320_v59 = vld [vmem:[%s8474_s28 + $0x28] sm:$0xff]  }
 0xea1   : > { %6742 = vmatpush3.bf16.msra.mxu0 %v7320_v59  ;;  %v7323_v12 = vld [vmem:[%s8474_s28 + $0x78] sm:$0xff]  }
 0xea2   : > { %5586 = vadd.xlane.f32.xlu0 %v5584_v61  ;;  %v5585_v42 = vadd.f32 %v5581_v32, %v8939_v53  ;;  %v7322_v32 = vld [vmem:[%s8474_s28 + $0x30] sm:$0xff]   ;;  %6743 = vmatprep.subr.bf16.mxu0 %v7321_v24 }
 0xea4   : > { %5588 = vadd.xlane.f32.xlu1 %v5585_v42 }
 0xea5   : > { %6744 = vmatpush3.bf16.msra.mxu0 %v7322_v32 }
 0xea6   : > { %6745 = vmatprep.subr.bf16.mxu0 %v7323_v12 }
 0xf2f   : > { %v5587_v0 = vpop.xlane.xlu0 %5586 }
 0xf30   : > { %v5590_v2 = vmul.f32 0.0078125, %v5587_v0 }
 0xf31   : > { %v5589_v36 = vpop.xlane.xlu1 %5588 }
 0xf32   : > { %v9291_v52 = vsub.f32 %v5584_v61, %v5590_v2  ;;  %v5591_v53 = vmul.f32 0.0078125, %v5589_v36  ;;  %v7324_v61 = vld [vmem:[%s8474_s28 + $0x38] sm:$0xff]  }
 0xf33   : > { %6746 = vmatpush3.bf16.msra.mxu0 %v7324_v61 }
 0xf34   : > { %v9293_v5 = vsub.f32 %v5585_v42, %v5591_v53  ;;  %v5594_v7 = vmul.f32 %v9291_v52, %v9291_v52  ;;  %v5640_v42 = vrot.slane %v9280_v57, %v5639_v20 }
 0xf36   : > { %5596 = vadd.xlane.f32.xlu0 %v5594_v7  ;;  %v5595_v30 = vmul.f32 %v9293_v5, %v9293_v5 }
 0xf3a   : > { %5598 = vadd.xlane.f32.xlu0 %v5595_v30 }
 0xfc3   : > { %v5597_v39 = vpop.xlane.xlu0 %5596 }
 0xfc4   : > { %v5600_v9 = vmul.f32 0.0078125, %v5597_v39 }
 0xfc6   : > { %v5602_v43 = vadd.f32 1e-05, %v5600_v9 }
 0xfc7   : > { %v5599_v6 = vpop.xlane.xlu0 %5598 }
 0xfc8   : > { %7393 = vrsqrt.f32 %v5602_v43  ;;  %v5601_v44 = vmul.f32 0.0078125, %v5599_v6 }
 0xfca   : > { %v5603_v60 = vadd.f32 1e-05, %v5601_v44 }
 0xfcc   : > { %7395 = vrsqrt.f32 %v5603_v60 }
 0xfd2   : > { %v7394_v22 = vpop.eup %7393 }
 0xfd3   : > { %v5606_v46 = vmul.f32 %v7394_v22, %v9291_v52 }
 0xfd5   : > { %v5612_v50 = vmul.f32 %v5611_v25, %v5606_v46 }
 0xfd6   : > { %v7396_v47 = vpop.eup %7395 }
 0xfd7   : > { %v5607_v29 = vmul.f32 %v7396_v47, %v9293_v5  ;;  %v5618_v58 = vadd.f32 %v5617_v45, %v5612_v50 }
 0xfd9   : > { %v5613_v37 = vmul.f32 %v5611_v25, %v5607_v29 }
 0xfdb   : > { %v5619_v41 = vadd.f32 %v5617_v45, %v5613_v37 }
 0xfdd   : > { %v5620_v26 = vpack.c.bf16 %v5619_v41, %v5618_v58 }
 0xfdf   : > { %5758 = vmatmul.mubr.bf16.vlgmr.msra.gmra.mrb[88].mxu1 %v5620_v26 }
0x10b2   : > { %v5759_v40 = vpop.f32.mrb[88].mxu1 }
0x10b3   : > { %v5760_v56 = vadd.f32 %v5759_v40, %v5640_v42  ;;  %v5761_v0 = vpop.f32.mrb[89].mxu1 }
0x10b4   : > { %v5762_v2 = vadd.f32 %v5761_v0, %v5644_v63  ;;  %v5763_v36 = vpop.f32.mrb[90].mxu1 }
0x10b5   : > { %v5764_v52 = vadd.f32 %v5763_v36, %v5640_v42  ;;  %v5765_v53 = vpop.f32.mrb[91].mxu1  ;;  %v5768_v7 = vmax.f32 %v5760_v56, 0.0 }
0x10b6   : > { %v5766_v5 = vadd.f32 %v5765_v53, %v5644_v63  ;;  %v5769_v33 = vmax.f32 %v5762_v2, 0.0 }
0x10b7   : > { %v5770_v30 = vmax.f32 %v5764_v52, 0.0 }
0x10b8   : > { %v5771_v8 = vmax.f32 %v5766_v5, 0.0 }
0x10b9   : > { %v5772_v10 = vpack.c.bf16 %v5770_v30, %v5768_v7 }
0x10ba   : > { %v5773_v11 = vpack.c.bf16 %v5771_v8, %v5769_v33 }
0x10bc   : > { %5938 = vmatprep.mubr.bf16.mxu0 %v5773_v11 }
0x10bd   : > { %5939 = vmatmul.mubr.bf16.vlgmr.msra.gmra.mrb[64].mxu0 %v5772_v10 }
0x1190   : > { %v6747_v18 = vpop.f32.mrb[64].mxu0 }
0x1191   : > { %v6748_v19 = vpop.f32.mrb[65].mxu0 }
0x1192   : > { %v6749_v21 = vadd.f32 %v6748_v19, %v6747_v18  ;;  %v6750_v15 = vpop.f32.mrb[66].mxu0 }
0x1193   : > { %v6751_v23 = vpop.f32.mrb[67].mxu0 }
0x1194   : > { %v5941_v17 = vadd.f32 %v6749_v21, %v5809_v54  ;;  %v6752_v51 = vadd.f32 %v6751_v23, %v6750_v15 }
0x1196   : > { %v5944_v1 = vadd.f32 %v6752_v51, %v5809_v54  ;;  %v5947_v27 = vadd.f32 %v5941_v17, %v5618_v58 }
0x1198   : > { %5949 = vadd.xlane.f32.xlu1 %v5947_v27  ;;  %v5948_v34 = vadd.f32 %v5944_v1, %v5619_v41 }
0x119a   : > { %5951 = vadd.xlane.f32.xlu0 %v5948_v34 }
0x1225   : > { %v5950_v4 = vpop.xlane.xlu1 %5949 }
0x1226   : > { %v5953_v3 = vmul.f32 0.0078125, %v5950_v4 }
0x1227   : > { %v5952_v16 = vpop.xlane.xlu0 %5951 }
0x1228   : > { %v9343_v57 = vsub.f32 %v5947_v27, %v5953_v3  ;;  %v5954_v28 = vmul.f32 0.0078125, %v5952_v16 }
0x122a   : > { %v9345_v13 = vsub.f32 %v5948_v34, %v5954_v28  ;;  %v5957_v35 = vmul.f32 %v9343_v57, %v9343_v57 }
0x122c   : > { %5959 = vadd.xlane.f32.xlu1 %v5957_v35  ;;  %v5958_v49 = vmul.f32 %v9345_v13, %v9345_v13 }
0x122e   : > { %5961 = vadd.xlane.f32.xlu0 %v5958_v49 }
0x122f   : > { %7719 = shalt.err (!%p7716_p3)
}
0x1230   : > { %s7720_s28 = scalar_lea.hbm %s9357_s22, 256  ;;  %s7724_s17 = scalar_lea.hbm %s9588_s18, 512 }
0x1231   : > { %p7721_p13 = scmp.ne.s32.totalorder %s9357_s22, %s7720_s28  ;;  %p7725_p12 = scmp.lt.u32.totalorder %s9357_s22, %s9588_s18 }
0x1232   : > { %p7726_p7 = scmp.lt.u32.totalorder %s7724_s17, %s7720_s28  ;;  %p7728_p1 = scmp.lt.u32.totalorder %s7720_s28, %s9357_s22 }
0x1233   : > { %p7722_p0 = pnand %p7721_p13, %p9589_p6 }
0x1234   : > { %p7727_p10 = por %p7726_p7, %p7725_p12 }
0x1235   : > { %p7723_p2 = pneg %p7722_p0 }
0x1236   : > { %p7729_p4 = por %p7728_p1, %p7727_p10 }
0x1238   : > { %p7730_p9 = pnand %p7729_p4, %p7723_p2 }
0x123a   : > { %7733 = shalt.err (!%p7730_p9)
}
0x123b   : > { %s7896_s11 = smov 128   ;;  %s7897_s24 = smov 8  }
0x123c   : > { %7055 = dma.vmem_to_hbm [thread:$0]  (%p9589_p6), %s9360_s3, 256, %s9357_s22, %s5990_s27, %s7896_s11, %s7896_s11, %s7897_s24  }
0x123d   : > { %s9590_s26 = sld [smem:[#allocation49_spill]]  ;;  %s6044_s1 = sshll.u32 %s8487_s23, 4  ;;  %s9397_s1 = int_to_ptr.vmem [resolvable:$true] %s6044_s1 }
0x123e   : > { %s7734_s15 = scalar_lea.vmem %s9397_s1, 256  ;;  %s7898_s28 = smov [#allocation23]  }
0x123f   : > { %p7735_p8 = scmp.ne.s32.totalorder %s9397_s1, %s7734_s15  ;;  %s7738_s21 = sshll.u32 %s7898_s28, 4  ;;  %s7739_s21 = int_to_ptr.vmem [resolvable:$false] %s7738_s21 }
0x1240   : > { %s7740_s10 = scalar_lea.vmem %s7739_s21, 512  ;;  %p7741_p3 = scmp.lt.s32.totalorder %s9397_s1, %s7739_s21 }
0x1241   : > { %p7736_p11 = pnand %p7735_p8, %p9589_p6  ;;  %p7742_p13 = scmp.lt.s32.totalorder %s7740_s10, %s7734_s15 }
0x1243   : > { %s9591_s29 = smov %s9590_s26  ;;  %s9394_s12 = scalar_lea.hbm %s9590_s26, %s6629_s7 }
0x1244   : > { %p7737_p5 = pneg %p7736_p11  ;;  %p7743_p0 = por %p7742_p13, %p7741_p3 }
0x1246   : > { %p7744_p2 = pnand %p7743_p0, %p7737_p5 }
0x1248   : > { %7747 = shalt.err (!%p7744_p2)
}
0x1249   : > { %s7748_s23 = scalar_lea.hbm %s9394_s12, 256  ;;  %s7752_s3 = scalar_lea.hbm %s9591_s29, 512 }
0x124a   : > { %p7749_p12 = scmp.ne.s32.totalorder %s9394_s12, %s7748_s23  ;;  %p7753_p1 = scmp.lt.u32.totalorder %s9394_s12, %s9591_s29 }
0x124b   : > { %p7754_p4 = scmp.lt.u32.totalorder %s7752_s3, %s7748_s23  ;;  %p7756_p8 = scmp.lt.u32.totalorder %s7748_s23, %s9394_s12 }
0x124c   : > { %p7750_p7 = pnand %p7749_p12, %p9589_p6 }
0x124d   : > { %p7755_p9 = por %p7754_p4, %p7753_p1 }
0x124e   : > { %p7751_p10 = pneg %p7750_p7 }
0x124f   : > { %p7757_p11 = por %p7756_p8, %p7755_p9 }
0x1251   : > { %p7758_p5 = pnand %p7757_p11, %p7751_p10 }
0x1253   : > { %7761 = shalt.err (!%p7758_p5)
}
0x1254   : > { %7056 = dma.vmem_to_hbm [thread:$0]  (%p9589_p6), %s9397_s1, 256, %s9394_s12, %s5990_s27, %s7896_s11, %s7896_s11, %s7897_s24   ;;  %v5974_v22 = vrot.slane %v9323_v38, %v8922_v14  ;;  %v5980_v46 = vrot.slane %v9323_v38, %v5493_v55 }
0x1255   : > { %s9592_s9 = sld [smem:[#allocation38_spill]]  ;;  %s7899_s30 = smov [#allocation20]  }
0x1256   : > { %s6008_s27 = sshll.u32 %s7899_s30, 4  ;;  %s6009_s27 = int_to_ptr.vmem [resolvable:$true] %s6008_s27 }
0x1257   : > { %s7762_s14 = scalar_lea.vmem %s6009_s27, 256  ;;  %p7769_p2 = scmp.lt.s32.totalorder %s6009_s27, %s6009_s27 }
0x1258   : > { %p7763_p6 = scmp.ne.s32.totalorder %s6009_s27, %s7762_s14  ;;  %p7770_p12 = scmp.lt.s32.totalorder %s7762_s14, %s7762_s14 }
0x125a   : > { %p7771_p7 = por %p7770_p12, %p7769_p2 }
0x125b   : > { %p9593_p3 = scmp.eq.s32.totalorder %s9592_s9, 1 }
0x125d   : > { %p7764_p13 = pnand %p7763_p6, %p9593_p3 }
0x125f   : > { %p7765_p0 = pneg %p7764_p13 }
0x1261   : > { %p7772_p10 = pnand %p7771_p7, %p7765_p0 }
0x12b9   : > { %v5960_v39 = vpop.xlane.xlu1 %5959 }
0x12ba   : > { %v5963_v9 = vmul.f32 0.0078125, %v5960_v39 }
0x12bb   : > { %v5962_v43 = vpop.xlane.xlu0 %5961 }
0x12bc   : > { %v5965_v6 = vadd.f32 1e-05, %v5963_v9  ;;  %v5964_v44 = vmul.f32 0.0078125, %v5962_v43 }
0x12be   : > { %7397 = vrsqrt.f32 %v5965_v6  ;;  %v5966_v60 = vadd.f32 1e-05, %v5964_v44 }
0x12c0   : > { %7399 = vrsqrt.f32 %v5966_v60 }
0x12c8   : > { %v7398_v25 = vpop.eup %7397 }
0x12c9   : > { %v5969_v47 = vmul.f32 %v7398_v25, %v9343_v57 }
0x12ca   : > { %v7400_v45 = vpop.eup %7399 }
0x12cb   : > { %v5970_v29 = vmul.f32 %v7400_v45, %v9345_v13  ;;  %v5975_v50 = vmul.f32 %v5974_v22, %v5969_v47 }
0x12cd   : > { %v5976_v37 = vmul.f32 %v5974_v22, %v5970_v29  ;;  %v5981_v58 = vadd.f32 %v5980_v46, %v5975_v50 }
0x12cf   : > { %v5982_v41 = vadd.f32 %v5980_v46, %v5976_v37  ;;  %5983 = vst [vmem:[#allocation20] sm:$0xff] %v5981_v58 }
0x12d1   : > { %5984 = vst [vmem:[#allocation20 + $0x8] sm:$0xff] %v5982_v41 }
0x12d2   : > { %7775 = shalt.err (!%p7772_p10)
}
0x12d3   : > { %s9594_s19 = sld [smem:[#allocation47_spill]]  ;;  %p9595_p4 = pmov %p9593_p3 }
0x12d9   : > { %s7776_s26 = scalar_lea.hbm %s9594_s19, 256 }
0x12da   : > { %p7777_p1 = scmp.ne.s32.totalorder %s9594_s19, %s7776_s26  ;;  %p7782_p11 = scmp.lt.u32.totalorder %s7776_s26, %s9594_s19 }
0x12dc   : > { %p7778_p9 = pnand %p7777_p1, %p9595_p4 }
0x12de   : > { %p7779_p8 = pneg %p7778_p9 }
0x12e0   : > { %p7784_p5 = pnand %p7782_p11, %p7779_p8 }
0x12e2   : > { %7787 = shalt.err (!%p7784_p5)
}
0x12e3   : > { %p9596_p6 = pmov %p9593_p3 }
0x12e5   : > { %7054 = dma.vmem_to_hbm [thread:$0]  (%p9596_p6), %s6009_s27, 256, %s9594_s19, [#allocation5], %s7896_s11, %s7896_s11, %s7897_s24  }
0x12e6   : > { %7837 = dma.done.wait (%p9593_p3), [#allocation5], 256   ;;  %p9597_p13 = pmov %p9593_p3 }
0x12e8   : > { %7839 = vsyncadd (%p9597_p13), [#allocation5], 4294967040 }
0x12e9 PF: > { %s9598_s23 = sld [smem:[#allocation35_spill]]  ;;  %s9600_s22 = sld [smem:[#allocation41_spill]] }
0x12ef   : > { %s9599_s7 = sadd.s32 4294967294, %s9598_s23   ;;  %p9601_p0 = scmp.ne.s32.totalorder %s9600_s22, 0 }
0x12f0   : > { %s6063_s3 = sand.u32 1, %s9599_s7   ;;  %p9602_p2 = scmp.ge.s32.totalorder %s9598_s23, 2 }
0x12f1   : > { %s6064_s20 = scalar_lea.sflag [#allocation22], %s6063_s3 }
0x12f2   : > { %p7094_p12 = pnand %p9602_p2, %p9601_p0 }
0x12f4   : > { %7841 = dma.done.wait (!%p7094_p12), %s6064_s20, 512  }
0x12f5   : > { %7843 = vsyncadd (!%p7094_p12), %s6064_s20, 4294966784  ;;  %s43_s26 = sadd.s32 1, %s9598_s23   ;;  %s9603_s21 = sld [smem:[#allocation32_spill]] }
0x12f6   : > { %p40_p7 = scmp.ge.s32.totalorder %s43_s26, 4   ;;  %s9604_s22 = sld [smem:[#allocation33_spill]] }
0x12f7   : > { %s9605_s23 = sld [smem:[#allocation37_spill]]  ;;  %s9606_s11 = sld [smem:[#allocation36_spill]] }
0x12f8   : > { %s9607_s24 = smov %s7862_s25  ;;  %42 = sbr.rel (!%p40_p7) target bundleno = 25 (0x19), region = 236 }
0x12fd   : > { %s9608_s25 = smov %s9606_s11 }
0x12ff   :  { %6078 = vsyncpa [#allocation4], 1 }
0x1300   :  { %6080 = vsyncpa [#allocation4 + $0x1], 1 }
0x1301   :  { %6081 = vsyncpa [#allocation7], 1 }
0x1302   :  { %6083 = vsyncpa [#allocation7 + $0x1], 1 }
0x1303   :  { %6084 = vsyncpa [#allocation10], 1 }
0x1304   :  { %6086 = vsyncpa [#allocation10 + $0x1], 1 }
0x1305   :  { %6087 = vsyncpa [#allocation13], 1 }
0x1306   :  { %6089 = vsyncpa [#allocation13 + $0x1], 1 }
0x1307   :  { %6090 = vsyncpa [#allocation16], 1 }
0x1308   :  { %6092 = vsyncpa [#allocation16 + $0x1], 1 }
0x1309   :  { %6093 = vsyncpa [#allocation19], 1 }
0x130a   :  { %6095 = vsyncpa [#allocation19 + $0x1], 1 }
0x130b   :  { %6096 = vsyncpa [#allocation5], 1 }
0x130c   :  { %6098 = vsyncpa [#allocation5 + $0x1], 1 }
0x130d   :  { %6099 = vsyncpa [#allocation22], 1 }
0x130e   :  { %6101 = vsyncpa [#allocation22 + $0x1], 1 }

</bundles_post_ra>
